<compile_context>
chip_gen: v6e
topology: v6e:2x2x1
jax: 0.10.0
libtpu: 0.0.40
codegen_flags: <defaults>
</compile_context>

<pallas_src>
import functools
import math

import jax
import jax.numpy as jnp
from jax.experimental import pallas as pl
from jax.experimental.pallas import tpu as pltpu


# ----------------------------------------------------------------------------
# In-kernel helpers
# ----------------------------------------------------------------------------
def _dot(a, b):
    """MXU matmul: bf16 inputs, f32 accumulation."""
    return jnp.dot(a.astype(jnp.bfloat16), b.astype(jnp.bfloat16),
                   preferred_element_type=jnp.float32)


def _layernorm(x, g, b, eps):
    mu = jnp.mean(x, axis=-1, keepdims=True)
    xc = x - mu
    var = jnp.mean(xc * xc, axis=-1, keepdims=True)
    return xc * jax.lax.rsqrt(var + eps) * g + b


def _gelu(y):
    c = math.sqrt(2.0 / math.pi)
    return 0.5 * y * (1.0 + jnp.tanh(c * (y + 0.044715 * y * y * y)))


# ----------------------------------------------------------------------------
# Pallas kernels
# ----------------------------------------------------------------------------
def _rowmap_kernel(x_ref, w_ref, b_ref, pe_ref, o_ref, *, leaky):
    """y = act(x @ W + b) + PE on a (rows, features) slab (one batch element)."""
    y = _dot(x_ref[0], w_ref[...]) + b_ref[...]
    if leaky:
        y = jnp.where(y > 0, y, 0.1 * y)          # LeakyReLU(0.1)
    o_ref[0] = y + pe_ref[...]


def _block_kernel(x_ref, ln1g_ref, ln1b_ref, wqkv_ref, bqkv_ref, wo_ref, bo_ref,
                  ln2g_ref, ln2b_ref, w1_ref, b1_ref, w2_ref, b2_ref, o_ref,
                  *, heads, eps):
    """Fused pre-LN transformer block for one batch element (T, H)."""
    x = x_ref[0]                                   # (T, H) f32
    T, H = x.shape
    dk = H // heads
    scale = 1.0 / math.sqrt(dk)

    # --- self-attention sublayer ---
    xn = _layernorm(x, ln1g_ref[...], ln1b_ref[...], eps)
    attn = jnp.zeros((T, H), jnp.float32)
    for h in range(heads):                         # static unroll; all in vregs
        q = _dot(xn, wqkv_ref[h]) + bqkv_ref[h]                     # (T, dk)
        k = _dot(xn, wqkv_ref[heads + h]) + bqkv_ref[heads + h]     # (T, dk)
        v = _dot(xn, wqkv_ref[2 * heads + h]) + bqkv_ref[2 * heads + h]
        s = _dot(q, k.T) * scale                                    # (T, T)
        m = jnp.max(s, axis=-1, keepdims=True)
        p = jnp.exp(s - m)
        p = p * pl.reciprocal(jnp.sum(p, axis=-1, keepdims=True), approx=True)
        # head output folded straight into the output projection
        attn = attn + _dot(_dot(p, v), wo_ref[h])                   # (T, H)
    x = x + attn + bo_ref[...]

    # --- feed-forward sublayer ---
    xn2 = _layernorm(x, ln2g_ref[...], ln2b_ref[...], eps)
    hdn = _gelu(_dot(xn2, w1_ref[...]) + b1_ref[...])
    o_ref[0] = x + _dot(hdn, w2_ref[...]) + b2_ref[...]


def _poolfc_kernel(y_ref, w_ref, b_ref, o_ref):
    """Global average pool (over frames + joints, via fused weight) + fc."""
    pooled = jnp.mean(y_ref[...], axis=1)          # (B, Ht): mean over frames
    o_ref[...] = _dot(pooled, w_ref[...]) + b_ref[...]


# ----------------------------------------------------------------------------
# pallas_call wrappers
# ----------------------------------------------------------------------------
_VMEM = pl.BlockSpec(memory_space=pltpu.MemorySpace.VMEM)


def _wspec(a):
    nd = a.ndim
    return pl.BlockSpec(a.shape, lambda b, _n=nd: (0,) * _n)


def rowmap(x, w, b, pe, *, leaky):
    """x: (B, R, K) -> act(x @ w + b) + pe : (B, R, N), one grid step per batch."""
    B, R, K = x.shape
    N = w.shape[1]
    return pl.pallas_call(
        functools.partial(_rowmap_kernel, leaky=leaky),
        out_shape=jax.ShapeDtypeStruct((B, R, N), jnp.float32),
        grid=(B,),
        in_specs=[pl.BlockSpec((1, R, K), lambda i: (i, 0, 0)),
                  _wspec(w), _wspec(b), _wspec(pe)],
        out_specs=pl.BlockSpec((1, R, N), lambda i: (i, 0, 0)),
        compiler_params=pltpu.CompilerParams(dimension_semantics=("parallel",)),
    )(x, w, b, pe)


def transformer_block(x, p, heads):
    """Fused pre-LN BERT block.  x: (B, T, H) -> (B, T, H)."""
    B, T, H = x.shape
    weights = [p["ln1_g"], p["ln1_b"], p["wqkv"], p["bqkv"], p["wo"], p["bo"],
               p["ln2_g"], p["ln2_b"], p["w1"], p["b1"], p["w2"], p["b2"]]
    return pl.pallas_call(
        functools.partial(_block_kernel, heads=heads, eps=1e-5),
        out_shape=jax.ShapeDtypeStruct((B, T, H), jnp.float32),
        grid=(B,),
        in_specs=[pl.BlockSpec((1, T, H), lambda b: (b, 0, 0))]
                 + [_wspec(w) for w in weights],
        out_specs=pl.BlockSpec((1, T, H), lambda b: (b, 0, 0)),
        compiler_params=pltpu.CompilerParams(dimension_semantics=("parallel",)),
    )(x, *weights)


def pool_fc(y, w, b):
    """y: (B, F, Ht) -> (B, num_class)."""
    B = y.shape[0]
    N = w.shape[1]
    return pl.pallas_call(
        _poolfc_kernel,
        out_shape=jax.ShapeDtypeStruct((B, N), jnp.float32),
        in_specs=[_VMEM, _VMEM, _VMEM],
        out_specs=_VMEM,
    )(y, w, b)


# ----------------------------------------------------------------------------
# Model forward (only 3 tiny XLA transposes remain between fused kernels)
# ----------------------------------------------------------------------------
def forward(x, P, cfg):
    """x: (B, F, S, 3) -- matches the PyTorch input before permute(0,3,1,2)."""
    B, F, S, C = x.shape
    Cin = cfg["in_channels"]
    heads = cfg["attn_heads"]

    # rearrange raw input so the fused input_map weight can emit the spatial
    # transformer layout (B, S, Cin*F) directly.
    x_in = jnp.transpose(x, (0, 2, 1, 3)).reshape(B, S, F * C)

    # input_map: 1x1 conv + BN(folded) + LeakyReLU(0.1) + spatial PE
    xs = rowmap(x_in, P["in_w"], P["in_b"], P["pe_s"], leaky=True)

    for blk in P["spatial_blocks"]:
        xs = transformer_block(xs, blk, heads)

    # reproduce the reference reshape(B,S,F,Cin).permute(0,3,2,1) reinterpretation
    # and gather per-frame joint slabs for the fused (1,3)-conv matmul.
    slab = jnp.transpose(xs.reshape(B, S, F, Cin), (0, 2, 1, 3)).reshape(B, F, S * Cin)

    # out_nets: Conv2d(Cin,Cout,(1,3),pad(0,1)) + BN(folded) + temporal PE,
    # emitted directly in the temporal-transformer layout (B, F, Cout*S).
    yt = rowmap(slab, P["out_w"], P["out_b"], P["pe_t"], leaky=False)

    for blk in P["temporal_blocks"]:
        yt = transformer_block(yt, blk, heads)

    # adaptive_avg_pool2d((1,1)) + Dropout(identity) + fc, fused via P["pf_w"].
    return pool_fc(yt, P["pf_w"], P["pf_b"])


# ----------------------------------------------------------------------------
# Positional encoding + deterministic parameter initialization
# ----------------------------------------------------------------------------
def make_pe(channel, joint_num, time_len, domain):
    t_idx = jnp.arange(time_len)
    j_idx = jnp.arange(joint_num)
    if domain == "temporal":
        pos = jnp.repeat(t_idx, joint_num)
    else:  # spatial
        pos = jnp.tile(j_idx, time_len)
    position = pos.astype(jnp.float32)[:, None]
    div_term = jnp.exp(jnp.arange(0, channel, 2).astype(jnp.float32)
                       * (-(math.log(10000.0) / channel)))
    pe = jnp.zeros((time_len * joint_num, channel), jnp.float32)
    pe = pe.at[:, 0::2].set(jnp.sin(position * div_term))
    pe = pe.at[:, 1::2].set(jnp.cos(position * div_term))
    pe = jnp.transpose(pe.reshape(time_len, joint_num, channel), (2, 0, 1))
    return pe  # (C, time_len, joint_num)


def init_params(key, cfg):
    Cin, Cout = cfg["in_channels"], cfg["out_channels"]
    F, S = cfg["num_frame"], cfg["num_node"]
    nc = cfg["num_class"]
    heads = cfg["attn_heads"]
    Hs, Ht = Cin * F, Cout * S
    ff_s, ff_t = cfg["hidden"] * 2, cfg["hidden"] * 4
    eps_bn = 1e-5

    keys = iter(jax.random.split(key, 128))

    def nrm(shape, scale=0.05):
        return scale * jax.random.normal(next(keys), shape, jnp.float32)

    # --- input_map: conv1x1(3->Cin) + BN folded, layout-fused into (F*3, Cin*F)
    w_in = nrm((3, Cin))
    b_in = nrm((Cin,))
    g1, beta1 = 1.0 + nrm((Cin,)), nrm((Cin,))
    s1 = g1 / jnp.sqrt(1.0 + eps_bn)
    w_in = w_in * s1[None, :]
    b_in = b_in * s1 + beta1
    in_w = jnp.einsum("ca,fg->fcag", w_in,
                      jnp.eye(F, dtype=jnp.float32)).reshape(F * 3, Hs)
    in_b = jnp.repeat(b_in, F).reshape(1, Hs)

    # --- out_nets: conv(Cin->Cout,(1,3),pad 1) + BN folded, layout-fused into
    #     a (S*Cin, Cout*S) matrix (the im2col + channel permute live here).
    w_conv = nrm((Cout, Cin, 3))
    b_conv = nrm((Cout,))
    g2, beta2 = 1.0 + nrm((Cout,)), nrm((Cout,))
    s2 = g2 / jnp.sqrt(1.0 + eps_bn)
    w_conv = w_conv * s2[:, None, None]
    b_conv = b_conv * s2 + beta2
    sp = jnp.arange(S)
    kk = sp[:, None] - sp[None, :] + 1                    # (S', S) tap index
    valid = ((kk >= 0) & (kk <= 2)).astype(jnp.float32)
    kc = jnp.clip(kk, 0, 2)
    G = w_conv[:, :, kc] * valid[None, None]              # (Cout, Cin, S', S)
    out_w = jnp.transpose(G, (2, 1, 0, 3)).reshape(S * Cin, Ht)
    out_b = jnp.repeat(b_conv, S).reshape(1, Ht)

    # --- adaptive_avg_pool2d + fc fused into one (Ht, num_class) matrix
    fc_w = nrm((Cout, nc))
    fc_b = nrm((nc,))
    R = (jnp.arange(Ht)[:, None] % Cout
         == jnp.arange(Cout)[None, :]).astype(jnp.float32) / S
    pf_w = R @ fc_w
    pf_b = fc_b.reshape(1, nc)

    # --- positional encodings, pre-flattened to the kernel layouts (hoisted)
    pe_s4 = make_pe(Cin, S, F, "spatial")                 # (Cin, F, S)
    pe_s = jnp.transpose(pe_s4, (2, 0, 1)).reshape(S, Hs)
    pe_t4 = make_pe(Cout, S, F, "temporal")               # (Cout, F, S)
    pe_t = jnp.transpose(pe_t4, (1, 0, 2)).reshape(F, Ht)

    def init_block(H, ff):
        dk = H // heads
        return dict(
            ln1_g=jnp.ones((1, H), jnp.float32), ln1_b=jnp.zeros((1, H), jnp.float32),
            # QKV weights stacked per head: [q_0..q_{h-1}, k_0.., v_0..]
            wqkv=nrm((3 * heads, H, dk)), bqkv=nrm((3 * heads, 1, dk)),
            wo=nrm((heads, dk, H)), bo=nrm((1, H)),
            ln2_g=jnp.ones((1, H), jnp.float32), ln2_b=jnp.zeros((1, H), jnp.float32),
            w1=nrm((H, ff)), b1=nrm((1, ff)),
            w2=nrm((ff, H)), b2=nrm((1, H)),
        )

    spatial = [init_block(Hs, ff_s) for _ in range(cfg["n_layers"])]
    temporal = [init_block(Ht, ff_t) for _ in range(3)]

    return dict(in_w=in_w, in_b=in_b, pe_s=pe_s,
                out_w=out_w, out_b=out_b, pe_t=pe_t,
                pf_w=pf_w, pf_b=pf_b,
                spatial_blocks=spatial, temporal_blocks=temporal)


# ----------------------------------------------------------------------------
# Main
# ----------------------------------------------------------------------------
if __name__ == "__main__":
    B = 2
    num_frame = 8     # F (time)
    num_node = 6      # S (joints)
    in_channels = 4
    out_channels = 8
    num_class = 10
    attn_heads = 4
    n_layers = 2
    hidden = num_frame * in_channels   # must equal F * in_channels (=32)

    cfg = dict(
        in_channels=in_channels, out_channels=out_channels,
        num_frame=num_frame, num_node=num_node,
        num_class=num_class, attn_heads=attn_heads,
        n_layers=n_layers, hidden=hidden,
    )

    key = jax.random.PRNGKey(0)
    kx, kp = jax.random.split(key)
    x = jax.random.normal(kx, (B, num_frame, num_node, 3), jnp.float32)
    params = init_params(kp, cfg)

    fwd = jax.jit(functools.partial(forward, cfg=cfg))
    out = jax.block_until_ready(fwd(x, params))
    assert out.shape == (B, num_class), out.shape
    assert bool(jnp.all(jnp.isfinite(out)))
    print("KERNEL_OK")
</pallas_src>

<mosaic_0001>
module attributes {stable_mosaic.version = 11 : i64} {
  func.func @_rowmap_kernel(%arg0: i32, %arg1: memref<1x6x24xf32, #tpu.memory_space<vmem>>, %arg2: memref<24x32xf32, #tpu.memory_space<vmem>>, %arg3: memref<1x32xf32, #tpu.memory_space<vmem>>, %arg4: memref<6x32xf32, #tpu.memory_space<vmem>>, %arg5: memref<1x6x32xf32, #tpu.memory_space<vmem>>) attributes {dimension_semantics = [#tpu.dimension_semantics<parallel>], iteration_bounds = array<i64: 2>, scalar_prefetch = 0 : i64, scratch_operands = 0 : i64, tpu.core_type = #tpu.core_type<tc>, window_params = [{transform_indices = @transform_0, window_bounds = array<i64: 1, 6, 24>}, {pipeline_mode = #tpu.pipeline_mode<synchronous>, transform_indices = @transform_1, window_bounds = array<i64: 24, 32>}, {pipeline_mode = #tpu.pipeline_mode<synchronous>, transform_indices = @transform_2, window_bounds = array<i64: 1, 32>}, {pipeline_mode = #tpu.pipeline_mode<synchronous>, transform_indices = @transform_3, window_bounds = array<i64: 6, 32>}, {transform_indices = @transform_4, window_bounds = array<i64: 1, 6, 32>}]} {
    %c0 = arith.constant 0 : index
    %c0_0 = arith.constant 0 : index
    %c0_1 = arith.constant 0 : index
    %0 = vector.load %arg1[%c0, %c0_0, %c0_1] : memref<1x6x24xf32, #tpu.memory_space<vmem>>, vector<1x6x24xf32>
    %1 = vector.shape_cast %0 : vector<1x6x24xf32> to vector<6x24xf32>
    %c0_2 = arith.constant 0 : index
    %c0_3 = arith.constant 0 : index
    %2 = vector.load %arg2[%c0_2, %c0_3] : memref<24x32xf32, #tpu.memory_space<vmem>>, vector<24x32xf32>
    %3 = arith.truncf %1 : vector<6x24xf32> to vector<6x24xbf16>
    %4 = arith.truncf %2 : vector<24x32xf32> to vector<24x32xbf16>
    %cst = arith.constant dense<0.000000e+00> : vector<6x32xf32>
    %5 = tpu.matmul %3, %4, %cst {dimension_numbers = #tpu.dot_dimension_numbers<[1], [0], [0], [1], [0, 0, 1, 1], [], []>} : vector<6x24xbf16>, vector<24x32xbf16>, vector<6x32xf32> -> vector<6x32xf32>
    %c0_4 = arith.constant 0 : index
    %c0_5 = arith.constant 0 : index
    %6 = vector.load %arg3[%c0_4, %c0_5] : memref<1x32xf32, #tpu.memory_space<vmem>>, vector<1x32xf32>
    %7 = vector.broadcast %6 : vector<1x32xf32> to vector<6x32xf32>
    %8 = arith.addf %5, %7 : vector<6x32xf32>
    %cst_6 = arith.constant 0.000000e+00 : f32
    %9 = vector.broadcast %cst_6 : f32 to vector<6x32xf32>
    %10 = arith.cmpf ogt, %8, %9 : vector<6x32xf32>
    %cst_7 = arith.constant 1.000000e-01 : f32
    %11 = vector.broadcast %cst_7 : f32 to vector<6x32xf32>
    %12 = arith.mulf %11, %8 : vector<6x32xf32>
    %13 = arith.select %10, %8, %12 : vector<6x32xi1>, vector<6x32xf32>
    %c0_8 = arith.constant 0 : index
    %c0_9 = arith.constant 0 : index
    %14 = vector.load %arg4[%c0_8, %c0_9] : memref<6x32xf32, #tpu.memory_space<vmem>>, vector<6x32xf32>
    %15 = arith.addf %13, %14 : vector<6x32xf32>
    %c0_10 = arith.constant 0 : index
    %c0_11 = arith.constant 0 : index
    %c0_12 = arith.constant 0 : index
    %16 = vector.load %arg5[%c0_10, %c0_11, %c0_12] : memref<1x6x32xf32, #tpu.memory_space<vmem>>, vector<1x6x32xf32>
    %17 = vector.shape_cast %16 : vector<1x6x32xf32> to vector<6x32xf32>
    %18 = vector.shape_cast %15 : vector<6x32xf32> to vector<1x6x32xf32>
    tpu.vector_store %arg5[%c0_10, %c0_11, %c0_12], %18 {strides = array<i32>} : memref<1x6x32xf32, #tpu.memory_space<vmem>>, vector<1x6x32xf32>,
    return
  }
  func.func @transform_0(%arg0: i32) -> (i32, i32, i32) {
    %c0_i32 = arith.constant 0 : i32
    %c0_i32_0 = arith.constant 0 : i32
    %c0_i32_1 = arith.constant 0 : i32
    return %arg0, %c0_i32, %c0_i32_0 : i32, i32, i32
  }
  func.func @transform_1(%arg0: i32) -> (i32, i32) {
    %c0_i32 = arith.constant 0 : i32
    %c0_i32_0 = arith.constant 0 : i32
    %c0_i32_1 = arith.constant 0 : i32
    return %c0_i32, %c0_i32_0 : i32, i32
  }
  func.func @transform_2(%arg0: i32) -> (i32, i32) {
    %c0_i32 = arith.constant 0 : i32
    %c0_i32_0 = arith.constant 0 : i32
    %c0_i32_1 = arith.constant 0 : i32
    return %c0_i32, %c0_i32_0 : i32, i32
  }
  func.func @transform_3(%arg0: i32) -> (i32, i32) {
    %c0_i32 = arith.constant 0 : i32
    %c0_i32_0 = arith.constant 0 : i32
    %c0_i32_1 = arith.constant 0 : i32
    return %c0_i32, %c0_i32_0 : i32, i32
  }
  func.func @transform_4(%arg0: i32) -> (i32, i32, i32) {
    %c0_i32 = arith.constant 0 : i32
    %c0_i32_0 = arith.constant 0 : i32
    %c0_i32_1 = arith.constant 0 : i32
    return %arg0, %c0_i32, %c0_i32_0 : i32, i32, i32
  }
}

module attributes {stable_mosaic.version = 11 : i64} {
  func.func @_block_kernel(%arg0: i32, %arg1: memref<1x6x32xf32, #tpu.memory_space<vmem>>, %arg2: memref<1x32xf32, #tpu.memory_space<vmem>>, %arg3: memref<1x32xf32, #tpu.memory_space<vmem>>, %arg4: memref<12x32x8xf32, #tpu.memory_space<vmem>>, %arg5: memref<12x1x8xf32, #tpu.memory_space<vmem>>, %arg6: memref<4x8x32xf32, #tpu.memory_space<vmem>>, %arg7: memref<1x32xf32, #tpu.memory_space<vmem>>, %arg8: memref<1x32xf32, #tpu.memory_space<vmem>>, %arg9: memref<1x32xf32, #tpu.memory_space<vmem>>, %arg10: memref<32x64xf32, #tpu.memory_space<vmem>>, %arg11: memref<1x64xf32, #tpu.memory_space<vmem>>, %arg12: memref<64x32xf32, #tpu.memory_space<vmem>>, %arg13: memref<1x32xf32, #tpu.memory_space<vmem>>, %arg14: memref<1x6x32xf32, #tpu.memory_space<vmem>>) attributes {dimension_semantics = [#tpu.dimension_semantics<parallel>], iteration_bounds = array<i64: 2>, scalar_prefetch = 0 : i64, scratch_operands = 0 : i64, tpu.core_type = #tpu.core_type<tc>, window_params = [{transform_indices = @transform_0, window_bounds = array<i64: 1, 6, 32>}, {pipeline_mode = #tpu.pipeline_mode<synchronous>, transform_indices = @transform_1, window_bounds = array<i64: 1, 32>}, {pipeline_mode = #tpu.pipeline_mode<synchronous>, transform_indices = @transform_2, window_bounds = array<i64: 1, 32>}, {pipeline_mode = #tpu.pipeline_mode<synchronous>, transform_indices = @transform_3, window_bounds = array<i64: 12, 32, 8>}, {pipeline_mode = #tpu.pipeline_mode<synchronous>, transform_indices = @transform_4, window_bounds = array<i64: 12, 1, 8>}, {pipeline_mode = #tpu.pipeline_mode<synchronous>, transform_indices = @transform_5, window_bounds = array<i64: 4, 8, 32>}, {pipeline_mode = #tpu.pipeline_mode<synchronous>, transform_indices = @transform_6, window_bounds = array<i64: 1, 32>}, {pipeline_mode = #tpu.pipeline_mode<synchronous>, transform_indices = @transform_7, window_bounds = array<i64: 1, 32>}, {pipeline_mode = #tpu.pipeline_mode<synchronous>, transform_indices = @transform_8, window_bounds = array<i64: 1, 32>}, {pipeline_mode = #tpu.pipeline_mode<synchronous>, transform_indices = @transform_9, window_bounds = array<i64: 32, 64>}, {pipeline_mode = #tpu.pipeline_mode<synchronous>, transform_indices = @transform_10, window_bounds = array<i64: 1, 64>}, {pipeline_mode = #tpu.pipeline_mode<synchronous>, transform_indices = @transform_11, window_bounds = array<i64: 64, 32>}, {pipeline_mode = #tpu.pipeline_mode<synchronous>, transform_indices = @transform_12, window_bounds = array<i64: 1, 32>}, {transform_indices = @transform_13, window_bounds = array<i64: 1, 6, 32>}]} {
    %c0 = arith.constant 0 : index
    %c0_0 = arith.constant 0 : index
    %c0_1 = arith.constant 0 : index
    %0 = vector.load %arg1[%c0, %c0_0, %c0_1] : memref<1x6x32xf32, #tpu.memory_space<vmem>>, vector<1x6x32xf32>
    %1 = vector.shape_cast %0 : vector<1x6x32xf32> to vector<6x32xf32>
    %c0_2 = arith.constant 0 : index
    %c0_3 = arith.constant 0 : index
    %2 = vector.load %arg2[%c0_2, %c0_3] : memref<1x32xf32, #tpu.memory_space<vmem>>, vector<1x32xf32>
    %c0_4 = arith.constant 0 : index
    %c0_5 = arith.constant 0 : index
    %3 = vector.load %arg3[%c0_4, %c0_5] : memref<1x32xf32, #tpu.memory_space<vmem>>, vector<1x32xf32>
    %cst = arith.constant dense<0.000000e+00> : vector<6xf32>
    %4 = vector.multi_reduction <add>, %1, %cst [1] : vector<6x32xf32> to vector<6xf32>
    %5 = vector.shape_cast %4 : vector<6xf32> to vector<6x1xf32>
    %cst_6 = arith.constant 3.200000e+01 : f32
    %6 = vector.broadcast %cst_6 : f32 to vector<6x1xf32>
    %7 = arith.divf %5, %6 : vector<6x1xf32>
    %8 = vector.broadcast %7 : vector<6x1xf32> to vector<6x32xf32>
    %9 = arith.subf %1, %8 : vector<6x32xf32>
    %10 = arith.mulf %9, %9 : vector<6x32xf32>
    %cst_7 = arith.constant dense<0.000000e+00> : vector<6xf32>
    %11 = vector.multi_reduction <add>, %10, %cst_7 [1] : vector<6x32xf32> to vector<6xf32>
    %12 = vector.shape_cast %11 : vector<6xf32> to vector<6x1xf32>
    %cst_8 = arith.constant 3.200000e+01 : f32
    %13 = vector.broadcast %cst_8 : f32 to vector<6x1xf32>
    %14 = arith.divf %12, %13 : vector<6x1xf32>
    %cst_9 = arith.constant 9.99999974E-6 : f32
    %15 = vector.broadcast %cst_9 : f32 to vector<6x1xf32>
    %16 = arith.addf %14, %15 : vector<6x1xf32>
    %17 = math.rsqrt %16 : vector<6x1xf32>
    %18 = vector.broadcast %17 : vector<6x1xf32> to vector<6x32xf32>
    %19 = arith.mulf %9, %18 : vector<6x32xf32>
    %20 = vector.broadcast %2 : vector<1x32xf32> to vector<6x32xf32>
    %21 = arith.mulf %19, %20 : vector<6x32xf32>
    %22 = vector.broadcast %3 : vector<1x32xf32> to vector<6x32xf32>
    %23 = arith.addf %21, %22 : vector<6x32xf32>
    %cst_10 = arith.constant 0.000000e+00 : f32
    %24 = vector.broadcast %cst_10 : f32 to vector<6x32xf32>
    %c0_11 = arith.constant 0 : index
    %c0_12 = arith.constant 0 : index
    %c0_13 = arith.constant 0 : index
    %25 = vector.load %arg4[%c0_11, %c0_12, %c0_13] : memref<12x32x8xf32, #tpu.memory_space<vmem>>, vector<1x32x8xf32>
    %26 = vector.shape_cast %25 : vector<1x32x8xf32> to vector<32x8xf32>
    %27 = arith.truncf %23 : vector<6x32xf32> to vector<6x32xbf16>
    %28 = arith.truncf %26 : vector<32x8xf32> to vector<32x8xbf16>
    %cst_14 = arith.constant dense<0.000000e+00> : vector<6x8xf32>
    %29 = tpu.matmul %27, %28, %cst_14 {dimension_numbers = #tpu.dot_dimension_numbers<[1], [0], [0], [1], [0, 0, 1, 1], [], []>} : vector<6x32xbf16>, vector<32x8xbf16>, vector<6x8xf32> -> vector<6x8xf32>
    %c0_15 = arith.constant 0 : index
    %c0_16 = arith.constant 0 : index
    %c0_17 = arith.constant 0 : index
    %30 = vector.load %arg5[%c0_15, %c0_16, %c0_17] : memref<12x1x8xf32, #tpu.memory_space<vmem>>, vector<1x1x8xf32>
    %31 = vector.shape_cast %30 : vector<1x1x8xf32> to vector<1x8xf32>
    %32 = vector.broadcast %31 : vector<1x8xf32> to vector<6x8xf32>
    %33 = arith.addf %29, %32 : vector<6x8xf32>
    %c4 = arith.constant 4 : index
    %c0_18 = arith.constant 0 : index
    %c0_19 = arith.constant 0 : index
    %34 = vector.load %arg4[%c4, %c0_18, %c0_19] : memref<12x32x8xf32, #tpu.memory_space<vmem>>, vector<1x32x8xf32>
    %35 = vector.shape_cast %34 : vector<1x32x8xf32> to vector<32x8xf32>
    %36 = arith.truncf %23 : vector<6x32xf32> to vector<6x32xbf16>
    %37 = arith.truncf %35 : vector<32x8xf32> to vector<32x8xbf16>
    %cst_20 = arith.constant dense<0.000000e+00> : vector<6x8xf32>
    %38 = tpu.matmul %36, %37, %cst_20 {dimension_numbers = #tpu.dot_dimension_numbers<[1], [0], [0], [1], [0, 0, 1, 1], [], []>} : vector<6x32xbf16>, vector<32x8xbf16>, vector<6x8xf32> -> vector<6x8xf32>
    %c4_21 = arith.constant 4 : index
    %c0_22 = arith.constant 0 : index
    %c0_23 = arith.constant 0 : index
    %39 = vector.load %arg5[%c4_21, %c0_22, %c0_23] : memref<12x1x8xf32, #tpu.memory_space<vmem>>, vector<1x1x8xf32>
    %40 = vector.shape_cast %39 : vector<1x1x8xf32> to vector<1x8xf32>
    %41 = vector.broadcast %40 : vector<1x8xf32> to vector<6x8xf32>
    %42 = arith.addf %38, %41 : vector<6x8xf32>
    %c8 = arith.constant 8 : index
    %c0_24 = arith.constant 0 : index
    %c0_25 = arith.constant 0 : index
    %43 = vector.load %arg4[%c8, %c0_24, %c0_25] : memref<12x32x8xf32, #tpu.memory_space<vmem>>, vector<1x32x8xf32>
    %44 = vector.shape_cast %43 : vector<1x32x8xf32> to vector<32x8xf32>
    %45 = arith.truncf %23 : vector<6x32xf32> to vector<6x32xbf16>
    %46 = arith.truncf %44 : vector<32x8xf32> to vector<32x8xbf16>
    %cst_26 = arith.constant dense<0.000000e+00> : vector<6x8xf32>
    %47 = tpu.matmul %45, %46, %cst_26 {dimension_numbers = #tpu.dot_dimension_numbers<[1], [0], [0], [1], [0, 0, 1, 1], [], []>} : vector<6x32xbf16>, vector<32x8xbf16>, vector<6x8xf32> -> vector<6x8xf32>
    %c8_27 = arith.constant 8 : index
    %c0_28 = arith.constant 0 : index
    %c0_29 = arith.constant 0 : index
    %48 = vector.load %arg5[%c8_27, %c0_28, %c0_29] : memref<12x1x8xf32, #tpu.memory_space<vmem>>, vector<1x1x8xf32>
    %49 = vector.shape_cast %48 : vector<1x1x8xf32> to vector<1x8xf32>
    %50 = vector.broadcast %49 : vector<1x8xf32> to vector<6x8xf32>
    %51 = arith.addf %47, %50 : vector<6x8xf32>
    %52 = tpu.transpose %42, [1, 0] : vector<6x8xf32> -> vector<8x6xf32>
    %53 = arith.truncf %33 : vector<6x8xf32> to vector<6x8xbf16>
    %54 = arith.truncf %52 : vector<8x6xf32> to vector<8x6xbf16>
    %cst_30 = arith.constant dense<0.000000e+00> : vector<6x6xf32>
    %55 = tpu.matmul %53, %54, %cst_30 {dimension_numbers = #tpu.dot_dimension_numbers<[1], [0], [0], [1], [0, 0, 1, 1], [], []>} : vector<6x8xbf16>, vector<8x6xbf16>, vector<6x6xf32> -> vector<6x6xf32>
    %cst_31 = arith.constant 0.353553385 : f32
    %56 = vector.broadcast %cst_31 : f32 to vector<6x6xf32>
    %57 = arith.mulf %55, %56 : vector<6x6xf32>
    %cst_32 = arith.constant dense<0xFF800000> : vector<6xf32>
    %58 = vector.multi_reduction <maximumf>, %57, %cst_32 [1] : vector<6x6xf32> to vector<6xf32>
    %59 = vector.shape_cast %58 : vector<6xf32> to vector<6x1xf32>
    %60 = vector.broadcast %59 : vector<6x1xf32> to vector<6x6xf32>
    %61 = arith.subf %57, %60 : vector<6x6xf32>
    %62 = math.exp %61 : vector<6x6xf32>
    %cst_33 = arith.constant dense<0.000000e+00> : vector<6xf32>
    %63 = vector.multi_reduction <add>, %62, %cst_33 [1] : vector<6x6xf32> to vector<6xf32>
    %64 = vector.shape_cast %63 : vector<6xf32> to vector<6x1xf32>
    %65 = tpu.reciprocal %64 {approx = true} : vector<6x1xf32> -> vector<6x1xf32>
    %66 = vector.broadcast %65 : vector<6x1xf32> to vector<6x6xf32>
    %67 = arith.mulf %62, %66 : vector<6x6xf32>
    %68 = arith.truncf %67 : vector<6x6xf32> to vector<6x6xbf16>
    %69 = arith.truncf %51 : vector<6x8xf32> to vector<6x8xbf16>
    %cst_34 = arith.constant dense<0.000000e+00> : vector<6x8xf32>
    %70 = tpu.matmul %68, %69, %cst_34 {dimension_numbers = #tpu.dot_dimension_numbers<[1], [0], [0], [1], [0, 0, 1, 1], [], []>} : vector<6x6xbf16>, vector<6x8xbf16>, vector<6x8xf32> -> vector<6x8xf32>
    %c0_35 = arith.constant 0 : index
    %c0_36 = arith.constant 0 : index
    %c0_37 = arith.constant 0 : index
    %71 = vector.load %arg6[%c0_35, %c0_36, %c0_37] : memref<4x8x32xf32, #tpu.memory_space<vmem>>, vector<1x8x32xf32>
    %72 = vector.shape_cast %71 : vector<1x8x32xf32> to vector<8x32xf32>
    %73 = arith.truncf %70 : vector<6x8xf32> to vector<6x8xbf16>
    %74 = arith.truncf %72 : vector<8x32xf32> to vector<8x32xbf16>
    %cst_38 = arith.constant dense<0.000000e+00> : vector<6x32xf32>
    %75 = tpu.matmul %73, %74, %cst_38 {dimension_numbers = #tpu.dot_dimension_numbers<[1], [0], [0], [1], [0, 0, 1, 1], [], []>} : vector<6x8xbf16>, vector<8x32xbf16>, vector<6x32xf32> -> vector<6x32xf32>
    %76 = arith.addf %24, %75 : vector<6x32xf32>
    %c1 = arith.constant 1 : index
    %c0_39 = arith.constant 0 : index
    %c0_40 = arith.constant 0 : index
    %77 = vector.load %arg4[%c1, %c0_39, %c0_40] : memref<12x32x8xf32, #tpu.memory_space<vmem>>, vector<1x32x8xf32>
    %78 = vector.shape_cast %77 : vector<1x32x8xf32> to vector<32x8xf32>
    %79 = arith.truncf %23 : vector<6x32xf32> to vector<6x32xbf16>
    %80 = arith.truncf %78 : vector<32x8xf32> to vector<32x8xbf16>
    %cst_41 = arith.constant dense<0.000000e+00> : vector<6x8xf32>
    %81 = tpu.matmul %79, %80, %cst_41 {dimension_numbers = #tpu.dot_dimension_numbers<[1], [0], [0], [1], [0, 0, 1, 1], [], []>} : vector<6x32xbf16>, vector<32x8xbf16>, vector<6x8xf32> -> vector<6x8xf32>
    %c1_42 = arith.constant 1 : index
    %c0_43 = arith.constant 0 : index
    %c0_44 = arith.constant 0 : index
    %82 = vector.load %arg5[%c1_42, %c0_43, %c0_44] : memref<12x1x8xf32, #tpu.memory_space<vmem>>, vector<1x1x8xf32>
    %83 = vector.shape_cast %82 : vector<1x1x8xf32> to vector<1x8xf32>
    %84 = vector.broadcast %83 : vector<1x8xf32> to vector<6x8xf32>
    %85 = arith.addf %81, %84 : vector<6x8xf32>
    %c5 = arith.constant 5 : index
    %c0_45 = arith.constant 0 : index
    %c0_46 = arith.constant 0 : index
    %86 = vector.load %arg4[%c5, %c0_45, %c0_46] : memref<12x32x8xf32, #tpu.memory_space<vmem>>, vector<1x32x8xf32>
    %87 = vector.shape_cast %86 : vector<1x32x8xf32> to vector<32x8xf32>
    %88 = arith.truncf %23 : vector<6x32xf32> to vector<6x32xbf16>
    %89 = arith.truncf %87 : vector<32x8xf32> to vector<32x8xbf16>
    %cst_47 = arith.constant dense<0.000000e+00> : vector<6x8xf32>
    %90 = tpu.matmul %88, %89, %cst_47 {dimension_numbers = #tpu.dot_dimension_numbers<[1], [0], [0], [1], [0, 0, 1, 1], [], []>} : vector<6x32xbf16>, vector<32x8xbf16>, vector<6x8xf32> -> vector<6x8xf32>
    %c5_48 = arith.constant 5 : index
    %c0_49 = arith.constant 0 : index
    %c0_50 = arith.constant 0 : index
    %91 = vector.load %arg5[%c5_48, %c0_49, %c0_50] : memref<12x1x8xf32, #tpu.memory_space<vmem>>, vector<1x1x8xf32>
    %92 = vector.shape_cast %91 : vector<1x1x8xf32> to vector<1x8xf32>
    %93 = vector.broadcast %92 : vector<1x8xf32> to vector<6x8xf32>
    %94 = arith.addf %90, %93 : vector<6x8xf32>
    %c9 = arith.constant 9 : index
    %c0_51 = arith.constant 0 : index
    %c0_52 = arith.constant 0 : index
    %95 = vector.load %arg4[%c9, %c0_51, %c0_52] : memref<12x32x8xf32, #tpu.memory_space<vmem>>, vector<1x32x8xf32>
    %96 = vector.shape_cast %95 : vector<1x32x8xf32> to vector<32x8xf32>
    %97 = arith.truncf %23 : vector<6x32xf32> to vector<6x32xbf16>
    %98 = arith.truncf %96 : vector<32x8xf32> to vector<32x8xbf16>
    %cst_53 = arith.constant dense<0.000000e+00> : vector<6x8xf32>
    %99 = tpu.matmul %97, %98, %cst_53 {dimension_numbers = #tpu.dot_dimension_numbers<[1], [0], [0], [1], [0, 0, 1, 1], [], []>} : vector<6x32xbf16>, vector<32x8xbf16>, vector<6x8xf32> -> vector<6x8xf32>
    %c9_54 = arith.constant 9 : index
    %c0_55 = arith.constant 0 : index
    %c0_56 = arith.constant 0 : index
    %100 = vector.load %arg5[%c9_54, %c0_55, %c0_56] : memref<12x1x8xf32, #tpu.memory_space<vmem>>, vector<1x1x8xf32>
    %101 = vector.shape_cast %100 : vector<1x1x8xf32> to vector<1x8xf32>
    %102 = vector.broadcast %101 : vector<1x8xf32> to vector<6x8xf32>
    %103 = arith.addf %99, %102 : vector<6x8xf32>
    %104 = tpu.transpose %94, [1, 0] : vector<6x8xf32> -> vector<8x6xf32>
    %105 = arith.truncf %85 : vector<6x8xf32> to vector<6x8xbf16>
    %106 = arith.truncf %104 : vector<8x6xf32> to vector<8x6xbf16>
    %cst_57 = arith.constant dense<0.000000e+00> : vector<6x6xf32>
    %107 = tpu.matmul %105, %106, %cst_57 {dimension_numbers = #tpu.dot_dimension_numbers<[1], [0], [0], [1], [0, 0, 1, 1], [], []>} : vector<6x8xbf16>, vector<8x6xbf16>, vector<6x6xf32> -> vector<6x6xf32>
    %cst_58 = arith.constant 0.353553385 : f32
    %108 = vector.broadcast %cst_58 : f32 to vector<6x6xf32>
    %109 = arith.mulf %107, %108 : vector<6x6xf32>
    %cst_59 = arith.constant dense<0xFF800000> : vector<6xf32>
    %110 = vector.multi_reduction <maximumf>, %109, %cst_59 [1] : vector<6x6xf32> to vector<6xf32>
    %111 = vector.shape_cast %110 : vector<6xf32> to vector<6x1xf32>
    %112 = vector.broadcast %111 : vector<6x1xf32> to vector<6x6xf32>
    %113 = arith.subf %109, %112 : vector<6x6xf32>
    %114 = math.exp %113 : vector<6x6xf32>
    %cst_60 = arith.constant dense<0.000000e+00> : vector<6xf32>
    %115 = vector.multi_reduction <add>, %114, %cst_60 [1] : vector<6x6xf32> to vector<6xf32>
    %116 = vector.shape_cast %115 : vector<6xf32> to vector<6x1xf32>
    %117 = tpu.reciprocal %116 {approx = true} : vector<6x1xf32> -> vector<6x1xf32>
    %118 = vector.broadcast %117 : vector<6x1xf32> to vector<6x6xf32>
    %119 = arith.mulf %114, %118 : vector<6x6xf32>
    %120 = arith.truncf %119 : vector<6x6xf32> to vector<6x6xbf16>
    %121 = arith.truncf %103 : vector<6x8xf32> to vector<6x8xbf16>
    %cst_61 = arith.constant dense<0.000000e+00> : vector<6x8xf32>
    %122 = tpu.matmul %120, %121, %cst_61 {dimension_numbers = #tpu.dot_dimension_numbers<[1], [0], [0], [1], [0, 0, 1, 1], [], []>} : vector<6x6xbf16>, vector<6x8xbf16>, vector<6x8xf32> -> vector<6x8xf32>
    %c1_62 = arith.constant 1 : index
    %c0_63 = arith.constant 0 : index
    %c0_64 = arith.constant 0 : index
    %123 = vector.load %arg6[%c1_62, %c0_63, %c0_64] : memref<4x8x32xf32, #tpu.memory_space<vmem>>, vector<1x8x32xf32>
    %124 = vector.shape_cast %123 : vector<1x8x32xf32> to vector<8x32xf32>
    %125 = arith.truncf %122 : vector<6x8xf32> to vector<6x8xbf16>
    %126 = arith.truncf %124 : vector<8x32xf32> to vector<8x32xbf16>
    %cst_65 = arith.constant dense<0.000000e+00> : vector<6x32xf32>
    %127 = tpu.matmul %125, %126, %cst_65 {dimension_numbers = #tpu.dot_dimension_numbers<[1], [0], [0], [1], [0, 0, 1, 1], [], []>} : vector<6x8xbf16>, vector<8x32xbf16>, vector<6x32xf32> -> vector<6x32xf32>
    %128 = arith.addf %76, %127 : vector<6x32xf32>
    %c2 = arith.constant 2 : index
    %c0_66 = arith.constant 0 : index
    %c0_67 = arith.constant 0 : index
    %129 = vector.load %arg4[%c2, %c0_66, %c0_67] : memref<12x32x8xf32, #tpu.memory_space<vmem>>, vector<1x32x8xf32>
    %130 = vector.shape_cast %129 : vector<1x32x8xf32> to vector<32x8xf32>
    %131 = arith.truncf %23 : vector<6x32xf32> to vector<6x32xbf16>
    %132 = arith.truncf %130 : vector<32x8xf32> to vector<32x8xbf16>
    %cst_68 = arith.constant dense<0.000000e+00> : vector<6x8xf32>
    %133 = tpu.matmul %131, %132, %cst_68 {dimension_numbers = #tpu.dot_dimension_numbers<[1], [0], [0], [1], [0, 0, 1, 1], [], []>} : vector<6x32xbf16>, vector<32x8xbf16>, vector<6x8xf32> -> vector<6x8xf32>
    %c2_69 = arith.constant 2 : index
    %c0_70 = arith.constant 0 : index
    %c0_71 = arith.constant 0 : index
    %134 = vector.load %arg5[%c2_69, %c0_70, %c0_71] : memref<12x1x8xf32, #tpu.memory_space<vmem>>, vector<1x1x8xf32>
    %135 = vector.shape_cast %134 : vector<1x1x8xf32> to vector<1x8xf32>
    %136 = vector.broadcast %135 : vector<1x8xf32> to vector<6x8xf32>
    %137 = arith.addf %133, %136 : vector<6x8xf32>
    %c6 = arith.constant 6 : index
    %c0_72 = arith.constant 0 : index
    %c0_73 = arith.constant 0 : index
    %138 = vector.load %arg4[%c6, %c0_72, %c0_73] : memref<12x32x8xf32, #tpu.memory_space<vmem>>, vector<1x32x8xf32>
    %139 = vector.shape_cast %138 : vector<1x32x8xf32> to vector<32x8xf32>
    %140 = arith.truncf %23 : vector<6x32xf32> to vector<6x32xbf16>
    %141 = arith.truncf %139 : vector<32x8xf32> to vector<32x8xbf16>
    %cst_74 = arith.constant dense<0.000000e+00> : vector<6x8xf32>
    %142 = tpu.matmul %140, %141, %cst_74 {dimension_numbers = #tpu.dot_dimension_numbers<[1], [0], [0], [1], [0, 0, 1, 1], [], []>} : vector<6x32xbf16>, vector<32x8xbf16>, vector<6x8xf32> -> vector<6x8xf32>
    %c6_75 = arith.constant 6 : index
    %c0_76 = arith.constant 0 : index
    %c0_77 = arith.constant 0 : index
    %143 = vector.load %arg5[%c6_75, %c0_76, %c0_77] : memref<12x1x8xf32, #tpu.memory_space<vmem>>, vector<1x1x8xf32>
    %144 = vector.shape_cast %143 : vector<1x1x8xf32> to vector<1x8xf32>
    %145 = vector.broadcast %144 : vector<1x8xf32> to vector<6x8xf32>
    %146 = arith.addf %142, %145 : vector<6x8xf32>
    %c10 = arith.constant 10 : index
    %c0_78 = arith.constant 0 : index
    %c0_79 = arith.constant 0 : index
    %147 = vector.load %arg4[%c10, %c0_78, %c0_79] : memref<12x32x8xf32, #tpu.memory_space<vmem>>, vector<1x32x8xf32>
    %148 = vector.shape_cast %147 : vector<1x32x8xf32> to vector<32x8xf32>
    %149 = arith.truncf %23 : vector<6x32xf32> to vector<6x32xbf16>
    %150 = arith.truncf %148 : vector<32x8xf32> to vector<32x8xbf16>
    %cst_80 = arith.constant dense<0.000000e+00> : vector<6x8xf32>
    %151 = tpu.matmul %149, %150, %cst_80 {dimension_numbers = #tpu.dot_dimension_numbers<[1], [0], [0], [1], [0, 0, 1, 1], [], []>} : vector<6x32xbf16>, vector<32x8xbf16>, vector<6x8xf32> -> vector<6x8xf32>
    %c10_81 = arith.constant 10 : index
    %c0_82 = arith.constant 0 : index
    %c0_83 = arith.constant 0 : index
    %152 = vector.load %arg5[%c10_81, %c0_82, %c0_83] : memref<12x1x8xf32, #tpu.memory_space<vmem>>, vector<1x1x8xf32>
    %153 = vector.shape_cast %152 : vector<1x1x8xf32> to vector<1x8xf32>
    %154 = vector.broadcast %153 : vector<1x8xf32> to vector<6x8xf32>
    %155 = arith.addf %151, %154 : vector<6x8xf32>
    %156 = tpu.transpose %146, [1, 0] : vector<6x8xf32> -> vector<8x6xf32>
    %157 = arith.truncf %137 : vector<6x8xf32> to vector<6x8xbf16>
    %158 = arith.truncf %156 : vector<8x6xf32> to vector<8x6xbf16>
    %cst_84 = arith.constant dense<0.000000e+00> : vector<6x6xf32>
    %159 = tpu.matmul %157, %158, %cst_84 {dimension_numbers = #tpu.dot_dimension_numbers<[1], [0], [0], [1], [0, 0, 1, 1], [], []>} : vector<6x8xbf16>, vector<8x6xbf16>, vector<6x6xf32> -> vector<6x6xf32>
    %cst_85 = arith.constant 0.353553385 : f32
    %160 = vector.broadcast %cst_85 : f32 to vector<6x6xf32>
    %161 = arith.mulf %159, %160 : vector<6x6xf32>
    %cst_86 = arith.constant dense<0xFF800000> : vector<6xf32>
    %162 = vector.multi_reduction <maximumf>, %161, %cst_86 [1] : vector<6x6xf32> to vector<6xf32>
    %163 = vector.shape_cast %162 : vector<6xf32> to vector<6x1xf32>
    %164 = vector.broadcast %163 : vector<6x1xf32> to vector<6x6xf32>
    %165 = arith.subf %161, %164 : vector<6x6xf32>
    %166 = math.exp %165 : vector<6x6xf32>
    %cst_87 = arith.constant dense<0.000000e+00> : vector<6xf32>
    %167 = vector.multi_reduction <add>, %166, %cst_87 [1] : vector<6x6xf32> to vector<6xf32>
    %168 = vector.shape_cast %167 : vector<6xf32> to vector<6x1xf32>
    %169 = tpu.reciprocal %168 {approx = true} : vector<6x1xf32> -> vector<6x1xf32>
    %170 = vector.broadcast %169 : vector<6x1xf32> to vector<6x6xf32>
    %171 = arith.mulf %166, %170 : vector<6x6xf32>
    %172 = arith.truncf %171 : vector<6x6xf32> to vector<6x6xbf16>
    %173 = arith.truncf %155 : vector<6x8xf32> to vector<6x8xbf16>
    %cst_88 = arith.constant dense<0.000000e+00> : vector<6x8xf32>
    %174 = tpu.matmul %172, %173, %cst_88 {dimension_numbers = #tpu.dot_dimension_numbers<[1], [0], [0], [1], [0, 0, 1, 1], [], []>} : vector<6x6xbf16>, vector<6x8xbf16>, vector<6x8xf32> -> vector<6x8xf32>
    %c2_89 = arith.constant 2 : index
    %c0_90 = arith.constant 0 : index
    %c0_91 = arith.constant 0 : index
    %175 = vector.load %arg6[%c2_89, %c0_90, %c0_91] : memref<4x8x32xf32, #tpu.memory_space<vmem>>, vector<1x8x32xf32>
    %176 = vector.shape_cast %175 : vector<1x8x32xf32> to vector<8x32xf32>
    %177 = arith.truncf %174 : vector<6x8xf32> to vector<6x8xbf16>
    %178 = arith.truncf %176 : vector<8x32xf32> to vector<8x32xbf16>
    %cst_92 = arith.constant dense<0.000000e+00> : vector<6x32xf32>
    %179 = tpu.matmul %177, %178, %cst_92 {dimension_numbers = #tpu.dot_dimension_numbers<[1], [0], [0], [1], [0, 0, 1, 1], [], []>} : vector<6x8xbf16>, vector<8x32xbf16>, vector<6x32xf32> -> vector<6x32xf32>
    %180 = arith.addf %128, %179 : vector<6x32xf32>
    %c3 = arith.constant 3 : index
    %c0_93 = arith.constant 0 : index
    %c0_94 = arith.constant 0 : index
    %181 = vector.load %arg4[%c3, %c0_93, %c0_94] : memref<12x32x8xf32, #tpu.memory_space<vmem>>, vector<1x32x8xf32>
    %182 = vector.shape_cast %181 : vector<1x32x8xf32> to vector<32x8xf32>
    %183 = arith.truncf %23 : vector<6x32xf32> to vector<6x32xbf16>
    %184 = arith.truncf %182 : vector<32x8xf32> to vector<32x8xbf16>
    %cst_95 = arith.constant dense<0.000000e+00> : vector<6x8xf32>
    %185 = tpu.matmul %183, %184, %cst_95 {dimension_numbers = #tpu.dot_dimension_numbers<[1], [0], [0], [1], [0, 0, 1, 1], [], []>} : vector<6x32xbf16>, vector<32x8xbf16>, vector<6x8xf32> -> vector<6x8xf32>
    %c3_96 = arith.constant 3 : index
    %c0_97 = arith.constant 0 : index
    %c0_98 = arith.constant 0 : index
    %186 = vector.load %arg5[%c3_96, %c0_97, %c0_98] : memref<12x1x8xf32, #tpu.memory_space<vmem>>, vector<1x1x8xf32>
    %187 = vector.shape_cast %186 : vector<1x1x8xf32> to vector<1x8xf32>
    %188 = vector.broadcast %187 : vector<1x8xf32> to vector<6x8xf32>
    %189 = arith.addf %185, %188 : vector<6x8xf32>
    %c7 = arith.constant 7 : index
    %c0_99 = arith.constant 0 : index
    %c0_100 = arith.constant 0 : index
    %190 = vector.load %arg4[%c7, %c0_99, %c0_100] : memref<12x32x8xf32, #tpu.memory_space<vmem>>, vector<1x32x8xf32>
    %191 = vector.shape_cast %190 : vector<1x32x8xf32> to vector<32x8xf32>
    %192 = arith.truncf %23 : vector<6x32xf32> to vector<6x32xbf16>
    %193 = arith.truncf %191 : vector<32x8xf32> to vector<32x8xbf16>
    %cst_101 = arith.constant dense<0.000000e+00> : vector<6x8xf32>
    %194 = tpu.matmul %192, %193, %cst_101 {dimension_numbers = #tpu.dot_dimension_numbers<[1], [0], [0], [1], [0, 0, 1, 1], [], []>} : vector<6x32xbf16>, vector<32x8xbf16>, vector<6x8xf32> -> vector<6x8xf32>
    %c7_102 = arith.constant 7 : index
    %c0_103 = arith.constant 0 : index
    %c0_104 = arith.constant 0 : index
    %195 = vector.load %arg5[%c7_102, %c0_103, %c0_104] : memref<12x1x8xf32, #tpu.memory_space<vmem>>, vector<1x1x8xf32>
    %196 = vector.shape_cast %195 : vector<1x1x8xf32> to vector<1x8xf32>
    %197 = vector.broadcast %196 : vector<1x8xf32> to vector<6x8xf32>
    %198 = arith.addf %194, %197 : vector<6x8xf32>
    %c11 = arith.constant 11 : index
    %c0_105 = arith.constant 0 : index
    %c0_106 = arith.constant 0 : index
    %199 = vector.load %arg4[%c11, %c0_105, %c0_106] : memref<12x32x8xf32, #tpu.memory_space<vmem>>, vector<1x32x8xf32>
    %200 = vector.shape_cast %199 : vector<1x32x8xf32> to vector<32x8xf32>
    %201 = arith.truncf %23 : vector<6x32xf32> to vector<6x32xbf16>
    %202 = arith.truncf %200 : vector<32x8xf32> to vector<32x8xbf16>
    %cst_107 = arith.constant dense<0.000000e+00> : vector<6x8xf32>
    %203 = tpu.matmul %201, %202, %cst_107 {dimension_numbers = #tpu.dot_dimension_numbers<[1], [0], [0], [1], [0, 0, 1, 1], [], []>} : vector<6x32xbf16>, vector<32x8xbf16>, vector<6x8xf32> -> vector<6x8xf32>
    %c11_108 = arith.constant 11 : index
    %c0_109 = arith.constant 0 : index
    %c0_110 = arith.constant 0 : index
    %204 = vector.load %arg5[%c11_108, %c0_109, %c0_110] : memref<12x1x8xf32, #tpu.memory_space<vmem>>, vector<1x1x8xf32>
    %205 = vector.shape_cast %204 : vector<1x1x8xf32> to vector<1x8xf32>
    %206 = vector.broadcast %205 : vector<1x8xf32> to vector<6x8xf32>
    %207 = arith.addf %203, %206 : vector<6x8xf32>
    %208 = tpu.transpose %198, [1, 0] : vector<6x8xf32> -> vector<8x6xf32>
    %209 = arith.truncf %189 : vector<6x8xf32> to vector<6x8xbf16>
    %210 = arith.truncf %208 : vector<8x6xf32> to vector<8x6xbf16>
    %cst_111 = arith.constant dense<0.000000e+00> : vector<6x6xf32>
    %211 = tpu.matmul %209, %210, %cst_111 {dimension_numbers = #tpu.dot_dimension_numbers<[1], [0], [0], [1], [0, 0, 1, 1], [], []>} : vector<6x8xbf16>, vector<8x6xbf16>, vector<6x6xf32> -> vector<6x6xf32>
    %cst_112 = arith.constant 0.353553385 : f32
    %212 = vector.broadcast %cst_112 : f32 to vector<6x6xf32>
    %213 = arith.mulf %211, %212 : vector<6x6xf32>
    %cst_113 = arith.constant dense<0xFF800000> : vector<6xf32>
    %214 = vector.multi_reduction <maximumf>, %213, %cst_113 [1] : vector<6x6xf32> to vector<6xf32>
    %215 = vector.shape_cast %214 : vector<6xf32> to vector<6x1xf32>
    %216 = vector.broadcast %215 : vector<6x1xf32> to vector<6x6xf32>
    %217 = arith.subf %213, %216 : vector<6x6xf32>
    %218 = math.exp %217 : vector<6x6xf32>
    %cst_114 = arith.constant dense<0.000000e+00> : vector<6xf32>
    %219 = vector.multi_reduction <add>, %218, %cst_114 [1] : vector<6x6xf32> to vector<6xf32>
    %220 = vector.shape_cast %219 : vector<6xf32> to vector<6x1xf32>
    %221 = tpu.reciprocal %220 {approx = true} : vector<6x1xf32> -> vector<6x1xf32>
    %222 = vector.broadcast %221 : vector<6x1xf32> to vector<6x6xf32>
    %223 = arith.mulf %218, %222 : vector<6x6xf32>
    %224 = arith.truncf %223 : vector<6x6xf32> to vector<6x6xbf16>
    %225 = arith.truncf %207 : vector<6x8xf32> to vector<6x8xbf16>
    %cst_115 = arith.constant dense<0.000000e+00> : vector<6x8xf32>
    %226 = tpu.matmul %224, %225, %cst_115 {dimension_numbers = #tpu.dot_dimension_numbers<[1], [0], [0], [1], [0, 0, 1, 1], [], []>} : vector<6x6xbf16>, vector<6x8xbf16>, vector<6x8xf32> -> vector<6x8xf32>
    %c3_116 = arith.constant 3 : index
    %c0_117 = arith.constant 0 : index
    %c0_118 = arith.constant 0 : index
    %227 = vector.load %arg6[%c3_116, %c0_117, %c0_118] : memref<4x8x32xf32, #tpu.memory_space<vmem>>, vector<1x8x32xf32>
    %228 = vector.shape_cast %227 : vector<1x8x32xf32> to vector<8x32xf32>
    %229 = arith.truncf %226 : vector<6x8xf32> to vector<6x8xbf16>
    %230 = arith.truncf %228 : vector<8x32xf32> to vector<8x32xbf16>
    %cst_119 = arith.constant dense<0.000000e+00> : vector<6x32xf32>
    %231 = tpu.matmul %229, %230, %cst_119 {dimension_numbers = #tpu.dot_dimension_numbers<[1], [0], [0], [1], [0, 0, 1, 1], [], []>} : vector<6x8xbf16>, vector<8x32xbf16>, vector<6x32xf32> -> vector<6x32xf32>
    %232 = arith.addf %180, %231 : vector<6x32xf32>
    %233 = arith.addf %1, %232 : vector<6x32xf32>
    %c0_120 = arith.constant 0 : index
    %c0_121 = arith.constant 0 : index
    %234 = vector.load %arg7[%c0_120, %c0_121] : memref<1x32xf32, #tpu.memory_space<vmem>>, vector<1x32xf32>
    %235 = vector.broadcast %234 : vector<1x32xf32> to vector<6x32xf32>
    %236 = arith.addf %233, %235 : vector<6x32xf32>
    %c0_122 = arith.constant 0 : index
    %c0_123 = arith.constant 0 : index
    %237 = vector.load %arg8[%c0_122, %c0_123] : memref<1x32xf32, #tpu.memory_space<vmem>>, vector<1x32xf32>
    %c0_124 = arith.constant 0 : index
    %c0_125 = arith.constant 0 : index
    %238 = vector.load %arg9[%c0_124, %c0_125] : memref<1x32xf32, #tpu.memory_space<vmem>>, vector<1x32xf32>
    %cst_126 = arith.constant dense<0.000000e+00> : vector<6xf32>
    %239 = vector.multi_reduction <add>, %236, %cst_126 [1] : vector<6x32xf32> to vector<6xf32>
    %240 = vector.shape_cast %239 : vector<6xf32> to vector<6x1xf32>
    %cst_127 = arith.constant 3.200000e+01 : f32
    %241 = vector.broadcast %cst_127 : f32 to vector<6x1xf32>
    %242 = arith.divf %240, %241 : vector<6x1xf32>
    %243 = vector.broadcast %242 : vector<6x1xf32> to vector<6x32xf32>
    %244 = arith.subf %236, %243 : vector<6x32xf32>
    %245 = arith.mulf %244, %244 : vector<6x32xf32>
    %cst_128 = arith.constant dense<0.000000e+00> : vector<6xf32>
    %246 = vector.multi_reduction <add>, %245, %cst_128 [1] : vector<6x32xf32> to vector<6xf32>
    %247 = vector.shape_cast %246 : vector<6xf32> to vector<6x1xf32>
    %cst_129 = arith.constant 3.200000e+01 : f32
    %248 = vector.broadcast %cst_129 : f32 to vector<6x1xf32>
    %249 = arith.divf %247, %248 : vector<6x1xf32>
    %cst_130 = arith.constant 9.99999974E-6 : f32
    %250 = vector.broadcast %cst_130 : f32 to vector<6x1xf32>
    %251 = arith.addf %249, %250 : vector<6x1xf32>
    %252 = math.rsqrt %251 : vector<6x1xf32>
    %253 = vector.broadcast %252 : vector<6x1xf32> to vector<6x32xf32>
    %254 = arith.mulf %244, %253 : vector<6x32xf32>
    %255 = vector.broadcast %237 : vector<1x32xf32> to vector<6x32xf32>
    %256 = arith.mulf %254, %255 : vector<6x32xf32>
    %257 = vector.broadcast %238 : vector<1x32xf32> to vector<6x32xf32>
    %258 = arith.addf %256, %257 : vector<6x32xf32>
    %c0_131 = arith.constant 0 : index
    %c0_132 = arith.constant 0 : index
    %259 = vector.load %arg10[%c0_131, %c0_132] : memref<32x64xf32, #tpu.memory_space<vmem>>, vector<32x64xf32>
    %260 = arith.truncf %258 : vector<6x32xf32> to vector<6x32xbf16>
    %261 = arith.truncf %259 : vector<32x64xf32> to vector<32x64xbf16>
    %cst_133 = arith.constant dense<0.000000e+00> : vector<6x64xf32>
    %262 = tpu.matmul %260, %261, %cst_133 {dimension_numbers = #tpu.dot_dimension_numbers<[1], [0], [0], [1], [0, 0, 1, 1], [], []>} : vector<6x32xbf16>, vector<32x64xbf16>, vector<6x64xf32> -> vector<6x64xf32>
    %c0_134 = arith.constant 0 : index
    %c0_135 = arith.constant 0 : index
    %263 = vector.load %arg11[%c0_134, %c0_135] : memref<1x64xf32, #tpu.memory_space<vmem>>, vector<1x64xf32>
    %264 = vector.broadcast %263 : vector<1x64xf32> to vector<6x64xf32>
    %265 = arith.addf %262, %264 : vector<6x64xf32>
    %cst_136 = arith.constant 5.000000e-01 : f32
    %266 = vector.broadcast %cst_136 : f32 to vector<6x64xf32>
    %267 = arith.mulf %266, %265 : vector<6x64xf32>
    %cst_137 = arith.constant 4.471500e-02 : f32
    %268 = vector.broadcast %cst_137 : f32 to vector<6x64xf32>
    %269 = arith.mulf %268, %265 : vector<6x64xf32>
    %270 = arith.mulf %269, %265 : vector<6x64xf32>
    %271 = arith.mulf %270, %265 : vector<6x64xf32>
    %272 = arith.addf %265, %271 : vector<6x64xf32>
    %cst_138 = arith.constant 0.797884583 : f32
    %273 = vector.broadcast %cst_138 : f32 to vector<6x64xf32>
    %274 = arith.mulf %273, %272 : vector<6x64xf32>
    %275 = math.tanh %274 : vector<6x64xf32>
    %cst_139 = arith.constant 1.000000e+00 : f32
    %276 = vector.broadcast %cst_139 : f32 to vector<6x64xf32>
    %277 = arith.addf %276, %275 : vector<6x64xf32>
    %278 = arith.mulf %267, %277 : vector<6x64xf32>
    %c0_140 = arith.constant 0 : index
    %c0_141 = arith.constant 0 : index
    %279 = vector.load %arg12[%c0_140, %c0_141] : memref<64x32xf32, #tpu.memory_space<vmem>>, vector<64x32xf32>
    %280 = arith.truncf %278 : vector<6x64xf32> to vector<6x64xbf16>
    %281 = arith.truncf %279 : vector<64x32xf32> to vector<64x32xbf16>
    %cst_142 = arith.constant dense<0.000000e+00> : vector<6x32xf32>
    %282 = tpu.matmul %280, %281, %cst_142 {dimension_numbers = #tpu.dot_dimension_numbers<[1], [0], [0], [1], [0, 0, 1, 1], [], []>} : vector<6x64xbf16>, vector<64x32xbf16>, vector<6x32xf32> -> vector<6x32xf32>
    %283 = arith.addf %236, %282 : vector<6x32xf32>
    %c0_143 = arith.constant 0 : index
    %c0_144 = arith.constant 0 : index
    %284 = vector.load %arg13[%c0_143, %c0_144] : memref<1x32xf32, #tpu.memory_space<vmem>>, vector<1x32xf32>
    %285 = vector.broadcast %284 : vector<1x32xf32> to vector<6x32xf32>
    %286 = arith.addf %283, %285 : vector<6x32xf32>
    %c0_145 = arith.constant 0 : index
    %c0_146 = arith.constant 0 : index
    %c0_147 = arith.constant 0 : index
    %287 = vector.load %arg14[%c0_145, %c0_146, %c0_147] : memref<1x6x32xf32, #tpu.memory_space<vmem>>, vector<1x6x32xf32>
    %288 = vector.shape_cast %287 : vector<1x6x32xf32> to vector<6x32xf32>
    %289 = vector.shape_cast %286 : vector<6x32xf32> to vector<1x6x32xf32>
    tpu.vector_store %arg14[%c0_145, %c0_146, %c0_147], %289 {strides = array<i32>} : memref<1x6x32xf32, #tpu.memory_space<vmem>>, vector<1x6x32xf32>,
    return
  }
  func.func @transform_0(%arg0: i32) -> (i32, i32, i32) {
    %c0_i32 = arith.constant 0 : i32
    %c0_i32_0 = arith.constant 0 : i32
    %c0_i32_1 = arith.constant 0 : i32
    return %arg0, %c0_i32, %c0_i32_0 : i32, i32, i32
  }
  func.func @transform_1(%arg0: i32) -> (i32, i32) {
    %c0_i32 = arith.constant 0 : i32
    %c0_i32_0 = arith.constant 0 : i32
    %c0_i32_1 = arith.constant 0 : i32
    return %c0_i32, %c0_i32_0 : i32, i32
  }
  func.func @transform_2(%arg0: i32) -> (i32, i32) {
    %c0_i32 = arith.constant 0 : i32
    %c0_i32_0 = arith.constant 0 : i32
    %c0_i32_1 = arith.constant 0 : i32
    return %c0_i32, %c0_i32_0 : i32, i32
  }
  func.func @transform_3(%arg0: i32) -> (i32, i32, i32) {
    %c0_i32 = arith.constant 0 : i32
    %c0_i32_0 = arith.constant 0 : i32
    %c0_i32_1 = arith.constant 0 : i32
    %c0_i32_2 = arith.constant 0 : i32
    return %c0_i32, %c0_i32_0, %c0_i32_1 : i32, i32, i32
  }
  func.func @transform_4(%arg0: i32) -> (i32, i32, i32) {
    %c0_i32 = arith.constant 0 : i32
    %c0_i32_0 = arith.constant 0 : i32
    %c0_i32_1 = arith.constant 0 : i32
    %c0_i32_2 = arith.constant 0 : i32
    return %c0_i32, %c0_i32_0, %c0_i32_1 : i32, i32, i32
  }
  func.func @transform_5(%arg0: i32) -> (i32, i32, i32) {
    %c0_i32 = arith.constant 0 : i32
    %c0_i32_0 = arith.constant 0 : i32
    %c0_i32_1 = arith.constant 0 : i32
    %c0_i32_2 = arith.constant 0 : i32
    return %c0_i32, %c0_i32_0, %c0_i32_1 : i32, i32, i32
  }
  func.func @transform_6(%arg0: i32) -> (i32, i32) {
    %c0_i32 = arith.constant 0 : i32
    %c0_i32_0 = arith.constant 0 : i32
    %c0_i32_1 = arith.constant 0 : i32
    return %c0_i32, %c0_i32_0 : i32, i32
  }
  func.func @transform_7(%arg0: i32) -> (i32, i32) {
    %c0_i32 = arith.constant 0 : i32
    %c0_i32_0 = arith.constant 0 : i32
    %c0_i32_1 = arith.constant 0 : i32
    return %c0_i32, %c0_i32_0 : i32, i32
  }
  func.func @transform_8(%arg0: i32) -> (i32, i32) {
    %c0_i32 = arith.constant 0 : i32
    %c0_i32_0 = arith.constant 0 : i32
    %c0_i32_1 = arith.constant 0 : i32
    return %c0_i32, %c0_i32_0 : i32, i32
  }
  func.func @transform_9(%arg0: i32) -> (i32, i32) {
    %c0_i32 = arith.constant 0 : i32
    %c0_i32_0 = arith.constant 0 : i32
    %c0_i32_1 = arith.constant 0 : i32
    return %c0_i32, %c0_i32_0 : i32, i32
  }
  func.func @transform_10(%arg0: i32) -> (i32, i32) {
    %c0_i32 = arith.constant 0 : i32
    %c0_i32_0 = arith.constant 0 : i32
    %c0_i32_1 = arith.constant 0 : i32
    return %c0_i32, %c0_i32_0 : i32, i32
  }
  func.func @transform_11(%arg0: i32) -> (i32, i32) {
    %c0_i32 = arith.constant 0 : i32
    %c0_i32_0 = arith.constant 0 : i32
    %c0_i32_1 = arith.constant 0 : i32
    return %c0_i32, %c0_i32_0 : i32, i32
  }
  func.func @transform_12(%arg0: i32) -> (i32, i32) {
    %c0_i32 = arith.constant 0 : i32
    %c0_i32_0 = arith.constant 0 : i32
    %c0_i32_1 = arith.constant 0 : i32
    return %c0_i32, %c0_i32_0 : i32, i32
  }
  func.func @transform_13(%arg0: i32) -> (i32, i32, i32) {
    %c0_i32 = arith.constant 0 : i32
    %c0_i32_0 = arith.constant 0 : i32
    %c0_i32_1 = arith.constant 0 : i32
    return %arg0, %c0_i32, %c0_i32_0 : i32, i32, i32
  }
}

module attributes {stable_mosaic.version = 11 : i64} {
  func.func @_rowmap_kernel(%arg0: i32, %arg1: memref<1x8x24xf32, #tpu.memory_space<vmem>>, %arg2: memref<24x48xf32, #tpu.memory_space<vmem>>, %arg3: memref<1x48xf32, #tpu.memory_space<vmem>>, %arg4: memref<8x48xf32, #tpu.memory_space<vmem>>, %arg5: memref<1x8x48xf32, #tpu.memory_space<vmem>>) attributes {dimension_semantics = [#tpu.dimension_semantics<parallel>], iteration_bounds = array<i64: 2>, scalar_prefetch = 0 : i64, scratch_operands = 0 : i64, tpu.core_type = #tpu.core_type<tc>, window_params = [{transform_indices = @transform_0, window_bounds = array<i64: 1, 8, 24>}, {pipeline_mode = #tpu.pipeline_mode<synchronous>, transform_indices = @transform_1, window_bounds = array<i64: 24, 48>}, {pipeline_mode = #tpu.pipeline_mode<synchronous>, transform_indices = @transform_2, window_bounds = array<i64: 1, 48>}, {pipeline_mode = #tpu.pipeline_mode<synchronous>, transform_indices = @transform_3, window_bounds = array<i64: 8, 48>}, {transform_indices = @transform_4, window_bounds = array<i64: 1, 8, 48>}]} {
    %c0 = arith.constant 0 : index
    %c0_0 = arith.constant 0 : index
    %c0_1 = arith.constant 0 : index
    %0 = vector.load %arg1[%c0, %c0_0, %c0_1] : memref<1x8x24xf32, #tpu.memory_space<vmem>>, vector<1x8x24xf32>
    %1 = vector.shape_cast %0 : vector<1x8x24xf32> to vector<8x24xf32>
    %c0_2 = arith.constant 0 : index
    %c0_3 = arith.constant 0 : index
    %2 = vector.load %arg2[%c0_2, %c0_3] : memref<24x48xf32, #tpu.memory_space<vmem>>, vector<24x48xf32>
    %3 = arith.truncf %1 : vector<8x24xf32> to vector<8x24xbf16>
    %4 = arith.truncf %2 : vector<24x48xf32> to vector<24x48xbf16>
    %cst = arith.constant dense<0.000000e+00> : vector<8x48xf32>
    %5 = tpu.matmul %3, %4, %cst {dimension_numbers = #tpu.dot_dimension_numbers<[1], [0], [0], [1], [0, 0, 1, 1], [], []>} : vector<8x24xbf16>, vector<24x48xbf16>, vector<8x48xf32> -> vector<8x48xf32>
    %c0_4 = arith.constant 0 : index
    %c0_5 = arith.constant 0 : index
    %6 = vector.load %arg3[%c0_4, %c0_5] : memref<1x48xf32, #tpu.memory_space<vmem>>, vector<1x48xf32>
    %7 = vector.broadcast %6 : vector<1x48xf32> to vector<8x48xf32>
    %8 = arith.addf %5, %7 : vector<8x48xf32>
    %c0_6 = arith.constant 0 : index
    %c0_7 = arith.constant 0 : index
    %9 = vector.load %arg4[%c0_6, %c0_7] : memref<8x48xf32, #tpu.memory_space<vmem>>, vector<8x48xf32>
    %10 = arith.addf %8, %9 : vector<8x48xf32>
    %c0_8 = arith.constant 0 : index
    %c0_9 = arith.constant 0 : index
    %c0_10 = arith.constant 0 : index
    %11 = vector.load %arg5[%c0_8, %c0_9, %c0_10] : memref<1x8x48xf32, #tpu.memory_space<vmem>>, vector<1x8x48xf32>
    %12 = vector.shape_cast %11 : vector<1x8x48xf32> to vector<8x48xf32>
    %13 = vector.shape_cast %10 : vector<8x48xf32> to vector<1x8x48xf32>
    tpu.vector_store %arg5[%c0_8, %c0_9, %c0_10], %13 {strides = array<i32>} : memref<1x8x48xf32, #tpu.memory_space<vmem>>, vector<1x8x48xf32>,
    return
  }
  func.func @transform_0(%arg0: i32) -> (i32, i32, i32) {
    %c0_i32 = arith.constant 0 : i32
    %c0_i32_0 = arith.constant 0 : i32
    %c0_i32_1 = arith.constant 0 : i32
    return %arg0, %c0_i32, %c0_i32_0 : i32, i32, i32
  }
  func.func @transform_1(%arg0: i32) -> (i32, i32) {
    %c0_i32 = arith.constant 0 : i32
    %c0_i32_0 = arith.constant 0 : i32
    %c0_i32_1 = arith.constant 0 : i32
    return %c0_i32, %c0_i32_0 : i32, i32
  }
  func.func @transform_2(%arg0: i32) -> (i32, i32) {
    %c0_i32 = arith.constant 0 : i32
    %c0_i32_0 = arith.constant 0 : i32
    %c0_i32_1 = arith.constant 0 : i32
    return %c0_i32, %c0_i32_0 : i32, i32
  }
  func.func @transform_3(%arg0: i32) -> (i32, i32) {
    %c0_i32 = arith.constant 0 : i32
    %c0_i32_0 = arith.constant 0 : i32
    %c0_i32_1 = arith.constant 0 : i32
    return %c0_i32, %c0_i32_0 : i32, i32
  }
  func.func @transform_4(%arg0: i32) -> (i32, i32, i32) {
    %c0_i32 = arith.constant 0 : i32
    %c0_i32_0 = arith.constant 0 : i32
    %c0_i32_1 = arith.constant 0 : i32
    return %arg0, %c0_i32, %c0_i32_0 : i32, i32, i32
  }
}

module attributes {stable_mosaic.version = 11 : i64} {
  func.func @_poolfc_kernel(%arg0: memref<2x8x48xf32, #tpu.memory_space<vmem>>, %arg1: memref<48x10xf32, #tpu.memory_space<vmem>>, %arg2: memref<1x10xf32, #tpu.memory_space<vmem>>, %arg3: memref<2x10xf32, #tpu.memory_space<vmem>>) attributes {dimension_semantics = [], scalar_prefetch = 0 : i64, scratch_operands = 0 : i64, tpu.core_type = #tpu.core_type<tc>} {
    %c0 = arith.constant 0 : index
    %c0_0 = arith.constant 0 : index
    %c0_1 = arith.constant 0 : index
    %0 = vector.load %arg0[%c0, %c0_0, %c0_1] : memref<2x8x48xf32, #tpu.memory_space<vmem>>, vector<2x8x48xf32>
    %cst = arith.constant dense<0.000000e+00> : vector<2x48xf32>
    %1 = vector.multi_reduction <add>, %0, %cst [1] : vector<2x8x48xf32> to vector<2x48xf32>
    %cst_2 = arith.constant 8.000000e+00 : f32
    %2 = vector.broadcast %cst_2 : f32 to vector<2x48xf32>
    %3 = arith.divf %1, %2 : vector<2x48xf32>
    %c0_3 = arith.constant 0 : index
    %c0_4 = arith.constant 0 : index
    %4 = vector.load %arg1[%c0_3, %c0_4] : memref<48x10xf32, #tpu.memory_space<vmem>>, vector<48x10xf32>
    %5 = arith.truncf %3 : vector<2x48xf32> to vector<2x48xbf16>
    %6 = arith.truncf %4 : vector<48x10xf32> to vector<48x10xbf16>
    %cst_5 = arith.constant dense<0.000000e+00> : vector<2x10xf32>
    %7 = tpu.matmul %5, %6, %cst_5 {dimension_numbers = #tpu.dot_dimension_numbers<[1], [0], [0], [1], [0, 0, 1, 1], [], []>} : vector<2x48xbf16>, vector<48x10xbf16>, vector<2x10xf32> -> vector<2x10xf32>
    %c0_6 = arith.constant 0 : index
    %c0_7 = arith.constant 0 : index
    %8 = vector.load %arg2[%c0_6, %c0_7] : memref<1x10xf32, #tpu.memory_space<vmem>>, vector<1x10xf32>
    %9 = vector.broadcast %8 : vector<1x10xf32> to vector<2x10xf32>
    %10 = arith.addf %7, %9 : vector<2x10xf32>
    %c0_8 = arith.constant 0 : index
    %c0_9 = arith.constant 0 : index
    %11 = vector.load %arg3[%c0_8, %c0_9] : memref<2x10xf32, #tpu.memory_space<vmem>>, vector<2x10xf32>
    tpu.vector_store %arg3[%c0_8, %c0_9], %10 {strides = array<i32>} : memref<2x10xf32, #tpu.memory_space<vmem>>, vector<2x10xf32>,
    return
  }
}

module attributes {stable_mosaic.version = 11 : i64} {
  func.func @_block_kernel(%arg0: i32, %arg1: memref<1x8x48xf32, #tpu.memory_space<vmem>>, %arg2: memref<1x48xf32, #tpu.memory_space<vmem>>, %arg3: memref<1x48xf32, #tpu.memory_space<vmem>>, %arg4: memref<12x48x12xf32, #tpu.memory_space<vmem>>, %arg5: memref<12x1x12xf32, #tpu.memory_space<vmem>>, %arg6: memref<4x12x48xf32, #tpu.memory_space<vmem>>, %arg7: memref<1x48xf32, #tpu.memory_space<vmem>>, %arg8: memref<1x48xf32, #tpu.memory_space<vmem>>, %arg9: memref<1x48xf32, #tpu.memory_space<vmem>>, %arg10: memref<48x128xf32, #tpu.memory_space<vmem>>, %arg11: memref<1x128xf32, #tpu.memory_space<vmem>>, %arg12: memref<128x48xf32, #tpu.memory_space<vmem>>, %arg13: memref<1x48xf32, #tpu.memory_space<vmem>>, %arg14: memref<1x8x48xf32, #tpu.memory_space<vmem>>) attributes {dimension_semantics = [#tpu.dimension_semantics<parallel>], iteration_bounds = array<i64: 2>, scalar_prefetch = 0 : i64, scratch_operands = 0 : i64, tpu.core_type = #tpu.core_type<tc>, window_params = [{transform_indices = @transform_0, window_bounds = array<i64: 1, 8, 48>}, {pipeline_mode = #tpu.pipeline_mode<synchronous>, transform_indices = @transform_1, window_bounds = array<i64: 1, 48>}, {pipeline_mode = #tpu.pipeline_mode<synchronous>, transform_indices = @transform_2, window_bounds = array<i64: 1, 48>}, {pipeline_mode = #tpu.pipeline_mode<synchronous>, transform_indices = @transform_3, window_bounds = array<i64: 12, 48, 12>}, {pipeline_mode = #tpu.pipeline_mode<synchronous>, transform_indices = @transform_4, window_bounds = array<i64: 12, 1, 12>}, {pipeline_mode = #tpu.pipeline_mode<synchronous>, transform_indices = @transform_5, window_bounds = array<i64: 4, 12, 48>}, {pipeline_mode = #tpu.pipeline_mode<synchronous>, transform_indices = @transform_6, window_bounds = array<i64: 1, 48>}, {pipeline_mode = #tpu.pipeline_mode<synchronous>, transform_indices = @transform_7, window_bounds = array<i64: 1, 48>}, {pipeline_mode = #tpu.pipeline_mode<synchronous>, transform_indices = @transform_8, window_bounds = array<i64: 1, 48>}, {pipeline_mode = #tpu.pipeline_mode<synchronous>, transform_indices = @transform_9, window_bounds = array<i64: 48, 128>}, {pipeline_mode = #tpu.pipeline_mode<synchronous>, transform_indices = @transform_10, window_bounds = array<i64: 1, 128>}, {pipeline_mode = #tpu.pipeline_mode<synchronous>, transform_indices = @transform_11, window_bounds = array<i64: 128, 48>}, {pipeline_mode = #tpu.pipeline_mode<synchronous>, transform_indices = @transform_12, window_bounds = array<i64: 1, 48>}, {transform_indices = @transform_13, window_bounds = array<i64: 1, 8, 48>}]} {
    %c0 = arith.constant 0 : index
    %c0_0 = arith.constant 0 : index
    %c0_1 = arith.constant 0 : index
    %0 = vector.load %arg1[%c0, %c0_0, %c0_1] : memref<1x8x48xf32, #tpu.memory_space<vmem>>, vector<1x8x48xf32>
    %1 = vector.shape_cast %0 : vector<1x8x48xf32> to vector<8x48xf32>
    %c0_2 = arith.constant 0 : index
    %c0_3 = arith.constant 0 : index
    %2 = vector.load %arg2[%c0_2, %c0_3] : memref<1x48xf32, #tpu.memory_space<vmem>>, vector<1x48xf32>
    %c0_4 = arith.constant 0 : index
    %c0_5 = arith.constant 0 : index
    %3 = vector.load %arg3[%c0_4, %c0_5] : memref<1x48xf32, #tpu.memory_space<vmem>>, vector<1x48xf32>
    %cst = arith.constant dense<0.000000e+00> : vector<8xf32>
    %4 = vector.multi_reduction <add>, %1, %cst [1] : vector<8x48xf32> to vector<8xf32>
    %5 = vector.shape_cast %4 : vector<8xf32> to vector<8x1xf32>
    %cst_6 = arith.constant 4.800000e+01 : f32
    %6 = vector.broadcast %cst_6 : f32 to vector<8x1xf32>
    %7 = arith.divf %5, %6 : vector<8x1xf32>
    %8 = vector.broadcast %7 : vector<8x1xf32> to vector<8x48xf32>
    %9 = arith.subf %1, %8 : vector<8x48xf32>
    %10 = arith.mulf %9, %9 : vector<8x48xf32>
    %cst_7 = arith.constant dense<0.000000e+00> : vector<8xf32>
    %11 = vector.multi_reduction <add>, %10, %cst_7 [1] : vector<8x48xf32> to vector<8xf32>
    %12 = vector.shape_cast %11 : vector<8xf32> to vector<8x1xf32>
    %cst_8 = arith.constant 4.800000e+01 : f32
    %13 = vector.broadcast %cst_8 : f32 to vector<8x1xf32>
    %14 = arith.divf %12, %13 : vector<8x1xf32>
    %cst_9 = arith.constant 9.99999974E-6 : f32
    %15 = vector.broadcast %cst_9 : f32 to vector<8x1xf32>
    %16 = arith.addf %14, %15 : vector<8x1xf32>
    %17 = math.rsqrt %16 : vector<8x1xf32>
    %18 = vector.broadcast %17 : vector<8x1xf32> to vector<8x48xf32>
    %19 = arith.mulf %9, %18 : vector<8x48xf32>
    %20 = vector.broadcast %2 : vector<1x48xf32> to vector<8x48xf32>
    %21 = arith.mulf %19, %20 : vector<8x48xf32>
    %22 = vector.broadcast %3 : vector<1x48xf32> to vector<8x48xf32>
    %23 = arith.addf %21, %22 : vector<8x48xf32>
    %cst_10 = arith.constant 0.000000e+00 : f32
    %24 = vector.broadcast %cst_10 : f32 to vector<8x48xf32>
    %c0_11 = arith.constant 0 : index
    %c0_12 = arith.constant 0 : index
    %c0_13 = arith.constant 0 : index
    %25 = vector.load %arg4[%c0_11, %c0_12, %c0_13] : memref<12x48x12xf32, #tpu.memory_space<vmem>>, vector<1x48x12xf32>
    %26 = vector.shape_cast %25 : vector<1x48x12xf32> to vector<48x12xf32>
    %27 = arith.truncf %23 : vector<8x48xf32> to vector<8x48xbf16>
    %28 = arith.truncf %26 : vector<48x12xf32> to vector<48x12xbf16>
    %cst_14 = arith.constant dense<0.000000e+00> : vector<8x12xf32>
    %29 = tpu.matmul %27, %28, %cst_14 {dimension_numbers = #tpu.dot_dimension_numbers<[1], [0], [0], [1], [0, 0, 1, 1], [], []>} : vector<8x48xbf16>, vector<48x12xbf16>, vector<8x12xf32> -> vector<8x12xf32>
    %c0_15 = arith.constant 0 : index
    %c0_16 = arith.constant 0 : index
    %c0_17 = arith.constant 0 : index
    %30 = vector.load %arg5[%c0_15, %c0_16, %c0_17] : memref<12x1x12xf32, #tpu.memory_space<vmem>>, vector<1x1x12xf32>
    %31 = vector.shape_cast %30 : vector<1x1x12xf32> to vector<1x12xf32>
    %32 = vector.broadcast %31 : vector<1x12xf32> to vector<8x12xf32>
    %33 = arith.addf %29, %32 : vector<8x12xf32>
    %c4 = arith.constant 4 : index
    %c0_18 = arith.constant 0 : index
    %c0_19 = arith.constant 0 : index
    %34 = vector.load %arg4[%c4, %c0_18, %c0_19] : memref<12x48x12xf32, #tpu.memory_space<vmem>>, vector<1x48x12xf32>
    %35 = vector.shape_cast %34 : vector<1x48x12xf32> to vector<48x12xf32>
    %36 = arith.truncf %23 : vector<8x48xf32> to vector<8x48xbf16>
    %37 = arith.truncf %35 : vector<48x12xf32> to vector<48x12xbf16>
    %cst_20 = arith.constant dense<0.000000e+00> : vector<8x12xf32>
    %38 = tpu.matmul %36, %37, %cst_20 {dimension_numbers = #tpu.dot_dimension_numbers<[1], [0], [0], [1], [0, 0, 1, 1], [], []>} : vector<8x48xbf16>, vector<48x12xbf16>, vector<8x12xf32> -> vector<8x12xf32>
    %c4_21 = arith.constant 4 : index
    %c0_22 = arith.constant 0 : index
    %c0_23 = arith.constant 0 : index
    %39 = vector.load %arg5[%c4_21, %c0_22, %c0_23] : memref<12x1x12xf32, #tpu.memory_space<vmem>>, vector<1x1x12xf32>
    %40 = vector.shape_cast %39 : vector<1x1x12xf32> to vector<1x12xf32>
    %41 = vector.broadcast %40 : vector<1x12xf32> to vector<8x12xf32>
    %42 = arith.addf %38, %41 : vector<8x12xf32>
    %c8 = arith.constant 8 : index
    %c0_24 = arith.constant 0 : index
    %c0_25 = arith.constant 0 : index
    %43 = vector.load %arg4[%c8, %c0_24, %c0_25] : memref<12x48x12xf32, #tpu.memory_space<vmem>>, vector<1x48x12xf32>
    %44 = vector.shape_cast %43 : vector<1x48x12xf32> to vector<48x12xf32>
    %45 = arith.truncf %23 : vector<8x48xf32> to vector<8x48xbf16>
    %46 = arith.truncf %44 : vector<48x12xf32> to vector<48x12xbf16>
    %cst_26 = arith.constant dense<0.000000e+00> : vector<8x12xf32>
    %47 = tpu.matmul %45, %46, %cst_26 {dimension_numbers = #tpu.dot_dimension_numbers<[1], [0], [0], [1], [0, 0, 1, 1], [], []>} : vector<8x48xbf16>, vector<48x12xbf16>, vector<8x12xf32> -> vector<8x12xf32>
    %c8_27 = arith.constant 8 : index
    %c0_28 = arith.constant 0 : index
    %c0_29 = arith.constant 0 : index
    %48 = vector.load %arg5[%c8_27, %c0_28, %c0_29] : memref<12x1x12xf32, #tpu.memory_space<vmem>>, vector<1x1x12xf32>
    %49 = vector.shape_cast %48 : vector<1x1x12xf32> to vector<1x12xf32>
    %50 = vector.broadcast %49 : vector<1x12xf32> to vector<8x12xf32>
    %51 = arith.addf %47, %50 : vector<8x12xf32>
    %52 = tpu.transpose %42, [1, 0] : vector<8x12xf32> -> vector<12x8xf32>
    %53 = arith.truncf %33 : vector<8x12xf32> to vector<8x12xbf16>
    %54 = arith.truncf %52 : vector<12x8xf32> to vector<12x8xbf16>
    %cst_30 = arith.constant dense<0.000000e+00> : vector<8x8xf32>
    %55 = tpu.matmul %53, %54, %cst_30 {dimension_numbers = #tpu.dot_dimension_numbers<[1], [0], [0], [1], [0, 0, 1, 1], [], []>} : vector<8x12xbf16>, vector<12x8xbf16>, vector<8x8xf32> -> vector<8x8xf32>
    %cst_31 = arith.constant 0.288675129 : f32
    %56 = vector.broadcast %cst_31 : f32 to vector<8x8xf32>
    %57 = arith.mulf %55, %56 : vector<8x8xf32>
    %cst_32 = arith.constant dense<0xFF800000> : vector<8xf32>
    %58 = vector.multi_reduction <maximumf>, %57, %cst_32 [1] : vector<8x8xf32> to vector<8xf32>
    %59 = vector.shape_cast %58 : vector<8xf32> to vector<8x1xf32>
    %60 = vector.broadcast %59 : vector<8x1xf32> to vector<8x8xf32>
    %61 = arith.subf %57, %60 : vector<8x8xf32>
    %62 = math.exp %61 : vector<8x8xf32>
    %cst_33 = arith.constant dense<0.000000e+00> : vector<8xf32>
    %63 = vector.multi_reduction <add>, %62, %cst_33 [1] : vector<8x8xf32> to vector<8xf32>
    %64 = vector.shape_cast %63 : vector<8xf32> to vector<8x1xf32>
    %65 = tpu.reciprocal %64 {approx = true} : vector<8x1xf32> -> vector<8x1xf32>
    %66 = vector.broadcast %65 : vector<8x1xf32> to vector<8x8xf32>
    %67 = arith.mulf %62, %66 : vector<8x8xf32>
    %68 = arith.truncf %67 : vector<8x8xf32> to vector<8x8xbf16>
    %69 = arith.truncf %51 : vector<8x12xf32> to vector<8x12xbf16>
    %cst_34 = arith.constant dense<0.000000e+00> : vector<8x12xf32>
    %70 = tpu.matmul %68, %69, %cst_34 {dimension_numbers = #tpu.dot_dimension_numbers<[1], [0], [0], [1], [0, 0, 1, 1], [], []>} : vector<8x8xbf16>, vector<8x12xbf16>, vector<8x12xf32> -> vector<8x12xf32>
    %c0_35 = arith.constant 0 : index
    %c0_36 = arith.constant 0 : index
    %c0_37 = arith.constant 0 : index
    %71 = vector.load %arg6[%c0_35, %c0_36, %c0_37] : memref<4x12x48xf32, #tpu.memory_space<vmem>>, vector<1x12x48xf32>
    %72 = vector.shape_cast %71 : vector<1x12x48xf32> to vector<12x48xf32>
    %73 = arith.truncf %70 : vector<8x12xf32> to vector<8x12xbf16>
    %74 = arith.truncf %72 : vector<12x48xf32> to vector<12x48xbf16>
    %cst_38 = arith.constant dense<0.000000e+00> : vector<8x48xf32>
    %75 = tpu.matmul %73, %74, %cst_38 {dimension_numbers = #tpu.dot_dimension_numbers<[1], [0], [0], [1], [0, 0, 1, 1], [], []>} : vector<8x12xbf16>, vector<12x48xbf16>, vector<8x48xf32> -> vector<8x48xf32>
    %76 = arith.addf %24, %75 : vector<8x48xf32>
    %c1 = arith.constant 1 : index
    %c0_39 = arith.constant 0 : index
    %c0_40 = arith.constant 0 : index
    %77 = vector.load %arg4[%c1, %c0_39, %c0_40] : memref<12x48x12xf32, #tpu.memory_space<vmem>>, vector<1x48x12xf32>
    %78 = vector.shape_cast %77 : vector<1x48x12xf32> to vector<48x12xf32>
    %79 = arith.truncf %23 : vector<8x48xf32> to vector<8x48xbf16>
    %80 = arith.truncf %78 : vector<48x12xf32> to vector<48x12xbf16>
    %cst_41 = arith.constant dense<0.000000e+00> : vector<8x12xf32>
    %81 = tpu.matmul %79, %80, %cst_41 {dimension_numbers = #tpu.dot_dimension_numbers<[1], [0], [0], [1], [0, 0, 1, 1], [], []>} : vector<8x48xbf16>, vector<48x12xbf16>, vector<8x12xf32> -> vector<8x12xf32>
    %c1_42 = arith.constant 1 : index
    %c0_43 = arith.constant 0 : index
    %c0_44 = arith.constant 0 : index
    %82 = vector.load %arg5[%c1_42, %c0_43, %c0_44] : memref<12x1x12xf32, #tpu.memory_space<vmem>>, vector<1x1x12xf32>
    %83 = vector.shape_cast %82 : vector<1x1x12xf32> to vector<1x12xf32>
    %84 = vector.broadcast %83 : vector<1x12xf32> to vector<8x12xf32>
    %85 = arith.addf %81, %84 : vector<8x12xf32>
    %c5 = arith.constant 5 : index
    %c0_45 = arith.constant 0 : index
    %c0_46 = arith.constant 0 : index
    %86 = vector.load %arg4[%c5, %c0_45, %c0_46] : memref<12x48x12xf32, #tpu.memory_space<vmem>>, vector<1x48x12xf32>
    %87 = vector.shape_cast %86 : vector<1x48x12xf32> to vector<48x12xf32>
    %88 = arith.truncf %23 : vector<8x48xf32> to vector<8x48xbf16>
    %89 = arith.truncf %87 : vector<48x12xf32> to vector<48x12xbf16>
    %cst_47 = arith.constant dense<0.000000e+00> : vector<8x12xf32>
    %90 = tpu.matmul %88, %89, %cst_47 {dimension_numbers = #tpu.dot_dimension_numbers<[1], [0], [0], [1], [0, 0, 1, 1], [], []>} : vector<8x48xbf16>, vector<48x12xbf16>, vector<8x12xf32> -> vector<8x12xf32>
    %c5_48 = arith.constant 5 : index
    %c0_49 = arith.constant 0 : index
    %c0_50 = arith.constant 0 : index
    %91 = vector.load %arg5[%c5_48, %c0_49, %c0_50] : memref<12x1x12xf32, #tpu.memory_space<vmem>>, vector<1x1x12xf32>
    %92 = vector.shape_cast %91 : vector<1x1x12xf32> to vector<1x12xf32>
    %93 = vector.broadcast %92 : vector<1x12xf32> to vector<8x12xf32>
    %94 = arith.addf %90, %93 : vector<8x12xf32>
    %c9 = arith.constant 9 : index
    %c0_51 = arith.constant 0 : index
    %c0_52 = arith.constant 0 : index
    %95 = vector.load %arg4[%c9, %c0_51, %c0_52] : memref<12x48x12xf32, #tpu.memory_space<vmem>>, vector<1x48x12xf32>
    %96 = vector.shape_cast %95 : vector<1x48x12xf32> to vector<48x12xf32>
    %97 = arith.truncf %23 : vector<8x48xf32> to vector<8x48xbf16>
    %98 = arith.truncf %96 : vector<48x12xf32> to vector<48x12xbf16>
    %cst_53 = arith.constant dense<0.000000e+00> : vector<8x12xf32>
    %99 = tpu.matmul %97, %98, %cst_53 {dimension_numbers = #tpu.dot_dimension_numbers<[1], [0], [0], [1], [0, 0, 1, 1], [], []>} : vector<8x48xbf16>, vector<48x12xbf16>, vector<8x12xf32> -> vector<8x12xf32>
    %c9_54 = arith.constant 9 : index
    %c0_55 = arith.constant 0 : index
    %c0_56 = arith.constant 0 : index
    %100 = vector.load %arg5[%c9_54, %c0_55, %c0_56] : memref<12x1x12xf32, #tpu.memory_space<vmem>>, vector<1x1x12xf32>
    %101 = vector.shape_cast %100 : vector<1x1x12xf32> to vector<1x12xf32>
    %102 = vector.broadcast %101 : vector<1x12xf32> to vector<8x12xf32>
    %103 = arith.addf %99, %102 : vector<8x12xf32>
    %104 = tpu.transpose %94, [1, 0] : vector<8x12xf32> -> vector<12x8xf32>
    %105 = arith.truncf %85 : vector<8x12xf32> to vector<8x12xbf16>
    %106 = arith.truncf %104 : vector<12x8xf32> to vector<12x8xbf16>
    %cst_57 = arith.constant dense<0.000000e+00> : vector<8x8xf32>
    %107 = tpu.matmul %105, %106, %cst_57 {dimension_numbers = #tpu.dot_dimension_numbers<[1], [0], [0], [1], [0, 0, 1, 1], [], []>} : vector<8x12xbf16>, vector<12x8xbf16>, vector<8x8xf32> -> vector<8x8xf32>
    %cst_58 = arith.constant 0.288675129 : f32
    %108 = vector.broadcast %cst_58 : f32 to vector<8x8xf32>
    %109 = arith.mulf %107, %108 : vector<8x8xf32>
    %cst_59 = arith.constant dense<0xFF800000> : vector<8xf32>
    %110 = vector.multi_reduction <maximumf>, %109, %cst_59 [1] : vector<8x8xf32> to vector<8xf32>
    %111 = vector.shape_cast %110 : vector<8xf32> to vector<8x1xf32>
    %112 = vector.broadcast %111 : vector<8x1xf32> to vector<8x8xf32>
    %113 = arith.subf %109, %112 : vector<8x8xf32>
    %114 = math.exp %113 : vector<8x8xf32>
    %cst_60 = arith.constant dense<0.000000e+00> : vector<8xf32>
    %115 = vector.multi_reduction <add>, %114, %cst_60 [1] : vector<8x8xf32> to vector<8xf32>
    %116 = vector.shape_cast %115 : vector<8xf32> to vector<8x1xf32>
    %117 = tpu.reciprocal %116 {approx = true} : vector<8x1xf32> -> vector<8x1xf32>
    %118 = vector.broadcast %117 : vector<8x1xf32> to vector<8x8xf32>
    %119 = arith.mulf %114, %118 : vector<8x8xf32>
    %120 = arith.truncf %119 : vector<8x8xf32> to vector<8x8xbf16>
    %121 = arith.truncf %103 : vector<8x12xf32> to vector<8x12xbf16>
    %cst_61 = arith.constant dense<0.000000e+00> : vector<8x12xf32>
    %122 = tpu.matmul %120, %121, %cst_61 {dimension_numbers = #tpu.dot_dimension_numbers<[1], [0], [0], [1], [0, 0, 1, 1], [], []>} : vector<8x8xbf16>, vector<8x12xbf16>, vector<8x12xf32> -> vector<8x12xf32>
    %c1_62 = arith.constant 1 : index
    %c0_63 = arith.constant 0 : index
    %c0_64 = arith.constant 0 : index
    %123 = vector.load %arg6[%c1_62, %c0_63, %c0_64] : memref<4x12x48xf32, #tpu.memory_space<vmem>>, vector<1x12x48xf32>
    %124 = vector.shape_cast %123 : vector<1x12x48xf32> to vector<12x48xf32>
    %125 = arith.truncf %122 : vector<8x12xf32> to vector<8x12xbf16>
    %126 = arith.truncf %124 : vector<12x48xf32> to vector<12x48xbf16>
    %cst_65 = arith.constant dense<0.000000e+00> : vector<8x48xf32>
    %127 = tpu.matmul %125, %126, %cst_65 {dimension_numbers = #tpu.dot_dimension_numbers<[1], [0], [0], [1], [0, 0, 1, 1], [], []>} : vector<8x12xbf16>, vector<12x48xbf16>, vector<8x48xf32> -> vector<8x48xf32>
    %128 = arith.addf %76, %127 : vector<8x48xf32>
    %c2 = arith.constant 2 : index
    %c0_66 = arith.constant 0 : index
    %c0_67 = arith.constant 0 : index
    %129 = vector.load %arg4[%c2, %c0_66, %c0_67] : memref<12x48x12xf32, #tpu.memory_space<vmem>>, vector<1x48x12xf32>
    %130 = vector.shape_cast %129 : vector<1x48x12xf32> to vector<48x12xf32>
    %131 = arith.truncf %23 : vector<8x48xf32> to vector<8x48xbf16>
    %132 = arith.truncf %130 : vector<48x12xf32> to vector<48x12xbf16>
    %cst_68 = arith.constant dense<0.000000e+00> : vector<8x12xf32>
    %133 = tpu.matmul %131, %132, %cst_68 {dimension_numbers = #tpu.dot_dimension_numbers<[1], [0], [0], [1], [0, 0, 1, 1], [], []>} : vector<8x48xbf16>, vector<48x12xbf16>, vector<8x12xf32> -> vector<8x12xf32>
    %c2_69 = arith.constant 2 : index
    %c0_70 = arith.constant 0 : index
    %c0_71 = arith.constant 0 : index
    %134 = vector.load %arg5[%c2_69, %c0_70, %c0_71] : memref<12x1x12xf32, #tpu.memory_space<vmem>>, vector<1x1x12xf32>
    %135 = vector.shape_cast %134 : vector<1x1x12xf32> to vector<1x12xf32>
    %136 = vector.broadcast %135 : vector<1x12xf32> to vector<8x12xf32>
    %137 = arith.addf %133, %136 : vector<8x12xf32>
    %c6 = arith.constant 6 : index
    %c0_72 = arith.constant 0 : index
    %c0_73 = arith.constant 0 : index
    %138 = vector.load %arg4[%c6, %c0_72, %c0_73] : memref<12x48x12xf32, #tpu.memory_space<vmem>>, vector<1x48x12xf32>
    %139 = vector.shape_cast %138 : vector<1x48x12xf32> to vector<48x12xf32>
    %140 = arith.truncf %23 : vector<8x48xf32> to vector<8x48xbf16>
    %141 = arith.truncf %139 : vector<48x12xf32> to vector<48x12xbf16>
    %cst_74 = arith.constant dense<0.000000e+00> : vector<8x12xf32>
    %142 = tpu.matmul %140, %141, %cst_74 {dimension_numbers = #tpu.dot_dimension_numbers<[1], [0], [0], [1], [0, 0, 1, 1], [], []>} : vector<8x48xbf16>, vector<48x12xbf16>, vector<8x12xf32> -> vector<8x12xf32>
    %c6_75 = arith.constant 6 : index
    %c0_76 = arith.constant 0 : index
    %c0_77 = arith.constant 0 : index
    %143 = vector.load %arg5[%c6_75, %c0_76, %c0_77] : memref<12x1x12xf32, #tpu.memory_space<vmem>>, vector<1x1x12xf32>
    %144 = vector.shape_cast %143 : vector<1x1x12xf32> to vector<1x12xf32>
    %145 = vector.broadcast %144 : vector<1x12xf32> to vector<8x12xf32>
    %146 = arith.addf %142, %145 : vector<8x12xf32>
    %c10 = arith.constant 10 : index
    %c0_78 = arith.constant 0 : index
    %c0_79 = arith.constant 0 : index
    %147 = vector.load %arg4[%c10, %c0_78, %c0_79] : memref<12x48x12xf32, #tpu.memory_space<vmem>>, vector<1x48x12xf32>
    %148 = vector.shape_cast %147 : vector<1x48x12xf32> to vector<48x12xf32>
    %149 = arith.truncf %23 : vector<8x48xf32> to vector<8x48xbf16>
    %150 = arith.truncf %148 : vector<48x12xf32> to vector<48x12xbf16>
    %cst_80 = arith.constant dense<0.000000e+00> : vector<8x12xf32>
    %151 = tpu.matmul %149, %150, %cst_80 {dimension_numbers = #tpu.dot_dimension_numbers<[1], [0], [0], [1], [0, 0, 1, 1], [], []>} : vector<8x48xbf16>, vector<48x12xbf16>, vector<8x12xf32> -> vector<8x12xf32>
    %c10_81 = arith.constant 10 : index
    %c0_82 = arith.constant 0 : index
    %c0_83 = arith.constant 0 : index
    %152 = vector.load %arg5[%c10_81, %c0_82, %c0_83] : memref<12x1x12xf32, #tpu.memory_space<vmem>>, vector<1x1x12xf32>
    %153 = vector.shape_cast %152 : vector<1x1x12xf32> to vector<1x12xf32>
    %154 = vector.broadcast %153 : vector<1x12xf32> to vector<8x12xf32>
    %155 = arith.addf %151, %154 : vector<8x12xf32>
    %156 = tpu.transpose %146, [1, 0] : vector<8x12xf32> -> vector<12x8xf32>
    %157 = arith.truncf %137 : vector<8x12xf32> to vector<8x12xbf16>
    %158 = arith.truncf %156 : vector<12x8xf32> to vector<12x8xbf16>
    %cst_84 = arith.constant dense<0.000000e+00> : vector<8x8xf32>
    %159 = tpu.matmul %157, %158, %cst_84 {dimension_numbers = #tpu.dot_dimension_numbers<[1], [0], [0], [1], [0, 0, 1, 1], [], []>} : vector<8x12xbf16>, vector<12x8xbf16>, vector<8x8xf32> -> vector<8x8xf32>
    %cst_85 = arith.constant 0.288675129 : f32
    %160 = vector.broadcast %cst_85 : f32 to vector<8x8xf32>
    %161 = arith.mulf %159, %160 : vector<8x8xf32>
    %cst_86 = arith.constant dense<0xFF800000> : vector<8xf32>
    %162 = vector.multi_reduction <maximumf>, %161, %cst_86 [1] : vector<8x8xf32> to vector<8xf32>
    %163 = vector.shape_cast %162 : vector<8xf32> to vector<8x1xf32>
    %164 = vector.broadcast %163 : vector<8x1xf32> to vector<8x8xf32>
    %165 = arith.subf %161, %164 : vector<8x8xf32>
    %166 = math.exp %165 : vector<8x8xf32>
    %cst_87 = arith.constant dense<0.000000e+00> : vector<8xf32>
    %167 = vector.multi_reduction <add>, %166, %cst_87 [1] : vector<8x8xf32> to vector<8xf32>
    %168 = vector.shape_cast %167 : vector<8xf32> to vector<8x1xf32>
    %169 = tpu.reciprocal %168 {approx = true} : vector<8x1xf32> -> vector<8x1xf32>
    %170 = vector.broadcast %169 : vector<8x1xf32> to vector<8x8xf32>
    %171 = arith.mulf %166, %170 : vector<8x8xf32>
    %172 = arith.truncf %171 : vector<8x8xf32> to vector<8x8xbf16>
    %173 = arith.truncf %155 : vector<8x12xf32> to vector<8x12xbf16>
    %cst_88 = arith.constant dense<0.000000e+00> : vector<8x12xf32>
    %174 = tpu.matmul %172, %173, %cst_88 {dimension_numbers = #tpu.dot_dimension_numbers<[1], [0], [0], [1], [0, 0, 1, 1], [], []>} : vector<8x8xbf16>, vector<8x12xbf16>, vector<8x12xf32> -> vector<8x12xf32>
    %c2_89 = arith.constant 2 : index
    %c0_90 = arith.constant 0 : index
    %c0_91 = arith.constant 0 : index
    %175 = vector.load %arg6[%c2_89, %c0_90, %c0_91] : memref<4x12x48xf32, #tpu.memory_space<vmem>>, vector<1x12x48xf32>
    %176 = vector.shape_cast %175 : vector<1x12x48xf32> to vector<12x48xf32>
    %177 = arith.truncf %174 : vector<8x12xf32> to vector<8x12xbf16>
    %178 = arith.truncf %176 : vector<12x48xf32> to vector<12x48xbf16>
    %cst_92 = arith.constant dense<0.000000e+00> : vector<8x48xf32>
    %179 = tpu.matmul %177, %178, %cst_92 {dimension_numbers = #tpu.dot_dimension_numbers<[1], [0], [0], [1], [0, 0, 1, 1], [], []>} : vector<8x12xbf16>, vector<12x48xbf16>, vector<8x48xf32> -> vector<8x48xf32>
    %180 = arith.addf %128, %179 : vector<8x48xf32>
    %c3 = arith.constant 3 : index
    %c0_93 = arith.constant 0 : index
    %c0_94 = arith.constant 0 : index
    %181 = vector.load %arg4[%c3, %c0_93, %c0_94] : memref<12x48x12xf32, #tpu.memory_space<vmem>>, vector<1x48x12xf32>
    %182 = vector.shape_cast %181 : vector<1x48x12xf32> to vector<48x12xf32>
    %183 = arith.truncf %23 : vector<8x48xf32> to vector<8x48xbf16>
    %184 = arith.truncf %182 : vector<48x12xf32> to vector<48x12xbf16>
    %cst_95 = arith.constant dense<0.000000e+00> : vector<8x12xf32>
    %185 = tpu.matmul %183, %184, %cst_95 {dimension_numbers = #tpu.dot_dimension_numbers<[1], [0], [0], [1], [0, 0, 1, 1], [], []>} : vector<8x48xbf16>, vector<48x12xbf16>, vector<8x12xf32> -> vector<8x12xf32>
    %c3_96 = arith.constant 3 : index
    %c0_97 = arith.constant 0 : index
    %c0_98 = arith.constant 0 : index
    %186 = vector.load %arg5[%c3_96, %c0_97, %c0_98] : memref<12x1x12xf32, #tpu.memory_space<vmem>>, vector<1x1x12xf32>
    %187 = vector.shape_cast %186 : vector<1x1x12xf32> to vector<1x12xf32>
    %188 = vector.broadcast %187 : vector<1x12xf32> to vector<8x12xf32>
    %189 = arith.addf %185, %188 : vector<8x12xf32>
    %c7 = arith.constant 7 : index
    %c0_99 = arith.constant 0 : index
    %c0_100 = arith.constant 0 : index
    %190 = vector.load %arg4[%c7, %c0_99, %c0_100] : memref<12x48x12xf32, #tpu.memory_space<vmem>>, vector<1x48x12xf32>
    %191 = vector.shape_cast %190 : vector<1x48x12xf32> to vector<48x12xf32>
    %192 = arith.truncf %23 : vector<8x48xf32> to vector<8x48xbf16>
    %193 = arith.truncf %191 : vector<48x12xf32> to vector<48x12xbf16>
    %cst_101 = arith.constant dense<0.000000e+00> : vector<8x12xf32>
    %194 = tpu.matmul %192, %193, %cst_101 {dimension_numbers = #tpu.dot_dimension_numbers<[1], [0], [0], [1], [0, 0, 1, 1], [], []>} : vector<8x48xbf16>, vector<48x12xbf16>, vector<8x12xf32> -> vector<8x12xf32>
    %c7_102 = arith.constant 7 : index
    %c0_103 = arith.constant 0 : index
    %c0_104 = arith.constant 0 : index
    %195 = vector.load %arg5[%c7_102, %c0_103, %c0_104] : memref<12x1x12xf32, #tpu.memory_space<vmem>>, vector<1x1x12xf32>
    %196 = vector.shape_cast %195 : vector<1x1x12xf32> to vector<1x12xf32>
    %197 = vector.broadcast %196 : vector<1x12xf32> to vector<8x12xf32>
    %198 = arith.addf %194, %197 : vector<8x12xf32>
    %c11 = arith.constant 11 : index
    %c0_105 = arith.constant 0 : index
    %c0_106 = arith.constant 0 : index
    %199 = vector.load %arg4[%c11, %c0_105, %c0_106] : memref<12x48x12xf32, #tpu.memory_space<vmem>>, vector<1x48x12xf32>
    %200 = vector.shape_cast %199 : vector<1x48x12xf32> to vector<48x12xf32>
    %201 = arith.truncf %23 : vector<8x48xf32> to vector<8x48xbf16>
    %202 = arith.truncf %200 : vector<48x12xf32> to vector<48x12xbf16>
    %cst_107 = arith.constant dense<0.000000e+00> : vector<8x12xf32>
    %203 = tpu.matmul %201, %202, %cst_107 {dimension_numbers = #tpu.dot_dimension_numbers<[1], [0], [0], [1], [0, 0, 1, 1], [], []>} : vector<8x48xbf16>, vector<48x12xbf16>, vector<8x12xf32> -> vector<8x12xf32>
    %c11_108 = arith.constant 11 : index
    %c0_109 = arith.constant 0 : index
    %c0_110 = arith.constant 0 : index
    %204 = vector.load %arg5[%c11_108, %c0_109, %c0_110] : memref<12x1x12xf32, #tpu.memory_space<vmem>>, vector<1x1x12xf32>
    %205 = vector.shape_cast %204 : vector<1x1x12xf32> to vector<1x12xf32>
    %206 = vector.broadcast %205 : vector<1x12xf32> to vector<8x12xf32>
    %207 = arith.addf %203, %206 : vector<8x12xf32>
    %208 = tpu.transpose %198, [1, 0] : vector<8x12xf32> -> vector<12x8xf32>
    %209 = arith.truncf %189 : vector<8x12xf32> to vector<8x12xbf16>
    %210 = arith.truncf %208 : vector<12x8xf32> to vector<12x8xbf16>
    %cst_111 = arith.constant dense<0.000000e+00> : vector<8x8xf32>
    %211 = tpu.matmul %209, %210, %cst_111 {dimension_numbers = #tpu.dot_dimension_numbers<[1], [0], [0], [1], [0, 0, 1, 1], [], []>} : vector<8x12xbf16>, vector<12x8xbf16>, vector<8x8xf32> -> vector<8x8xf32>
    %cst_112 = arith.constant 0.288675129 : f32
    %212 = vector.broadcast %cst_112 : f32 to vector<8x8xf32>
    %213 = arith.mulf %211, %212 : vector<8x8xf32>
    %cst_113 = arith.constant dense<0xFF800000> : vector<8xf32>
    %214 = vector.multi_reduction <maximumf>, %213, %cst_113 [1] : vector<8x8xf32> to vector<8xf32>
    %215 = vector.shape_cast %214 : vector<8xf32> to vector<8x1xf32>
    %216 = vector.broadcast %215 : vector<8x1xf32> to vector<8x8xf32>
    %217 = arith.subf %213, %216 : vector<8x8xf32>
    %218 = math.exp %217 : vector<8x8xf32>
    %cst_114 = arith.constant dense<0.000000e+00> : vector<8xf32>
    %219 = vector.multi_reduction <add>, %218, %cst_114 [1] : vector<8x8xf32> to vector<8xf32>
    %220 = vector.shape_cast %219 : vector<8xf32> to vector<8x1xf32>
    %221 = tpu.reciprocal %220 {approx = true} : vector<8x1xf32> -> vector<8x1xf32>
    %222 = vector.broadcast %221 : vector<8x1xf32> to vector<8x8xf32>
    %223 = arith.mulf %218, %222 : vector<8x8xf32>
    %224 = arith.truncf %223 : vector<8x8xf32> to vector<8x8xbf16>
    %225 = arith.truncf %207 : vector<8x12xf32> to vector<8x12xbf16>
    %cst_115 = arith.constant dense<0.000000e+00> : vector<8x12xf32>
    %226 = tpu.matmul %224, %225, %cst_115 {dimension_numbers = #tpu.dot_dimension_numbers<[1], [0], [0], [1], [0, 0, 1, 1], [], []>} : vector<8x8xbf16>, vector<8x12xbf16>, vector<8x12xf32> -> vector<8x12xf32>
    %c3_116 = arith.constant 3 : index
    %c0_117 = arith.constant 0 : index
    %c0_118 = arith.constant 0 : index
    %227 = vector.load %arg6[%c3_116, %c0_117, %c0_118] : memref<4x12x48xf32, #tpu.memory_space<vmem>>, vector<1x12x48xf32>
    %228 = vector.shape_cast %227 : vector<1x12x48xf32> to vector<12x48xf32>
    %229 = arith.truncf %226 : vector<8x12xf32> to vector<8x12xbf16>
    %230 = arith.truncf %228 : vector<12x48xf32> to vector<12x48xbf16>
    %cst_119 = arith.constant dense<0.000000e+00> : vector<8x48xf32>
    %231 = tpu.matmul %229, %230, %cst_119 {dimension_numbers = #tpu.dot_dimension_numbers<[1], [0], [0], [1], [0, 0, 1, 1], [], []>} : vector<8x12xbf16>, vector<12x48xbf16>, vector<8x48xf32> -> vector<8x48xf32>
    %232 = arith.addf %180, %231 : vector<8x48xf32>
    %233 = arith.addf %1, %232 : vector<8x48xf32>
    %c0_120 = arith.constant 0 : index
    %c0_121 = arith.constant 0 : index
    %234 = vector.load %arg7[%c0_120, %c0_121] : memref<1x48xf32, #tpu.memory_space<vmem>>, vector<1x48xf32>
    %235 = vector.broadcast %234 : vector<1x48xf32> to vector<8x48xf32>
    %236 = arith.addf %233, %235 : vector<8x48xf32>
    %c0_122 = arith.constant 0 : index
    %c0_123 = arith.constant 0 : index
    %237 = vector.load %arg8[%c0_122, %c0_123] : memref<1x48xf32, #tpu.memory_space<vmem>>, vector<1x48xf32>
    %c0_124 = arith.constant 0 : index
    %c0_125 = arith.constant 0 : index
    %238 = vector.load %arg9[%c0_124, %c0_125] : memref<1x48xf32, #tpu.memory_space<vmem>>, vector<1x48xf32>
    %cst_126 = arith.constant dense<0.000000e+00> : vector<8xf32>
    %239 = vector.multi_reduction <add>, %236, %cst_126 [1] : vector<8x48xf32> to vector<8xf32>
    %240 = vector.shape_cast %239 : vector<8xf32> to vector<8x1xf32>
    %cst_127 = arith.constant 4.800000e+01 : f32
    %241 = vector.broadcast %cst_127 : f32 to vector<8x1xf32>
    %242 = arith.divf %240, %241 : vector<8x1xf32>
    %243 = vector.broadcast %242 : vector<8x1xf32> to vector<8x48xf32>
    %244 = arith.subf %236, %243 : vector<8x48xf32>
    %245 = arith.mulf %244, %244 : vector<8x48xf32>
    %cst_128 = arith.constant dense<0.000000e+00> : vector<8xf32>
    %246 = vector.multi_reduction <add>, %245, %cst_128 [1] : vector<8x48xf32> to vector<8xf32>
    %247 = vector.shape_cast %246 : vector<8xf32> to vector<8x1xf32>
    %cst_129 = arith.constant 4.800000e+01 : f32
    %248 = vector.broadcast %cst_129 : f32 to vector<8x1xf32>
    %249 = arith.divf %247, %248 : vector<8x1xf32>
    %cst_130 = arith.constant 9.99999974E-6 : f32
    %250 = vector.broadcast %cst_130 : f32 to vector<8x1xf32>
    %251 = arith.addf %249, %250 : vector<8x1xf32>
    %252 = math.rsqrt %251 : vector<8x1xf32>
    %253 = vector.broadcast %252 : vector<8x1xf32> to vector<8x48xf32>
    %254 = arith.mulf %244, %253 : vector<8x48xf32>
    %255 = vector.broadcast %237 : vector<1x48xf32> to vector<8x48xf32>
    %256 = arith.mulf %254, %255 : vector<8x48xf32>
    %257 = vector.broadcast %238 : vector<1x48xf32> to vector<8x48xf32>
    %258 = arith.addf %256, %257 : vector<8x48xf32>
    %c0_131 = arith.constant 0 : index
    %c0_132 = arith.constant 0 : index
    %259 = vector.load %arg10[%c0_131, %c0_132] : memref<48x128xf32, #tpu.memory_space<vmem>>, vector<48x128xf32>
    %260 = arith.truncf %258 : vector<8x48xf32> to vector<8x48xbf16>
    %261 = arith.truncf %259 : vector<48x128xf32> to vector<48x128xbf16>
    %cst_133 = arith.constant dense<0.000000e+00> : vector<8x128xf32>
    %262 = tpu.matmul %260, %261, %cst_133 {dimension_numbers = #tpu.dot_dimension_numbers<[1], [0], [0], [1], [0, 0, 1, 1], [], []>} : vector<8x48xbf16>, vector<48x128xbf16>, vector<8x128xf32> -> vector<8x128xf32>
    %c0_134 = arith.constant 0 : index
    %c0_135 = arith.constant 0 : index
    %263 = vector.load %arg11[%c0_134, %c0_135] : memref<1x128xf32, #tpu.memory_space<vmem>>, vector<1x128xf32>
    %264 = vector.broadcast %263 : vector<1x128xf32> to vector<8x128xf32>
    %265 = arith.addf %262, %264 : vector<8x128xf32>
    %cst_136 = arith.constant 5.000000e-01 : f32
    %266 = vector.broadcast %cst_136 : f32 to vector<8x128xf32>
    %267 = arith.mulf %266, %265 : vector<8x128xf32>
    %cst_137 = arith.constant 4.471500e-02 : f32
    %268 = vector.broadcast %cst_137 : f32 to vector<8x128xf32>
    %269 = arith.mulf %268, %265 : vector<8x128xf32>
    %270 = arith.mulf %269, %265 : vector<8x128xf32>
    %271 = arith.mulf %270, %265 : vector<8x128xf32>
    %272 = arith.addf %265, %271 : vector<8x128xf32>
    %cst_138 = arith.constant 0.797884583 : f32
    %273 = vector.broadcast %cst_138 : f32 to vector<8x128xf32>
    %274 = arith.mulf %273, %272 : vector<8x128xf32>
    %275 = math.tanh %274 : vector<8x128xf32>
    %cst_139 = arith.constant 1.000000e+00 : f32
    %276 = vector.broadcast %cst_139 : f32 to vector<8x128xf32>
    %277 = arith.addf %276, %275 : vector<8x128xf32>
    %278 = arith.mulf %267, %277 : vector<8x128xf32>
    %c0_140 = arith.constant 0 : index
    %c0_141 = arith.constant 0 : index
    %279 = vector.load %arg12[%c0_140, %c0_141] : memref<128x48xf32, #tpu.memory_space<vmem>>, vector<128x48xf32>
    %280 = arith.truncf %278 : vector<8x128xf32> to vector<8x128xbf16>
    %281 = arith.truncf %279 : vector<128x48xf32> to vector<128x48xbf16>
    %cst_142 = arith.constant dense<0.000000e+00> : vector<8x48xf32>
    %282 = tpu.matmul %280, %281, %cst_142 {dimension_numbers = #tpu.dot_dimension_numbers<[1], [0], [0], [1], [0, 0, 1, 1], [], []>} : vector<8x128xbf16>, vector<128x48xbf16>, vector<8x48xf32> -> vector<8x48xf32>
    %283 = arith.addf %236, %282 : vector<8x48xf32>
    %c0_143 = arith.constant 0 : index
    %c0_144 = arith.constant 0 : index
    %284 = vector.load %arg13[%c0_143, %c0_144] : memref<1x48xf32, #tpu.memory_space<vmem>>, vector<1x48xf32>
    %285 = vector.broadcast %284 : vector<1x48xf32> to vector<8x48xf32>
    %286 = arith.addf %283, %285 : vector<8x48xf32>
    %c0_145 = arith.constant 0 : index
    %c0_146 = arith.constant 0 : index
    %c0_147 = arith.constant 0 : index
    %287 = vector.load %arg14[%c0_145, %c0_146, %c0_147] : memref<1x8x48xf32, #tpu.memory_space<vmem>>, vector<1x8x48xf32>
    %288 = vector.shape_cast %287 : vector<1x8x48xf32> to vector<8x48xf32>
    %289 = vector.shape_cast %286 : vector<8x48xf32> to vector<1x8x48xf32>
    tpu.vector_store %arg14[%c0_145, %c0_146, %c0_147], %289 {strides = array<i32>} : memref<1x8x48xf32, #tpu.memory_space<vmem>>, vector<1x8x48xf32>,
    return
  }
  func.func @transform_0(%arg0: i32) -> (i32, i32, i32) {
    %c0_i32 = arith.constant 0 : i32
    %c0_i32_0 = arith.constant 0 : i32
    %c0_i32_1 = arith.constant 0 : i32
    return %arg0, %c0_i32, %c0_i32_0 : i32, i32, i32
  }
  func.func @transform_1(%arg0: i32) -> (i32, i32) {
    %c0_i32 = arith.constant 0 : i32
    %c0_i32_0 = arith.constant 0 : i32
    %c0_i32_1 = arith.constant 0 : i32
    return %c0_i32, %c0_i32_0 : i32, i32
  }
  func.func @transform_2(%arg0: i32) -> (i32, i32) {
    %c0_i32 = arith.constant 0 : i32
    %c0_i32_0 = arith.constant 0 : i32
    %c0_i32_1 = arith.constant 0 : i32
    return %c0_i32, %c0_i32_0 : i32, i32
  }
  func.func @transform_3(%arg0: i32) -> (i32, i32, i32) {
    %c0_i32 = arith.constant 0 : i32
    %c0_i32_0 = arith.constant 0 : i32
    %c0_i32_1 = arith.constant 0 : i32
    %c0_i32_2 = arith.constant 0 : i32
    return %c0_i32, %c0_i32_0, %c0_i32_1 : i32, i32, i32
  }
  func.func @transform_4(%arg0: i32) -> (i32, i32, i32) {
    %c0_i32 = arith.constant 0 : i32
    %c0_i32_0 = arith.constant 0 : i32
    %c0_i32_1 = arith.constant 0 : i32
    %c0_i32_2 = arith.constant 0 : i32
    return %c0_i32, %c0_i32_0, %c0_i32_1 : i32, i32, i32
  }
  func.func @transform_5(%arg0: i32) -> (i32, i32, i32) {
    %c0_i32 = arith.constant 0 : i32
    %c0_i32_0 = arith.constant 0 : i32
    %c0_i32_1 = arith.constant 0 : i32
    %c0_i32_2 = arith.constant 0 : i32
    return %c0_i32, %c0_i32_0, %c0_i32_1 : i32, i32, i32
  }
  func.func @transform_6(%arg0: i32) -> (i32, i32) {
    %c0_i32 = arith.constant 0 : i32
    %c0_i32_0 = arith.constant 0 : i32
    %c0_i32_1 = arith.constant 0 : i32
    return %c0_i32, %c0_i32_0 : i32, i32
  }
  func.func @transform_7(%arg0: i32) -> (i32, i32) {
    %c0_i32 = arith.constant 0 : i32
    %c0_i32_0 = arith.constant 0 : i32
    %c0_i32_1 = arith.constant 0 : i32
    return %c0_i32, %c0_i32_0 : i32, i32
  }
  func.func @transform_8(%arg0: i32) -> (i32, i32) {
    %c0_i32 = arith.constant 0 : i32
    %c0_i32_0 = arith.constant 0 : i32
    %c0_i32_1 = arith.constant 0 : i32
    return %c0_i32, %c0_i32_0 : i32, i32
  }
  func.func @transform_9(%arg0: i32) -> (i32, i32) {
    %c0_i32 = arith.constant 0 : i32
    %c0_i32_0 = arith.constant 0 : i32
    %c0_i32_1 = arith.constant 0 : i32
    return %c0_i32, %c0_i32_0 : i32, i32
  }
  func.func @transform_10(%arg0: i32) -> (i32, i32) {
    %c0_i32 = arith.constant 0 : i32
    %c0_i32_0 = arith.constant 0 : i32
    %c0_i32_1 = arith.constant 0 : i32
    return %c0_i32, %c0_i32_0 : i32, i32
  }
  func.func @transform_11(%arg0: i32) -> (i32, i32) {
    %c0_i32 = arith.constant 0 : i32
    %c0_i32_0 = arith.constant 0 : i32
    %c0_i32_1 = arith.constant 0 : i32
    return %c0_i32, %c0_i32_0 : i32, i32
  }
  func.func @transform_12(%arg0: i32) -> (i32, i32) {
    %c0_i32 = arith.constant 0 : i32
    %c0_i32_0 = arith.constant 0 : i32
    %c0_i32_1 = arith.constant 0 : i32
    return %c0_i32, %c0_i32_0 : i32, i32
  }
  func.func @transform_13(%arg0: i32) -> (i32, i32, i32) {
    %c0_i32 = arith.constant 0 : i32
    %c0_i32_0 = arith.constant 0 : i32
    %c0_i32_1 = arith.constant 0 : i32
    return %arg0, %c0_i32, %c0_i32_0 : i32, i32, i32
  }
}

</mosaic_0001>

<bundles_post_ra>
// kernel: forward.8
= control target key start
LH: loop header
LB: loop body
LE: loop exit
PB: predicated region body
PF: predicated region fallthrough
CT: control target
= control target key end

     0   :  { %s383_s15 = smov 0   ;;  %s415_s0 = inlined_call_operand.vmem [shape: f32[2,6,24], index: 0, kind: input, shape index: {}]   ;;  %s416_s1 = inlined_call_operand.vmem [shape: f32[24,32], index: 1, kind: input, shape index: {}]   ;;  %s417_s2 = inlined_call_operand.vmem [shape: f32[1,32], index: 2, kind: input, shape index: {}]   ;;  %s418_s3 = inlined_call_operand.vmem [shape: f32[6,32], index: 3, kind: input, shape index: {}]   ;;  %s419_s4 = inlined_call_operand.vmem [shape: f32[2,6,32], index: 4, kind: output, shape index: {}]  }
   0x1 LB: > { %s316_s16 = sadd.s32 4294967295, %s354_s15   ;;  %p320_p0 = scmp.ge.s32.totalorder %s354_s15, 1  ;;  %s354_s15 = sphi %s383_s15, %s14_s15  }
   0x2   : > { %p161_p1 = scmp.lt.s32.totalorder %s354_s15, 3 }
   0x4   : > { %p162_p2 = pnand %p320_p0, %p161_p1 }
   0x5   : > { %p185_p3 = scmp.lt.s32.totalorder (!%p162_p2), %s316_s16, 1 }
   0x6   : > { %165 = sbr.rel (%p162_p2) target bundleno = 223 (0xdf), region = 36 }
   0xb   : > { %v197_v0 = vld [vmem:[%s416_s1 + $0x10] sm:$0xff]  ;;  %vm212_vm0 = vcmask 1043456   ;;  %v356_v1 = vmov 0.0   ;;  %v195_v3 = vld [vmem:[%s416_s1] sm:$0xff]  ;;  %v196_v4 = vld [vmem:[%s416_s1 + $0x8] sm:$0xff]  ;;  %vm357_vm1 = vmmov 0  }
   0xc   : > { %330 = vmatprep.subr.bf16.mxu0 %v356_v1  ;;  %v200_v2 = vpack.c.bf16 %v197_v0, %v197_v0  ;;  %334 = vmatprep.mubr.msk.bf16.mxu0 %vm357_vm1, %v356_v1  ;;  %s421_s16 = smov (!%p185_p3, %s316_s16), 1  ;;  %v199_v6 = vpack.c.bf16 %v196_v4, %v195_v3  ;;  %vm208_vm2 = vcmask 195584   ;;  %v323_v9 = vld [vmem:[%s417_s2] ss:$0 sm:$0xff]  ;;  %vm261_vm4 = vcmask 259072  }
   0xd   : > { %s321_s23 = sshll.u32 %s421_s16, 3  ;;  %v259_v14 = vld [vmem:[%s418_s3] sm:$0x3f] }
   0xe   : > { %v214_v5 = vsel %vm212_vm0, %v200_v2, 0  ;;  %s188_s26 = scalar_lea.vmem %s415_s0, %s321_s23  ;;  %s192_s7 = scalar_lea.vmem %s419_s4, %s321_s23 }
   0xf   : > { %331 = vmatpush3.bf16.msra.mxu0 %v214_v5  ;;  %v194_v7 = vld [vmem:[%s188_s26] sm:$0x3f] }
  0x10   : > { %332 = vmatprep.subr.bf16.mxu0 %v356_v1  ;;  %v198_v8 = vpack.c.bf16 %v194_v7, %v194_v7 }
  0x13   : > { %333 = vmatpush3.bf16.msra.mxu0 %v199_v6 }
  0x16   : > { %335 = vmatmul.mubr.msk.bf16.vlgmr.msra.gmra.mxu0 %vm208_vm2, %v198_v8 }
  0xd6   : > { %v250_v10 = vpop.f32.mrf.mxu0 }
  0xd7   : > { %v251_v11 = vadd.f32 %v323_v9, %v250_v10 }
  0xd8   : > { %v336_v12 = vpop.f32.mrf.mxu0 }
  0xd9   : > { %vm256_vm3 = vcmp.gt.f32.partialorder %v251_v11, 0.0  ;;  %v257_v13 = vmul.f32 0.1, %v251_v11 }
  0xda   : > { %v253_v15 = vpop.f32.mrf.mxu0 }
  0xdb   : > { %v258_v16 = vsel %vm256_vm3, %v251_v11, %v257_v13 }
  0xdc   : > { %v260_v17 = vadd.f32 %v259_v14, %v258_v16  ;;  %v337_v18 = vpop.f32.mrf.mxu0 }
  0xde   : > { %262 = vst.msk [vmem:[%s192_s7] sm:$0x3f] %vm261_vm4, %v260_v17 }
  0xdf PF: > { %s14_s15 = sadd.s32 1, %s354_s15  }
  0xe0   : > { %p11_p4 = scmp.ge.s32.totalorder %s14_s15, 4  }
  0xe2   :  { %13 = sbr.rel (!%p11_p4) target bundleno = 1 (0x1), region = 66 }

// kernel: forward.11
= control target key start
LH: loop header
LB: loop body
LE: loop exit
PB: predicated region body
PF: predicated region fallthrough
CT: control target
= control target key end

     0   :  { %s380_s15 = smov 0   ;;  %s412_s0 = inlined_call_operand.vmem [shape: f32[2,8,24], index: 0, kind: input, shape index: {}]   ;;  %s413_s1 = inlined_call_operand.vmem [shape: f32[24,48], index: 1, kind: input, shape index: {}]   ;;  %s414_s2 = inlined_call_operand.vmem [shape: f32[1,48], index: 2, kind: input, shape index: {}]   ;;  %s415_s3 = inlined_call_operand.vmem [shape: f32[8,48], index: 3, kind: input, shape index: {}]   ;;  %s416_s4 = inlined_call_operand.vmem [shape: f32[2,8,48], index: 4, kind: output, shape index: {}]  }
   0x1 LB: > { %s313_s16 = sadd.s32 4294967295, %s351_s15   ;;  %p317_p0 = scmp.ge.s32.totalorder %s351_s15, 1  ;;  %s351_s15 = sphi %s380_s15, %s14_s15  }
   0x2   : > { %p161_p1 = scmp.lt.s32.totalorder %s351_s15, 3 }
   0x4   : > { %p162_p2 = pnand %p317_p0, %p161_p1 }
   0x5   : > { %p185_p3 = scmp.lt.s32.totalorder (!%p162_p2), %s313_s16, 1 }
   0x6   : > { %165 = sbr.rel (%p162_p2) target bundleno = 221 (0xdd), region = 36 }
   0xb   : > { %v197_v0 = vld [vmem:[%s413_s1 + $0x10] sm:$0xff]  ;;  %vm212_vm0 = vcmask 1043456   ;;  %v353_v1 = vmov 0.0   ;;  %v195_v3 = vld [vmem:[%s413_s1] sm:$0xff]  ;;  %v196_v4 = vld [vmem:[%s413_s1 + $0x8] sm:$0xff]  ;;  %vm354_vm1 = vmmov 0  }
   0xc   : > { %327 = vmatprep.subr.bf16.mxu0 %v353_v1  ;;  %v200_v2 = vpack.c.bf16 %v197_v0, %v197_v0  ;;  %331 = vmatprep.mubr.msk.bf16.mxu0 %vm354_vm1, %v353_v1  ;;  %s418_s16 = smov (!%p185_p3, %s313_s16), 1  ;;  %v199_v6 = vpack.c.bf16 %v196_v4, %v195_v3  ;;  %vm208_vm2 = vcmask 195584   ;;  %v320_v9 = vld [vmem:[%s414_s2] ss:$0 sm:$0xff]  ;;  %vm258_vm3 = vcmask 392192  }
   0xd   : > { %s318_s23 = sshll.u32 %s418_s16, 3  ;;  %v256_v11 = vld [vmem:[%s415_s3] sm:$0xff] }
   0xe   : > { %v214_v5 = vsel %vm212_vm0, %v200_v2, 0  ;;  %s188_s26 = scalar_lea.vmem %s412_s0, %s318_s23  ;;  %s192_s7 = scalar_lea.vmem %s416_s4, %s318_s23 }
   0xf   : > { %328 = vmatpush3.bf16.msra.mxu0 %v214_v5  ;;  %v194_v7 = vld [vmem:[%s188_s26] sm:$0xff] }
  0x10   : > { %329 = vmatprep.subr.bf16.mxu0 %v353_v1  ;;  %v198_v8 = vpack.c.bf16 %v194_v7, %v194_v7 }
  0x13   : > { %330 = vmatpush3.bf16.msra.mxu0 %v199_v6 }
  0x16   : > { %332 = vmatmul.mubr.msk.bf16.vlgmr.msra.gmra.mxu0 %vm208_vm2, %v198_v8 }
  0xd6   : > { %v250_v10 = vpop.f32.mrf.mxu0 }
  0xd7   : > { %v251_v12 = vadd.f32 %v320_v9, %v250_v10 }
  0xd8   : > { %v333_v13 = vpop.f32.mrf.mxu0 }
  0xd9   : > { %v257_v14 = vadd.f32 %v256_v11, %v251_v12 }
  0xda   : > { %v253_v15 = vpop.f32.mrf.mxu0 }
  0xdb   : > { %259 = vst.msk [vmem:[%s192_s7] sm:$0xff] %vm258_vm3, %v257_v14 }
  0xdc   : > { %v334_v16 = vpop.f32.mrf.mxu0 }
  0xdd PF: > { %s14_s15 = sadd.s32 1, %s351_s15  }
  0xde   : > { %p11_p4 = scmp.ge.s32.totalorder %s14_s15, 4  }
  0xe0   :  { %13 = sbr.rel (!%p11_p4) target bundleno = 1 (0x1), region = 66 }

// kernel: forward.15
= control target key start
LH: loop header
LB: loop body
LE: loop exit
PB: predicated region body
PF: predicated region fallthrough
CT: control target
= control target key end

     0   :  { %vm18_vm0 = vcmask 392192   ;;  %v161_v3 = vmov 0.0   ;;  %vm162_vm1 = vmmov 0   ;;  %s217_s0 = inlined_call_operand.vmem [shape: f32[2,8,48], index: 0, kind: input, shape index: {}]   ;;  %s218_s1 = inlined_call_operand.vmem [shape: f32[48,10], index: 1, kind: input, shape index: {}]   ;;  %s219_s2 = inlined_call_operand.vmem [shape: f32[1,10], index: 2, kind: input, shape index: {}]   ;;  %s220_s3 = inlined_call_operand.hbm [shape: f32[2,10], index: 3, kind: output, shape index: {}]  }
   0x1   :  { %v40_v0 = vld [vmem:[%s218_s1 + $0x20] sm:$0xff]  ;;  %v41_v1 = vld [vmem:[%s218_s1 + $0x28] sm:$0xff]  ;;  %v38_v2 = vld [vmem:[%s218_s1 + $0x10] sm:$0xff]  ;;  %126 = vmatprep.subr.bf16.mxu0 %v161_v3  ;;  %132 = vmatprep.mubr.msk.bf16.mxu0 %vm162_vm1, %v161_v3 }
   0x2   :  { %v46_v4 = vpack.c.bf16 %v41_v1, %v40_v0  ;;  %v39_v5 = vld [vmem:[%s218_s1 + $0x18] sm:$0xff]  ;;  %v16_v6 = vld [vmem:[%s217_s0] sm:$0xff]  ;;  %v17_v7 = vld [vmem:[%s217_s0 + $0x8] sm:$0xff] }
   0x3   :  { %v45_v8 = vpack.c.bf16 %v39_v5, %v38_v2  ;;  %v19_v9 = vsel %vm18_vm0, %v16_v6, 0.0  ;;  %v26_v10 = vsel %vm18_vm0, %v17_v7, 0.0 }
   0x4   :  { %127 = vmatpush3.bf16.msra.mxu0 %v46_v4 }
   0x5   :  { %8 = vsyncpa [#allocation3], 0  ;;  %128 = vmatprep.subr.bf16.mxu0 %v161_v3  ;;  %v36_v11 = vld [vmem:[%s218_s1] sm:$0xff]  ;;  %v37_v12 = vld [vmem:[%s218_s1 + $0x8] sm:$0xff]  ;;  %v20_v13 = vrot.slane %v19_v9, 4  ;;  %v27_v14 = vrot.slane %v26_v10, 4 }
   0x6   :  { %v44_v17 = vpack.c.bf16 %v37_v12, %v36_v11  ;;  %vm58_vm2 = vcmask 1041409   ;;  %v120_v34 = vld [vmem:[%s219_s2] ss:$0 sm:$0xff]  ;;  %s163_s28 = smov [#allocation2]   ;;  %vm104_vm3 = vcmask 74752  }
   0x7   :  { %v21_v15 = vadd.f32 %v20_v13, %v19_v9  ;;  %v28_v16 = vadd.f32 %v27_v14, %v26_v10  ;;  %s112_s29 = sshll.u32 %s163_s28, 4  ;;  %s113_s29 = int_to_ptr.vmem [resolvable:$true] %s112_s29 }
   0x8   :  { %129 = vmatpush3.bf16.msra.mxu0 %v45_v8  ;;  %s139_s30 = scalar_lea.vmem %s113_s29, 32  ;;  %p144_p1 = scmp.lt.s32.totalorder %s113_s29, %s113_s29 }
   0x9   :  { %130 = vmatprep.subr.bf16.mxu0 %v161_v3  ;;  %v22_v18 = vrot.slane %v21_v15, 2  ;;  %v29_v19 = vrot.slane %v28_v16, 2  ;;  %p140_p0 = scmp.ne.s32.totalorder %s113_s29, %s139_s30  ;;  %p145_p2 = scmp.lt.s32.totalorder %s139_s30, %s139_s30 }
   0xb   :  { %v23_v20 = vadd.f32 %v22_v18, %v21_v15  ;;  %v30_v21 = vadd.f32 %v29_v19, %v28_v16  ;;  %p146_p3 = por %p145_p2, %p144_p1 }
   0xc   :  { %131 = vmatpush3.bf16.msra.mxu0 %v44_v17 }
   0xd   :  { %v24_v22 = vrot.slane %v23_v20, 1  ;;  %v31_v23 = vrot.slane %v30_v21, 1  ;;  %p147_p4 = pnand %p146_p3, %p140_p0 }
   0xf   :  { %v25_v24 = vadd.f32 %v24_v22, %v23_v20  ;;  %v32_v25 = vadd.f32 %v31_v23, %v30_v21 }
  0x11   :  { %v34_v26 = vmul.f32 0.125, %v25_v24  ;;  %v35_v27 = vmul.f32 0.125, %v32_v25 }
  0x13   :  { %v42_v28 = vpack.c.bf16 %v34_v26, %v34_v26  ;;  %v43_v29 = vpack.c.bf16 %v35_v27, %v35_v27 }
  0x15   :  { %v56_v30 = vunpack.c.l.b16 %v42_v28  ;;  %v57_v31 = vunpack.c.l.b16 %v43_v29 }
  0x17   :  { %v59_v32 = vsel %vm58_vm2, %v57_v31, %v56_v30 }
  0x18   :  { %v60_v33 = vpack.c.b16 %v59_v32, %v59_v32 }
  0x1a   :  { %133 = vmatmul.mubr.msk.bf16.vlgmr.msra.gmra.mxu0 %vm18_vm0, %v60_v33 }
  0xda   :  { %v98_v35 = vpop.f32.mrf.mxu0 }
  0xdb   :  { %v99_v36 = vadd.f32 %v120_v34, %v98_v35 }
  0xdc   :  { %v134_v37 = vpop.f32.mrf.mxu0 }
  0xdd   :  { %105 = vst.msk [vmem:[#allocation2] sm:$0x3] %vm104_vm3, %v99_v36 }
  0xde   :  { %v101_v38 = vpop.f32.mrf.mxu0 }
  0xdf   :  { %150 = shalt.err (!%p147_p4)
}
  0xe0   :  { %115 = dma.vmem_to_hbm [thread:$0]  %s113_s29, 32, %s220_s3, [#allocation3]   ;;  %v135_v39 = vpop.f32.mrf.mxu0 }
  0xe1   :  { %159 = dma.done.wait [#allocation3], 32  }
  0xe2   :  { %160 = vsyncadd [#allocation3], 4294967264 }
  0xe3   :  { %119 = vsyncpa [#allocation3], 1 }

// kernel: forward.9
= control target key start
LH: loop header
LB: loop body
LE: loop exit
PB: predicated region body
PF: predicated region fallthrough
CT: control target
= control target key end

     0   :  { %s2602_s25 = smov 0   ;;  %s3049_s0 = inlined_call_operand.vmem [shape: f32[2,6,32], index: 0, kind: input, shape index: {}]   ;;  %s3050_s1 = inlined_call_operand.vmem [shape: f32[1,32], index: 1, kind: input, shape index: {}]   ;;  %s3051_s2 = inlined_call_operand.vmem [shape: f32[1,32], index: 2, kind: input, shape index: {}]   ;;  %s3052_s3 = inlined_call_operand.vmem [shape: f32[12,32,8], index: 3, kind: input, shape index: {}]   ;;  %s3053_s4 = inlined_call_operand.vmem [shape: f32[12,1,8], index: 4, kind: input, shape index: {}]   ;;  %s3054_s5 = inlined_call_operand.vmem [shape: f32[4,8,32], index: 5, kind: input, shape index: {}]   ;;  %s3055_s6 = inlined_call_operand.vmem [shape: f32[1,32], index: 6, kind: input, shape index: {}]   ;;  %s3056_s7 = inlined_call_operand.vmem [shape: f32[1,32], index: 7, kind: input, shape index: {}]   ;;  %s3057_s8 = inlined_call_operand.vmem [shape: f32[1,32], index: 8, kind: input, shape index: {}]   ;;  %s3058_s9 = inlined_call_operand.vmem [shape: f32[32,64], index: 9, kind: input, shape index: {}]   ;;  %s3059_s10 = inlined_call_operand.vmem [shape: f32[1,64], index: 10, kind: input, shape index: {}]   ;;  %s3060_s11 = inlined_call_operand.vmem [shape: f32[64,32], index: 11, kind: input, shape index: {}]   ;;  %s3061_s12 = inlined_call_operand.vmem [shape: f32[1,32], index: 12, kind: input, shape index: {}]   ;;  %s3062_s13 = inlined_call_operand.vmem [shape: f32[2,6,32], index: 13, kind: output, shape index: {}]  }
   0x1 LB: > { %s2122_s26 = sadd.s32 4294967295, %s2528_s25   ;;  %p2126_p0 = scmp.ge.s32.totalorder %s2528_s25, 1  ;;  %s2528_s25 = sphi %s2602_s25, %s23_s25  }
   0x2   : > { %p386_p1 = scmp.lt.s32.totalorder %s2528_s25, 3 }
   0x4   : > { %p387_p2 = pnand %p2126_p0, %p386_p1 }
   0x5   : > { %p428_p3 = scmp.lt.s32.totalorder (!%p387_p2), %s2122_s26, 1 }
   0x6   : > { %390 = sbr.rel (%p387_p2) target bundleno = 5078 (0x13d6), region = 72 }
   0xb   : > { %s3064_s26 = smov (!%p428_p3, %s2122_s26), 1  ;;  %vm440_vm0 = vcmask 259072   ;;  %v471_v7 = vld [vmem:[%s3052_s3 + $0x10] sm:$0xff]  ;;  %v472_v8 = vld [vmem:[%s3052_s3 + $0x18] sm:$0xff]  ;;  %v2530_v12 = vmov 0.0   ;;  %v469_v14 = vld [vmem:[%s3052_s3] sm:$0xff] }
   0xc   : > { %s2127_s27 = sshll.u32 %s3064_s26, 3  ;;  %v2135_v9 = vld [vmem:[%s3052_s3 + $0x90] sm:$0xff]  ;;  %v475_v10 = vpack.c.bf16 %v472_v8, %v471_v7  ;;  %v2136_v11 = vld [vmem:[%s3052_s3 + $0x98] sm:$0xff]  ;;  %2302 = vmatprep.subr.bf16.mxu0 %v2530_v12  ;;  %2310 = vmatprep.subr.bf16.mxu1 %v2530_v12  ;;  %v470_v15 = vld [vmem:[%s3052_s3 + $0x8] sm:$0xff]  ;;  %vm2531_vm1 = vmmov 0   ;;  %vm483_vm2 = vcmask 261120  }
   0xd   : > { %s431_s30 = scalar_lea.vmem %s3049_s0, %s2127_s27  ;;  %v533_v13 = vpack.c.bf16 %v2136_v11, %v2135_v9  ;;  %v2133_v16 = vld [vmem:[%s3052_s3 + $0x80] sm:$0xff]  ;;  %v474_v17 = vpack.c.bf16 %v470_v15, %v469_v14  ;;  %v2134_v18 = vld [vmem:[%s3052_s3 + $0x88] sm:$0xff]  ;;  %2306 = vmatprep.mubr.msk.bf16.mxu0 %vm2531_vm1, %v2530_v12  ;;  %2314 = vmatprep.mubr.msk.bf16.mxu1 %vm2531_vm1, %v2530_v12  ;;  %v2142_v28 = vld [vmem:[%s3052_s3 + $0x110] sm:$0xff]  ;;  %vm738_vm3 = vcmask 1042432   ;;  %vm675_vm4 = vcmask 1043456   ;;  %s435_s14 = scalar_lea.vmem %s3062_s13, %s2127_s27 }
   0xe   : > { %v2618_v0 = vld [vmem:[%s431_s30] sm:$0x3f]  ;;  %2303 = vmatpush3.bf16.msra.mxu0 %v475_v10  ;;  %v532_v19 = vpack.c.bf16 %v2134_v18, %v2133_v16  ;;  %v2143_v29 = vld [vmem:[%s3052_s3 + $0x118] sm:$0xff]  ;;  %v2141_v34 = vld [vmem:[%s3052_s3 + $0x108] sm:$0xff]  ;;  %vm671_vm5 = vcmask 64512   ;;  %vm720_vm6 = vcmask 46080  }
   0xf   : > { %v441_v1 = vsel %vm440_vm0, %v2618_v0, 0.0  ;;  %2311 = vmatpush3.bf16.msra.mxu1 %v533_v13  ;;  %2304 = vmatprep.subr.bf16.mxu0 %v2530_v12  ;;  %v2129_v24 = vld [vmem:[%s3050_s1] ss:$0 sm:$0xff]  ;;  %v588_v31 = vpack.c.bf16 %v2143_v29, %v2142_v28  ;;  %v2138_v36 = vld [vmem:[%s3053_s4 + $0x4] ss:$0 sm:$0xff]  ;;  %v2151_v58 = vld [vmem:[%s3052_s3 + $0x30] sm:$0xff] }
  0x10   : > { %442 = vadd.xlane.f32.xlu0 %v441_v1  ;;  %2312 = vmatprep.subr.bf16.mxu1 %v2530_v12  ;;  %v2130_v26 = vld [vmem:[%s3051_s2] ss:$0 sm:$0xff]  ;;  %v2145_v46 = vld [vmem:[%s3053_s4 + $0x8] ss:$0 sm:$0xff]  ;;  %v2152_v59 = vld [vmem:[%s3052_s3 + $0x38] sm:$0xff]  ;;  %vm734_vm7 = vcmask 48128  }
  0x11   : > { %v2140_v33 = vld [vmem:[%s3052_s3 + $0x100] sm:$0xff]  ;;  %v791_v61 = vpack.c.bf16 %v2152_v59, %v2151_v58  ;;  %v2150_v1 = vld [vmem:[%s3052_s3 + $0x28] sm:$0xff]  ;;  %vm2015_vm8 = vcmask 523264  }
  0x12   : > { %2305 = vmatpush3.bf16.msra.mxu0 %v474_v17  ;;  %v587_v35 = vpack.c.bf16 %v2141_v34, %v2140_v33  ;;  %v2131_v54 = vld [vmem:[%s3053_s4] ss:$0 sm:$0xff]  ;;  %v2164_v7 = vld [vmem:[%s3052_s3 + $0x128] sm:$0xff] }
  0x13   : > { %2313 = vmatpush3.bf16.msra.mxu1 %v532_v19  ;;  %2318 = vmatprep.subr.bf16.mxu0 %v2530_v12  ;;  %v2149_v63 = vld [vmem:[%s3052_s3 + $0x20] sm:$0xff] }
  0x14   : > { %2326 = vmatprep.subr.bf16.mxu1 %v2530_v12 }
  0x99   : > { %v443_v2 = vpop.xlane.xlu0 %442 }
  0x9a   : > { %v445_v3 = vmul.f32 0.03125, %v443_v2  ;;  %v790_v2 = vpack.c.bf16 %v2150_v1, %v2149_v63 }
  0x9c   : > { %v446_v4 = vsub.f32 %v2618_v0, %v445_v3  ;;  %v2165_v3 = vld [vmem:[%s3052_s3 + $0x130] sm:$0xff] }
  0x9e   : > { %v447_v5 = vmul.f32 %v446_v4, %v446_v4 }
  0xa0   : > { %v448_v6 = vsel %vm440_vm0, %v447_v5, 0.0 }
  0xa1   : > { %449 = vadd.xlane.f32.xlu0 %v448_v6  ;;  %v2163_v6 = vld [vmem:[%s3052_s3 + $0x120] sm:$0xff] }
  0xa2   : > { %v900_v8 = vpack.c.bf16 %v2164_v7, %v2163_v6 }
 0x12a   : > { %v450_v20 = vpop.xlane.xlu0 %449 }
 0x12b   : > { %v451_v21 = vmul.f32 0.03125, %v450_v20  ;;  %v2168_v20 = vld [vmem:[%s3053_s4 + $0x9] ss:$0 sm:$0xff] }
 0x12d   : > { %v452_v22 = vadd.f32 1e-05, %v451_v21 }
 0x12f   : > { %2500 = vrsqrt.f32 %v452_v22 }
 0x13c   : > { %v2501_v23 = vpop.eup %2500 }
 0x13d   : > { %v454_v25 = vmul.f32 %v2501_v23, %v446_v4  ;;  %v2166_v4 = vld [vmem:[%s3052_s3 + $0x138] sm:$0xff] }
 0x13e   : > { %v901_v5 = vpack.c.bf16 %v2166_v4, %v2165_v3 }
 0x13f   : > { %v461_v27 = vmul.f32 %v2129_v24, %v454_v25 }
 0x141   : > { %v468_v30 = vadd.f32 %v2130_v26, %v461_v27 }
 0x143   : > { %v2670_v32 = vpack.c.bf16 %v468_v30, %v468_v30 }
 0x145   : > { %2307 = vmatmul.mubr.msk.bf16.vlgmr.msra.gmra.mxu0 %vm483_vm2, %v2670_v32  ;;  %2315 = vmatmul.mubr.msk.bf16.vlgmr.msra.gmra.mxu1 %vm483_vm2, %v2670_v32 }
 0x146   : > { %2319 = vmatpush3.bf16.msra.mxu0 %v588_v31  ;;  %2322 = vmatprep.mubr.msk.bf16.mxu0 %vm2531_vm1, %v2530_v12 }
 0x147   : > { %2320 = vmatprep.subr.bf16.mxu0 %v2530_v12  ;;  %2328 = vmatprep.mubr.msk.bf16.mxu1 %vm2531_vm1, %v2530_v12 }
 0x14a   : > { %2321 = vmatpush3.bf16.msra.mxu0 %v587_v35  ;;  %v2158_v35 = vld [vmem:[%s3052_s3 + $0xb0] sm:$0xff] }
 0x14b   : > { %2332 = vmatprep.subr.bf16.mxu0 %v2530_v12 }
 0x14d   : > { %2323 = vmatmul.mubr.msk.bf16.vlgmr.msra.gmra.mxu0 %vm483_vm2, %v2670_v32 }
 0x14e   : > { %2334 = vmatprep.mubr.msk.bf16.mxu0 %vm2531_vm1, %v2530_v12 }
 0x205   : > { %v521_v37 = vpop.f32.mrf.mxu0  ;;  %v576_v38 = vpop.f32.mrf.mxu1 }
 0x206   : > { %v577_v39 = vadd.f32 %v2138_v36, %v576_v38  ;;  %v522_v56 = vadd.f32 %v2131_v54, %v521_v37  ;;  %v2159_v36 = vld [vmem:[%s3052_s3 + $0xb8] sm:$0xff]  ;;  %v2154_v54 = vld [vmem:[%s3053_s4 + $0x1] ss:$0 sm:$0xff] }
 0x207   : > { %v2308_v40 = vpop.f32.mrf.mxu0  ;;  %v2316_v41 = vpop.f32.mrf.mxu1 }
 0x208   : > { %637 = vxpose.xlu1.b32.start.end [1/1] (short) (narrow) %v577_v39, 8  ;;  %v669_v62 = vpack.c.bf16 %v522_v56, %v522_v56  ;;  %v846_v39 = vpack.c.bf16 %v2159_v36, %v2158_v35  ;;  %v2156_v41 = vld [vmem:[%s3052_s3 + $0xa0] sm:$0xff] }
 0x209   : > { %v524_v42 = vpop.f32.mrf.mxu0  ;;  %v579_v43 = vpop.f32.mrf.mxu1 }
 0x20a   : > { %v2157_v42 = vld [vmem:[%s3052_s3 + $0xa8] sm:$0xff] }
 0x20b   : > { %v2309_v44 = vpop.f32.mrf.mxu0  ;;  %v2317_v45 = vpop.f32.mrf.mxu1  ;;  %v845_v43 = vpack.c.bf16 %v2157_v42, %v2156_v41  ;;  %v2189_v42 = vld [vmem:[%s3052_s3 + $0x140] sm:$0xff] }
 0x20d   : > { %v631_v47 = vpop.f32.mrf.mxu0 }
 0x20e   : > { %v632_v48 = vadd.f32 %v2145_v46, %v631_v47 }
 0x20f   : > { %v2324_v49 = vpop.f32.mrf.mxu0 }
 0x210   : > { %v733_v50 = vpack.c.bf16 %v632_v48, %v632_v48  ;;  %v2161_v48 = vld [vmem:[%s3053_s4 + $0x5] ss:$0 sm:$0xff] }
 0x211   : > { %v634_v51 = vpop.f32.mrf.mxu0 }
 0x212   : > { %v740_v52 = vsel %vm738_vm3, %v733_v50, 0 }
 0x213   : > { %v2325_v53 = vpop.f32.mrf.mxu0  ;;  %2333 = vmatpush3.bf16.msra.mxu0 %v740_v52 }
 0x214   : > { %2346 = vmatprep.subr.bf16.mxu0 %v2530_v12 }
 0x284   : > { %v653_v55 = vpop.trf.xlu1 }
 0x285   : > { %v670_v57 = vpack.c.bf16 %v653_v55, %v653_v55 }
 0x287   : > { %v677_v60 = vsel %vm675_vm4, %v670_v57, 0 }
 0x288   : > { %2327 = vmatpush3.bf16.msra.mxu1 %v677_v60 }
 0x289   : > { %2338 = vmatprep.subr.bf16.mxu1 %v2530_v12 }
 0x28b   : > { %2329 = vmatmul.mubr.msk.bf16.vlgmr.msra.gmra.mxu1 %vm671_vm5, %v669_v62 }
 0x28c   : > { %2339 = vmatpush3.bf16.msra.mxu1 %v791_v61  ;;  %2342 = vmatprep.mubr.msk.bf16.mxu1 %vm2531_vm1, %v2530_v12 }
 0x28d   : > { %2340 = vmatprep.subr.bf16.mxu1 %v2530_v12 }
 0x290   : > { %2341 = vmatpush3.bf16.msra.mxu1 %v790_v2 }
 0x291   : > { %2354 = vmatprep.subr.bf16.mxu1 %v2530_v12 }
 0x293   : > { %2343 = vmatmul.mubr.msk.bf16.vlgmr.msra.gmra.mxu1 %vm483_vm2, %v2670_v32 }
 0x294   : > { %2355 = vmatpush3.bf16.msra.mxu1 %v901_v5  ;;  %2358 = vmatprep.mubr.msk.bf16.mxu1 %vm2531_vm1, %v2530_v12 }
 0x295   : > { %2356 = vmatprep.subr.bf16.mxu1 %v2530_v12 }
 0x298   : > { %2357 = vmatpush3.bf16.msra.mxu1 %v900_v8 }
 0x299   : > { %2368 = vmatprep.subr.bf16.mxu1 %v2530_v12 }
 0x29b   : > { %2359 = vmatmul.mubr.msk.bf16.vlgmr.msra.gmra.mxu1 %vm483_vm2, %v2670_v32 }
 0x29c   : > { %2370 = vmatprep.mubr.msk.bf16.mxu1 %vm2531_vm1, %v2530_v12 }
 0x34b   : > { %v713_v9 = vpop.f32.mrf.mxu1 }
 0x34c   : > { %v719_v10 = vmul.f32 0.35355338, %v713_v9  ;;  %v782_v9 = vld [vmem:[%s3054_s5] sm:$0xff] }
 0x34d   : > { %v2330_v11 = vpop.f32.mrf.mxu1 }
 0x34e   : > { %v721_v13 = vsel %vm720_vm6, %v719_v10, -inf }
 0x34f   : > { %722 = vmax.xlane.f32.xlu1 %v721_v13  ;;  %v716_v14 = vpop.f32.mrf.mxu1 }
 0x351   : > { %v2331_v15 = vpop.f32.mrf.mxu1 }
 0x353   : > { %v834_v16 = vpop.f32.mrf.mxu1 }
 0x354   : > { %v835_v56 = vadd.f32 %v2154_v54, %v834_v16  ;;  %v2184_v16 = vld [vmem:[%s3052_s3 + $0xd0] sm:$0xff] }
 0x355   : > { %v2344_v17 = vpop.f32.mrf.mxu1 }
 0x356   : > { %v982_v59 = vpack.c.bf16 %v835_v56, %v835_v56  ;;  %v2185_v17 = vld [vmem:[%s3052_s3 + $0xd8] sm:$0xff] }
 0x357   : > { %v837_v18 = vpop.f32.mrf.mxu1 }
 0x358   : > { %v1247_v18 = vpack.c.bf16 %v2185_v17, %v2184_v16 }
 0x359   : > { %v2345_v19 = vpop.f32.mrf.mxu1 }
 0x35b   : > { %v944_v21 = vpop.f32.mrf.mxu1 }
 0x35c   : > { %v945_v22 = vadd.f32 %v2168_v20, %v944_v21  ;;  %v2182_v20 = vld [vmem:[%s3052_s3 + $0xc0] sm:$0xff]  ;;  %v2183_v21 = vld [vmem:[%s3052_s3 + $0xc8] sm:$0xff] }
 0x35d   : > { %v2360_v23 = vpop.f32.mrf.mxu1 }
 0x35e   : > { %v1043_v24 = vpack.c.bf16 %v945_v22, %v945_v22  ;;  %v1246_v22 = vpack.c.bf16 %v2183_v21, %v2182_v20  ;;  %v2172_v23 = vld [vmem:[%s3054_s5 + $0x8] sm:$0xff] }
 0x35f   : > { %v947_v25 = vpop.f32.mrf.mxu1 }
 0x360   : > { %v1048_v26 = vsel %vm738_vm3, %v1043_v24, 0  ;;  %v1093_v24 = vpack.c.bf16 %v2172_v23, %v2172_v23 }
 0x361   : > { %v2361_v27 = vpop.f32.mrf.mxu1  ;;  %2369 = vmatpush3.bf16.msra.mxu1 %v1048_v26  ;;  %v2177_v26 = vld [vmem:[%s3052_s3 + $0x50] sm:$0xff] }
 0x362   : > { %2380 = vmatprep.subr.bf16.mxu1 %v2530_v12  ;;  %v1098_v25 = vsel %vm675_vm4, %v1093_v24, 0  ;;  %v2178_v27 = vld [vmem:[%s3052_s3 + $0x58] sm:$0xff] }
 0x3d8   : > { %v723_v28 = vpop.xlane.xlu1 %722 }
 0x3d9   : > { %v724_v29 = vsub.f32 %v719_v10, %v723_v28  ;;  %v784_v10 = vpack.c.bf16 %v782_v9, %v782_v9 }
 0x3db   : > { %v725_v30 = vmul.f32 1.442695, %v724_v29  ;;  %v1144_v15 = vsel %vm675_vm4, %v784_v10, 0  ;;  %v1192_v29 = vpack.c.bf16 %v2178_v27, %v2177_v26  ;;  %v2202_v26 = vld [vmem:[%s3052_s3 + $0x70] sm:$0xff]  ;;  %v2203_v27 = vld [vmem:[%s3052_s3 + $0x78] sm:$0xff] }
 0x3dd   : > { %2502 = vpow2.f32 %v725_v30 }
 0x3ea   : > { %v2503_v31 = vpop.eup %2502 }
 0x3eb   : > { %v727_v33 = vsel %vm720_vm6, %v2503_v31, 0.0 }
 0x3ec   : > { %728 = vadd.xlane.f32.xlu0 %v727_v33  ;;  %v2176_v33 = vld [vmem:[%s3052_s3 + $0x48] sm:$0xff] }
 0x475   : > { %v729_v34 = vpop.xlane.xlu0 %728 }
 0x476   : > { %2504 = vrcp.f32 %v729_v34 }
 0x483   : > { %v2505_v37 = vpop.eup %2504 }
 0x484   : > { %v731_v38 = vmul.f32 %v2505_v37, %v2503_v31  ;;  %v2175_v31 = vld [vmem:[%s3052_s3 + $0x40] sm:$0xff]  ;;  %v2191_v37 = vld [vmem:[%s3052_s3 + $0x150] sm:$0xff] }
 0x485   : > { %v1191_v36 = vpack.c.bf16 %v2176_v33, %v2175_v31  ;;  %v2200_v33 = vld [vmem:[%s3052_s3 + $0x60] sm:$0xff] }
 0x486   : > { %v732_v40 = vpack.c.bf16 %v731_v38, %v731_v38  ;;  %v2192_v38 = vld [vmem:[%s3052_s3 + $0x158] sm:$0xff] }
 0x487   : > { %v1302_v41 = vpack.c.bf16 %v2192_v38, %v2191_v37  ;;  %v2217_v37 = vld [vmem:[%s3052_s3 + $0x178] sm:$0xff] }
 0x488   : > { %2335 = vmatmul.mubr.msk.bf16.vlgmr.msra.gmra.mxu0 %vm734_vm7, %v732_v40 }
 0x489   : > { %2347 = vmatpush3.bf16.msra.mxu0 %v846_v39  ;;  %2350 = vmatprep.mubr.msk.bf16.mxu0 %vm2531_vm1, %v2530_v12 }
 0x48a   : > { %2348 = vmatprep.subr.bf16.mxu0 %v2530_v12 }
 0x48d   : > { %2349 = vmatpush3.bf16.msra.mxu0 %v845_v43  ;;  %v2190_v43 = vld [vmem:[%s3052_s3 + $0x148] sm:$0xff] }
 0x48e   : > { %2362 = vmatprep.subr.bf16.mxu0 %v2530_v12 }
 0x490   : > { %2351 = vmatmul.mubr.msk.bf16.vlgmr.msra.gmra.mxu0 %vm483_vm2, %v2670_v32 }
 0x491   : > { %2364 = vmatprep.mubr.msk.bf16.mxu0 %vm2531_vm1, %v2530_v12 }
 0x548   : > { %v776_v44 = vpop.f32.mrf.mxu0 }
 0x549   : > { %v783_v19 = vpack.c.bf16 %v776_v44, %v776_v44 }
 0x54a   : > { %v2336_v45 = vpop.f32.mrf.mxu0 }
 0x54c   : > { %v779_v46 = vpop.f32.mrf.mxu0 }
 0x54d   : > { %v1301_v46 = vpack.c.bf16 %v2190_v43, %v2189_v42  ;;  %v2198_v43 = vld [vmem:[%s3054_s5 + $0x10] sm:$0xff] }
 0x54e   : > { %v2337_v47 = vpop.f32.mrf.mxu0 }
 0x550   : > { %v889_v49 = vpop.f32.mrf.mxu0 }
 0x551   : > { %v890_v50 = vadd.f32 %v2161_v48, %v889_v49  ;;  %v2187_v48 = vld [vmem:[%s3053_s4 + $0x6] ss:$0 sm:$0xff] }
 0x552   : > { %v2352_v51 = vpop.f32.mrf.mxu0 }
 0x553   : > { %950 = vxpose.xlu0.b32.start.end [1/1] (short) (narrow) %v890_v50, 8 }
 0x554   : > { %v892_v52 = vpop.f32.mrf.mxu0 }
 0x556   : > { %v2353_v53 = vpop.f32.mrf.mxu0 }
 0x5cf   : > { %v966_v55 = vpop.trf.xlu0 }
 0x5d0   : > { %v983_v57 = vpack.c.bf16 %v966_v55, %v966_v55 }
 0x5d2   : > { %v988_v58 = vsel %vm675_vm4, %v983_v57, 0 }
 0x5d3   : > { %2363 = vmatpush3.bf16.msra.mxu0 %v988_v58 }
 0x5d4   : > { %2374 = vmatprep.subr.bf16.mxu0 %v2530_v12 }
 0x5d6   : > { %2365 = vmatmul.mubr.msk.bf16.vlgmr.msra.gmra.mxu0 %vm671_vm5, %v982_v59 }
 0x5d7   : > { %2376 = vmatprep.mubr.msk.bf16.mxu0 %vm2531_vm1, %v2530_v12  ;;  %2375 = vmatpush3.bf16.msra.mxu0 %v1098_v25 }
 0x5d8   : > { %2386 = vmatprep.subr.bf16.mxu0 %v2530_v12 }
 0x696   : > { %v1024_v60 = vpop.f32.mrf.mxu0 }
 0x697   : > { %v1030_v61 = vmul.f32 0.35355338, %v1024_v60 }
 0x698   : > { %v2366_v62 = vpop.f32.mrf.mxu0 }
 0x699   : > { %v1031_v63 = vsel %vm720_vm6, %v1030_v61, -inf }
 0x69a   : > { %1032 = vmax.xlane.f32.xlu1 %v1031_v63  ;;  %v1027_v1 = vpop.f32.mrf.mxu0 }
 0x69c   : > { %v2367_v2 = vpop.f32.mrf.mxu0 }
 0x723   : > { %v1033_v3 = vpop.xlane.xlu1 %1032 }
 0x724   : > { %v1034_v4 = vsub.f32 %v1030_v61, %v1033_v3  ;;  %v2180_v61 = vld [vmem:[%s3053_s4 + $0x2] ss:$0 sm:$0xff] }
 0x726   : > { %v1035_v5 = vmul.f32 1.442695, %v1034_v4 }
 0x728   : > { %2506 = vpow2.f32 %v1035_v5  ;;  %v2194_v5 = vld [vmem:[%s3053_s4 + $0xa] ss:$0 sm:$0xff] }
 0x735   : > { %v2507_v6 = vpop.eup %2506 }
 0x736   : > { %v1037_v7 = vsel %vm720_vm6, %v2507_v6, 0.0 }
 0x737   : > { %1038 = vadd.xlane.f32.xlu1 %v1037_v7 }
 0x7c0   : > { %v1039_v8 = vpop.xlane.xlu1 %1038 }
 0x7c1   : > { %2508 = vrcp.f32 %v1039_v8 }
 0x7ce   : > { %v2509_v11 = vpop.eup %2508 }
 0x7cf   : > { %v1041_v13 = vmul.f32 %v2509_v11, %v2507_v6 }
 0x7d1   : > { %v1042_v14 = vpack.c.bf16 %v1041_v13, %v1041_v13 }
 0x7d3   : > { %2371 = vmatmul.mubr.msk.bf16.vlgmr.msra.gmra.mxu1 %vm734_vm7, %v1042_v14 }
 0x7d4   : > { %2381 = vmatpush3.bf16.msra.mxu1 %v1144_v15  ;;  %2382 = vmatprep.mubr.msk.bf16.mxu1 %vm2531_vm1, %v2530_v12 }
 0x7d5   : > { %2394 = vmatprep.subr.bf16.mxu1 %v2530_v12 }
 0x7db   : > { %2383 = vmatmul.mubr.msk.bf16.vlgmr.msra.gmra.mxu1 %vm671_vm5, %v783_v19 }
 0x7dc   : > { %2395 = vmatpush3.bf16.msra.mxu1 %v1247_v18  ;;  %2398 = vmatprep.mubr.msk.bf16.mxu1 %vm2531_vm1, %v2530_v12 }
 0x7dd   : > { %2396 = vmatprep.subr.bf16.mxu1 %v2530_v12 }
 0x7e0   : > { %2397 = vmatpush3.bf16.msra.mxu1 %v1246_v22 }
 0x7e1   : > { %2410 = vmatprep.subr.bf16.mxu1 %v2530_v12 }
 0x7e3   : > { %2399 = vmatmul.mubr.msk.bf16.vlgmr.msra.gmra.mxu1 %vm483_vm2, %v2670_v32 }
 0x7e4   : > { %2412 = vmatprep.mubr.msk.bf16.mxu1 %vm2531_vm1, %v2530_v12 }
 0x893   : > { %v1084_v28 = vpop.f32.mrf.mxu1 }
 0x894   : > { %v1092_v30 = vpack.c.bf16 %v1084_v28, %v1084_v28 }
 0x895   : > { %v2372_v34 = vpop.f32.mrf.mxu1 }
 0x896   : > { %2377 = vmatmul.mubr.msk.bf16.vlgmr.msra.gmra.mxu0 %vm671_vm5, %v1092_v30  ;;  %v1548_v30 = vpack.c.bf16 %v2203_v27, %v2202_v26  ;;  %v2201_v34 = vld [vmem:[%s3052_s3 + $0x68] sm:$0xff] }
 0x897   : > { %v1087_v35 = vpop.f32.mrf.mxu1  ;;  %2387 = vmatpush3.bf16.msra.mxu0 %v1192_v29  ;;  %2390 = vmatprep.mubr.msk.bf16.mxu0 %vm2531_vm1, %v2530_v12 }
 0x898   : > { %2388 = vmatprep.subr.bf16.mxu0 %v2530_v12  ;;  %v1547_v35 = vpack.c.bf16 %v2201_v34, %v2200_v33 }
 0x899   : > { %v2373_v39 = vpop.f32.mrf.mxu1 }
 0x89a   : > { %v2214_v39 = vld [vmem:[%s3052_s3 + $0x160] sm:$0xff] }
 0x89b   : > { %v2841_v40 = vpop.f32.mrf.mxu1  ;;  %2389 = vmatpush3.bf16.msra.mxu0 %v1191_v36  ;;  %v2216_v36 = vld [vmem:[%s3052_s3 + $0x170] sm:$0xff] }
 0x89c   : > { %2402 = vmatprep.subr.bf16.mxu0 %v2530_v12  ;;  %v1658_v38 = vpack.c.bf16 %v2217_v37, %v2216_v36 }
 0x89d   : > { %v2384_v44 = vpop.f32.mrf.mxu1 }
 0x89e   : > { %2391 = vmatmul.mubr.msk.bf16.vlgmr.msra.gmra.mxu0 %vm483_vm2, %v2670_v32  ;;  %v1494_v44 = vpack.c.bf16 %v2198_v43, %v2198_v43 }
 0x89f   : > { %v1183_v45 = vpop.f32.mrf.mxu1  ;;  %2403 = vmatpush3.bf16.msra.mxu0 %v1302_v41  ;;  %2406 = vmatprep.mubr.msk.bf16.mxu0 %vm2531_vm1, %v2530_v12  ;;  %v2215_v41 = vld [vmem:[%s3052_s3 + $0x168] sm:$0xff] }
 0x8a0   : > { %2404 = vmatprep.subr.bf16.mxu0 %v2530_v12  ;;  %v1657_v42 = vpack.c.bf16 %v2215_v41, %v2214_v39  ;;  %v1499_v45 = vsel %vm675_vm4, %v1494_v44, 0  ;;  %v2223_v39 = vld [vmem:[%s3054_s5 + $0x18] sm:$0xff] }
 0x8a1   : > { %v2385_v47 = vpop.f32.mrf.mxu1  ;;  %v1850_v41 = vpack.c.bf16 %v2223_v39, %v2223_v39 }
 0x8a2   : > { %v2210_v47 = vld [vmem:[%s3052_s3 + $0xf8] sm:$0xff] }
 0x8a3   : > { %v1290_v49 = vpop.f32.mrf.mxu1  ;;  %2405 = vmatpush3.bf16.msra.mxu0 %v1301_v46  ;;  %v2209_v46 = vld [vmem:[%s3052_s3 + $0xf0] sm:$0xff] }
 0x8a4   : > { %v1291_v50 = vadd.f32 %v2187_v48, %v1290_v49  ;;  %2416 = vmatprep.subr.bf16.mxu0 %v2530_v12  ;;  %v1603_v49 = vpack.c.bf16 %v2210_v47, %v2209_v46 }
 0x8a5   : > { %v2400_v51 = vpop.f32.mrf.mxu1 }
 0x8a6   : > { %2407 = vmatmul.mubr.msk.bf16.vlgmr.msra.gmra.mxu0 %vm483_vm2, %v2670_v32  ;;  %1351 = vxpose.xlu1.b32.start.end [1/1] (short) (narrow) %v1291_v50, 8  ;;  %v2207_v51 = vld [vmem:[%s3052_s3 + $0xe0] sm:$0xff] }
 0x8a7   : > { %v1293_v52 = vpop.f32.mrf.mxu1  ;;  %2418 = vmatprep.mubr.msk.bf16.mxu0 %vm2531_vm1, %v2530_v12 }
 0x8a8   : > { %v2208_v52 = vld [vmem:[%s3052_s3 + $0xe8] sm:$0xff] }
 0x8a9   : > { %v2401_v53 = vpop.f32.mrf.mxu1 }
 0x922   : > { %v1367_v54 = vpop.trf.xlu1 }
 0x923   : > { %v1384_v55 = vpack.c.bf16 %v1367_v54, %v1367_v54 }
 0x925   : > { %v1389_v56 = vsel %vm675_vm4, %v1384_v55, 0  ;;  %v1602_v55 = vpack.c.bf16 %v2208_v52, %v2207_v51 }
 0x926   : > { %2411 = vmatpush3.bf16.msra.mxu1 %v1389_v56 }
 0x927   : > { %2422 = vmatprep.subr.bf16.mxu1 %v2530_v12 }
 0x956   : > { %v2865_v57 = vpop.f32.mrf.mxu0 }
 0x958   : > { %v2378_v58 = vpop.f32.mrf.mxu0 }
 0x95a   : > { %v1137_v59 = vpop.f32.mrf.mxu0 }
 0x95c   : > { %v2379_v60 = vpop.f32.mrf.mxu0 }
 0x95e   : > { %v1235_v62 = vpop.f32.mrf.mxu0 }
 0x95f   : > { %v1236_v63 = vadd.f32 %v2180_v61, %v1235_v62  ;;  %v2219_v62 = vld [vmem:[%s3053_s4 + $0xb] ss:$0 sm:$0xff] }
 0x960   : > { %v2392_v1 = vpop.f32.mrf.mxu0 }
 0x961   : > { %v1383_v2 = vpack.c.bf16 %v1236_v63, %v1236_v63 }
 0x962   : > { %v1238_v3 = vpop.f32.mrf.mxu0 }
 0x963   : > { %2413 = vmatmul.mubr.msk.bf16.vlgmr.msra.gmra.mxu1 %vm671_vm5, %v1383_v2 }
 0x964   : > { %v2393_v4 = vpop.f32.mrf.mxu0  ;;  %2424 = vmatprep.mubr.msk.bf16.mxu1 %vm2531_vm1, %v2530_v12  ;;  %2423 = vmatpush3.bf16.msra.mxu1 %v1499_v45 }
 0x965   : > { %2436 = vmatprep.subr.bf16.mxu1 %v2530_v12 }
 0x966   : > { %v1345_v6 = vpop.f32.mrf.mxu0 }
 0x967   : > { %v1346_v7 = vadd.f32 %v2194_v5, %v1345_v6 }
 0x968   : > { %v2408_v8 = vpop.f32.mrf.mxu0 }
 0x969   : > { %v1444_v9 = vpack.c.bf16 %v1346_v7, %v1346_v7 }
 0x96a   : > { %v1348_v10 = vpop.f32.mrf.mxu0 }
 0x96b   : > { %v1449_v11 = vsel %vm738_vm3, %v1444_v9, 0 }
 0x96c   : > { %v2409_v13 = vpop.f32.mrf.mxu0  ;;  %2417 = vmatpush3.bf16.msra.mxu0 %v1449_v11 }
 0x96d   : > { %2428 = vmatprep.subr.bf16.mxu0 %v2530_v12  ;;  %v2212_v13 = vld [vmem:[%s3053_s4 + $0x7] ss:$0 sm:$0xff] }
 0xa23   : > { %v1425_v14 = vpop.f32.mrf.mxu1 }
 0xa24   : > { %v1431_v15 = vmul.f32 0.35355338, %v1425_v14 }
 0xa25   : > { %v2414_v16 = vpop.f32.mrf.mxu1 }
 0xa26   : > { %v1432_v17 = vsel %vm720_vm6, %v1431_v15, -inf }
 0xa27   : > { %1433 = vmax.xlane.f32.xlu0 %v1432_v17  ;;  %v1428_v18 = vpop.f32.mrf.mxu1 }
 0xa29   : > { %v2415_v19 = vpop.f32.mrf.mxu1 }
 0xa2a   : > { %v2205_v19 = vld [vmem:[%s3053_s4 + $0x3] ss:$0 sm:$0xff] }
 0xab0   : > { %v1434_v20 = vpop.xlane.xlu0 %1433 }
 0xab1   : > { %v1435_v21 = vsub.f32 %v1431_v15, %v1434_v20 }
 0xab3   : > { %v1436_v22 = vmul.f32 1.442695, %v1435_v21 }
 0xab5   : > { %2510 = vpow2.f32 %v1436_v22 }
 0xac2   : > { %v2511_v23 = vpop.eup %2510 }
 0xac3   : > { %v1438_v24 = vsel %vm720_vm6, %v2511_v23, 0.0 }
 0xac4   : > { %1439 = vadd.xlane.f32.xlu0 %v1438_v24 }
 0xb4d   : > { %v1440_v25 = vpop.xlane.xlu0 %1439 }
 0xb4e   : > { %2512 = vrcp.f32 %v1440_v25 }
 0xb5b   : > { %v2513_v28 = vpop.eup %2512 }
 0xb5c   : > { %v1442_v29 = vmul.f32 %v2513_v28, %v2511_v23 }
 0xb5e   : > { %v1443_v31 = vpack.c.bf16 %v1442_v29, %v1442_v29 }
 0xb60   : > { %2419 = vmatmul.mubr.msk.bf16.vlgmr.msra.gmra.mxu0 %vm734_vm7, %v1443_v31 }
 0xb61   : > { %2429 = vmatpush3.bf16.msra.mxu0 %v1548_v30  ;;  %2432 = vmatprep.mubr.msk.bf16.mxu0 %vm2531_vm1, %v2530_v12 }
 0xb62   : > { %2430 = vmatprep.subr.bf16.mxu0 %v2530_v12 }
 0xb65   : > { %2431 = vmatpush3.bf16.msra.mxu0 %v1547_v35 }
 0xb66   : > { %2444 = vmatprep.subr.bf16.mxu0 %v2530_v12 }
 0xb68   : > { %2433 = vmatmul.mubr.msk.bf16.vlgmr.msra.gmra.mxu0 %vm483_vm2, %v2670_v32 }
 0xb69   : > { %2445 = vmatpush3.bf16.msra.mxu0 %v1658_v38  ;;  %2448 = vmatprep.mubr.msk.bf16.mxu0 %vm2531_vm1, %v2530_v12 }
 0xb6a   : > { %2446 = vmatprep.subr.bf16.mxu0 %v2530_v12 }
 0xb6d   : > { %2447 = vmatpush3.bf16.msra.mxu0 %v1657_v42  ;;  %v1855_v42 = vsel %vm675_vm4, %v1850_v41, 0 }
 0xb6e   : > { %2458 = vmatprep.subr.bf16.mxu0 %v2530_v12 }
 0xb70   : > { %2449 = vmatmul.mubr.msk.bf16.vlgmr.msra.gmra.mxu0 %vm483_vm2, %v2670_v32 }
 0xb71   : > { %2460 = vmatprep.mubr.msk.bf16.mxu0 %vm2531_vm1, %v2530_v12 }
 0xc20   : > { %v1485_v48 = vpop.f32.mrf.mxu0 }
 0xc21   : > { %v1493_v50 = vpack.c.bf16 %v1485_v48, %v1485_v48 }
 0xc22   : > { %v2420_v53 = vpop.f32.mrf.mxu0 }
 0xc23   : > { %2425 = vmatmul.mubr.msk.bf16.vlgmr.msra.gmra.mxu1 %vm671_vm5, %v1493_v50  ;;  %v2225_v50 = vld [vmem:[%s3055_s6] ss:$0 sm:$0xff] }
 0xc24   : > { %v1488_v54 = vpop.f32.mrf.mxu0  ;;  %2437 = vmatpush3.bf16.msra.mxu1 %v1603_v49  ;;  %2440 = vmatprep.mubr.msk.bf16.mxu1 %vm2531_vm1, %v2530_v12 }
 0xc25   : > { %2438 = vmatprep.subr.bf16.mxu1 %v2530_v12 }
 0xc26   : > { %v2421_v56 = vpop.f32.mrf.mxu0 }
 0xc28   : > { %v1591_v58 = vpop.f32.mrf.mxu0  ;;  %2439 = vmatpush3.bf16.msra.mxu1 %v1602_v55 }
 0xc29   : > { %2452 = vmatprep.subr.bf16.mxu1 %v2530_v12 }
 0xc2a   : > { %v2434_v59 = vpop.f32.mrf.mxu0 }
 0xc2b   : > { %2441 = vmatmul.mubr.msk.bf16.vlgmr.msra.gmra.mxu1 %vm483_vm2, %v2670_v32  ;;  %v1181_v32 = vadd.f32 %v2841_v40, %v2865_v57  ;;  %v1592_v57 = vadd.f32 %v2205_v19, %v1591_v58  ;;  %v2007_v19 = vld [vmem:[%s3060_s11 + $0x28] sm:$0xff] }
 0xc2c   : > { %v1594_v60 = vpop.f32.mrf.mxu0  ;;  %2454 = vmatprep.mubr.msk.bf16.mxu1 %vm2531_vm1, %v2530_v12 }
 0xc2d   : > { %v1739_v22 = vpack.c.bf16 %v1592_v57, %v1592_v57  ;;  %v2004_v57 = vld [vmem:[%s3060_s11 + $0x10] sm:$0xff] }
 0xc2e   : > { %v2435_v61 = vpop.f32.mrf.mxu0 }
 0xc30   : > { %v1701_v63 = vpop.f32.mrf.mxu0 }
 0xc31   : > { %v1702_v1 = vadd.f32 %v2219_v62, %v1701_v63  ;;  %v1939_v63 = vld [vmem:[%s3058_s9 + $0x18] sm:$0xff] }
 0xc32   : > { %v2450_v2 = vpop.f32.mrf.mxu0 }
 0xc33   : > { %v1800_v3 = vpack.c.bf16 %v1702_v1, %v1702_v1  ;;  %v1936_v2 = vld [vmem:[%s3058_s9] sm:$0xff] }
 0xc34   : > { %v1704_v4 = vpop.f32.mrf.mxu0 }
 0xc35   : > { %v1805_v5 = vsel %vm738_vm3, %v1800_v3, 0  ;;  %v1937_v3 = vld [vmem:[%s3058_s9 + $0x8] sm:$0xff] }
 0xc36   : > { %v2451_v6 = vpop.f32.mrf.mxu0  ;;  %2459 = vmatpush3.bf16.msra.mxu0 %v1805_v5  ;;  %v1941_v4 = vpack.c.bf16 %v1937_v3, %v1936_v2 }
 0xc37   : > { %2470 = vmatprep.subr.bf16.mxu0 %v2530_v12 }
 0xce3   : > { %v1535_v7 = vpop.f32.mrf.mxu1 }
 0xce4   : > { %v1541_v8 = vadd.f32 %v1535_v7, %v1181_v32 }
 0xce5   : > { %v2426_v9 = vpop.f32.mrf.mxu1 }
 0xce7   : > { %v1538_v10 = vpop.f32.mrf.mxu1 }
 0xce8   : > { %v2227_v10 = vld [vmem:[%s3057_s8] ss:$0 sm:$0xff] }
 0xce9   : > { %v2427_v11 = vpop.f32.mrf.mxu1 }
 0xceb   : > { %v1646_v14 = vpop.f32.mrf.mxu1 }
 0xcec   : > { %v1647_v15 = vadd.f32 %v2212_v13, %v1646_v14 }
 0xced   : > { %v2442_v16 = vpop.f32.mrf.mxu1 }
 0xcee   : > { %1707 = vxpose.xlu1.b32.start.end [1/1] (short) (narrow) %v1647_v15, 8  ;;  %v2008_v15 = vld [vmem:[%s3060_s11 + $0x30] sm:$0xff]  ;;  %v2009_v16 = vld [vmem:[%s3060_s11 + $0x38] sm:$0xff] }
 0xcef   : > { %v1649_v17 = vpop.f32.mrf.mxu1 }
 0xcf0   : > { %v2006_v17 = vld [vmem:[%s3060_s11 + $0x20] sm:$0xff] }
 0xcf1   : > { %v2443_v18 = vpop.f32.mrf.mxu1 }
 0xcf2   : > { %v2014_v18 = vpack.c.bf16 %v2009_v16, %v2008_v15 }
 0xd6a   : > { %v1723_v40 = vpop.trf.xlu1 }
 0xd6b   : > { %v1740_v20 = vpack.c.bf16 %v1723_v40, %v1723_v40  ;;  %v2013_v40 = vpack.c.bf16 %v2007_v19, %v2006_v17 }
 0xd6d   : > { %v1745_v21 = vsel %vm675_vm4, %v1740_v20, 0  ;;  %v2005_v20 = vld [vmem:[%s3060_s11 + $0x18] sm:$0xff] }
 0xd6e   : > { %2453 = vmatpush3.bf16.msra.mxu1 %v1745_v21  ;;  %v2012_v21 = vpack.c.bf16 %v2005_v20, %v2004_v57 }
 0xd6f   : > { %2464 = vmatprep.subr.bf16.mxu1 %v2530_v12 }
 0xd71   : > { %2455 = vmatmul.mubr.msk.bf16.vlgmr.msra.gmra.mxu1 %vm671_vm5, %v1739_v22  ;;  %v2002_v22 = vld [vmem:[%s3060_s11] sm:$0xff] }
 0xd72   : > { %2466 = vmatprep.mubr.msk.bf16.mxu1 %vm2531_vm1, %v2530_v12  ;;  %2465 = vmatpush3.bf16.msra.mxu1 %v1855_v42 }
 0xd73   : > { %2478 = vmatprep.subr.bf16.mxu1 %v2530_v12 }
 0xe31   : > { %v1781_v23 = vpop.f32.mrf.mxu1 }
 0xe32   : > { %v1787_v24 = vmul.f32 0.35355338, %v1781_v23  ;;  %v2003_v23 = vld [vmem:[%s3060_s11 + $0x8] sm:$0xff] }
 0xe33   : > { %v2456_v25 = vpop.f32.mrf.mxu1 }
 0xe34   : > { %v1788_v26 = vsel %vm720_vm6, %v1787_v24, -inf  ;;  %v2228_v25 = vld [vmem:[%s3059_s10] ss:$0 sm:$0xff] }
 0xe35   : > { %1789 = vmax.xlane.f32.xlu0 %v1788_v26  ;;  %v1784_v27 = vpop.f32.mrf.mxu1 }
 0xe37   : > { %v2457_v28 = vpop.f32.mrf.mxu1 }
 0xebe   : > { %v1790_v29 = vpop.xlane.xlu0 %1789 }
 0xebf   : > { %v1791_v30 = vsub.f32 %v1787_v24, %v1790_v29  ;;  %v2011_v24 = vpack.c.bf16 %v2003_v23, %v2002_v22 }
 0xec1   : > { %v1792_v31 = vmul.f32 1.442695, %v1791_v30 }
 0xec3   : > { %2514 = vpow2.f32 %v1792_v31 }
 0xed0   : > { %v2515_v33 = vpop.eup %2514 }
 0xed1   : > { %v1794_v34 = vsel %vm720_vm6, %v2515_v33, 0.0 }
 0xed2   : > { %1795 = vadd.xlane.f32.xlu1 %v1794_v34 }
 0xf5b   : > { %v1796_v35 = vpop.xlane.xlu1 %1795 }
 0xf5c   : > { %2516 = vrcp.f32 %v1796_v35 }
 0xf69   : > { %v2517_v36 = vpop.eup %2516 }
 0xf6a   : > { %v1798_v37 = vmul.f32 %v2517_v36, %v2515_v33 }
 0xf6c   : > { %v1799_v38 = vpack.c.bf16 %v1798_v37, %v1798_v37 }
 0xf6e   : > { %2461 = vmatmul.mubr.msk.bf16.vlgmr.msra.gmra.mxu0 %vm734_vm7, %v1799_v38 }
 0xf6f   : > { %2474 = vmatprep.mubr.msk.bf16.mxu0 %vm2531_vm1, %v2530_v12 }
0x102e   : > { %v1841_v43 = vpop.f32.mrf.mxu0 }
0x102f   : > { %v1849_v44 = vpack.c.bf16 %v1841_v43, %v1841_v43  ;;  %v2231_v43 = vld [vmem:[%s3061_s12] ss:$0 sm:$0xff] }
0x1030   : > { %v2462_v45 = vpop.f32.mrf.mxu0 }
0x1031   : > { %2467 = vmatmul.mubr.msk.bf16.vlgmr.msra.gmra.mxu1 %vm671_vm5, %v1849_v44 }
0x1032   : > { %v1844_v46 = vpop.f32.mrf.mxu0  ;;  %2486 = vmatprep.mubr.msk.bf16.mxu1 %vm2531_vm1, %v2530_v12  ;;  %2479 = vmatpush3.bf16.msra.mxu1 %v2014_v18 }
0x1033   : > { %2480 = vmatprep.subr.bf16.mxu1 %v2530_v12 }
0x1034   : > { %v2463_v47 = vpop.f32.mrf.mxu0 }
0x1036   : > { %2481 = vmatpush3.bf16.msra.mxu1 %v2013_v40 }
0x1037   : > { %2482 = vmatprep.subr.bf16.mxu1 %v2530_v12 }
0x103a   : > { %2483 = vmatpush3.bf16.msra.mxu1 %v2012_v21 }
0x103b   : > { %2484 = vmatprep.subr.bf16.mxu1 %v2530_v12 }
0x103e   : > { %2485 = vmatpush3.bf16.msra.mxu1 %v2011_v24 }
0x10f1   : > { %v1891_v48 = vpop.f32.mrf.mxu1 }
0x10f2   : > { %v1897_v49 = vadd.f32 %v1891_v48, %v1541_v8  ;;  %v2226_v8 = vld [vmem:[%s3056_s7] ss:$0 sm:$0xff] }
0x10f3   : > { %v2468_v51 = vpop.f32.mrf.mxu1 }
0x10f4   : > { %v1898_v52 = vadd.f32 %v1897_v49, %v2618_v0  ;;  %v1938_v0 = vld [vmem:[%s3058_s9 + $0x10] sm:$0xff] }
0x10f5   : > { %v1894_v53 = vpop.f32.mrf.mxu1  ;;  %v1942_v1 = vpack.c.bf16 %v1939_v63, %v1938_v0 }
0x10f6   : > { %v2980_v54 = vadd.f32 %v2225_v50, %v1898_v52 }
0x10f7   : > { %v2469_v55 = vpop.f32.mrf.mxu1  ;;  %2471 = vmatpush3.bf16.msra.mxu0 %v1942_v1 }
0x10f8   : > { %v1909_v56 = vsel %vm440_vm0, %v2980_v54, 0.0  ;;  %2472 = vmatprep.subr.bf16.mxu0 %v2530_v12 }
0x10f9   : > { %1910 = vadd.xlane.f32.xlu0 %v1909_v56 }
0x10fb   : > { %2473 = vmatpush3.bf16.msra.mxu0 %v1941_v4 }
0x1182   : > { %v1911_v58 = vpop.xlane.xlu0 %1910 }
0x1183   : > { %v1912_v59 = vmul.f32 0.03125, %v1911_v58 }
0x1185   : > { %v1913_v60 = vsub.f32 %v2980_v54, %v1912_v59 }
0x1187   : > { %v1914_v61 = vmul.f32 %v1913_v60, %v1913_v60 }
0x1189   : > { %v1915_v62 = vsel %vm440_vm0, %v1914_v61, 0.0 }
0x118a   : > { %1916 = vadd.xlane.f32.xlu0 %v1915_v62 }
0x1213   : > { %v1917_v5 = vpop.xlane.xlu0 %1916 }
0x1214   : > { %v1918_v6 = vmul.f32 0.03125, %v1917_v5 }
0x1216   : > { %v1919_v32 = vadd.f32 1e-05, %v1918_v6 }
0x1218   : > { %2518 = vrsqrt.f32 %v1919_v32 }
0x1225   : > { %v2519_v7 = vpop.eup %2518 }
0x1226   : > { %v1921_v9 = vmul.f32 %v2519_v7, %v1913_v60 }
0x1228   : > { %v1928_v11 = vmul.f32 %v2226_v8, %v1921_v9 }
0x122a   : > { %v1935_v13 = vadd.f32 %v2227_v10, %v1928_v11 }
0x122c   : > { %v1940_v14 = vpack.c.bf16 %v1935_v13, %v1935_v13 }
0x122e   : > { %2475 = vmatmul.mubr.msk.bf16.vlgmr.msra.gmra.mxu0 %vm483_vm2, %v1940_v14 }
0x12ee   : > { %v1987_v26 = vpop.f32.mrf.mxu0 }
0x12ef   : > { %v1988_v27 = vadd.f32 %v2228_v25, %v1987_v26 }
0x12f0   : > { %v2476_v28 = vpop.f32.mrf.mxu0 }
0x12f1   : > { %v1994_v29 = vmul.f32 0.044715, %v1988_v27  ;;  %v1993_v38 = vmul.f32 0.5, %v1988_v27 }
0x12f2   : > { %v1990_v30 = vpop.f32.mrf.mxu0 }
0x12f3   : > { %v1995_v31 = vmul.f32 %v1994_v29, %v1988_v27 }
0x12f4   : > { %v2477_v33 = vpop.f32.mrf.mxu0 }
0x12f5   : > { %v1996_v34 = vmul.f32 %v1995_v31, %v1988_v27 }
0x12f7   : > { %v1997_v35 = vadd.f32 %v1996_v34, %v1988_v27 }
0x12f9   : > { %v1998_v36 = vmul.f32 0.7978846, %v1997_v35 }
0x12fb   : > { %2520 = vtanh.f32 %v1998_v36 }
0x1308   : > { %v2521_v37 = vpop.eup %2520 }
0x1309   : > { %v2000_v12 = vadd.f32 1.0, %v2521_v37 }
0x130b   : > { %v2001_v39 = vmul.f32 %v2000_v12, %v1993_v38 }
0x130d   : > { %v2010_v41 = vpack.c.bf16 %v2001_v39, %v2001_v39 }
0x130f   : > { %2487 = vmatmul.mubr.msk.bf16.vlgmr.msra.gmra.mxu1 %vm2015_vm8, %v2010_v41 }
0x13cf   : > { %v2053_v42 = vpop.f32.mrf.mxu1 }
0x13d0   : > { %v2059_v44 = vadd.f32 %v2053_v42, %v2980_v54 }
0x13d1   : > { %v2488_v45 = vpop.f32.mrf.mxu1 }
0x13d2   : > { %v2067_v46 = vadd.f32 %v2231_v43, %v2059_v44 }
0x13d3   : > { %v2056_v47 = vpop.f32.mrf.mxu1 }
0x13d4   : > { %2068 = vst.msk [vmem:[%s435_s14] sm:$0x3f] %vm440_vm0, %v2067_v46 }
0x13d5   : > { %v2489_v48 = vpop.f32.mrf.mxu1 }
0x13d6 PF: > { %s23_s25 = sadd.s32 1, %s2528_s25  }
0x13d7   : > { %p20_p4 = scmp.ge.s32.totalorder %s23_s25, 4  }
0x13d9   :  { %22 = sbr.rel (!%p20_p4) target bundleno = 1 (0x1), region = 127 }

// kernel: forward.12
= control target key start
LH: loop header
LB: loop body
LE: loop exit
PB: predicated region body
PF: predicated region fallthrough
CT: control target
= control target key end

     0   :  { %s2727_s25 = smov 0   ;;  %s3310_s0 = inlined_call_operand.vmem [shape: f32[2,8,48], index: 0, kind: input, shape index: {}]   ;;  %s3311_s1 = inlined_call_operand.vmem [shape: f32[1,48], index: 1, kind: input, shape index: {}]   ;;  %s3312_s2 = inlined_call_operand.vmem [shape: f32[1,48], index: 2, kind: input, shape index: {}]   ;;  %s3313_s3 = inlined_call_operand.vmem [shape: f32[12,48,12], index: 3, kind: input, shape index: {}]   ;;  %s3314_s4 = inlined_call_operand.vmem [shape: f32[12,1,12], index: 4, kind: input, shape index: {}]   ;;  %s3315_s5 = inlined_call_operand.vmem [shape: f32[4,12,48], index: 5, kind: input, shape index: {}]   ;;  %s3316_s6 = inlined_call_operand.vmem [shape: f32[1,48], index: 6, kind: input, shape index: {}]   ;;  %s3317_s7 = inlined_call_operand.vmem [shape: f32[1,48], index: 7, kind: input, shape index: {}]   ;;  %s3318_s8 = inlined_call_operand.vmem [shape: f32[1,48], index: 8, kind: input, shape index: {}]   ;;  %s3319_s9 = inlined_call_operand.vmem [shape: f32[48,128], index: 9, kind: input, shape index: {}]   ;;  %s3320_s10 = inlined_call_operand.vmem [shape: f32[1,128], index: 10, kind: input, shape index: {}]   ;;  %s3321_s11 = inlined_call_operand.vmem [shape: f32[128,48], index: 11, kind: input, shape index: {}]   ;;  %s3322_s12 = inlined_call_operand.vmem [shape: f32[1,48], index: 12, kind: input, shape index: {}]   ;;  %s3323_s13 = inlined_call_operand.vmem [shape: f32[2,8,48], index: 13, kind: output, shape index: {}]  }
   0x1 LB: > { %s2171_s26 = sadd.s32 4294967295, %s2653_s25   ;;  %p2175_p0 = scmp.ge.s32.totalorder %s2653_s25, 1  ;;  %s2653_s25 = sphi %s2727_s25, %s23_s25  }
   0x2   : > { %p386_p1 = scmp.lt.s32.totalorder %s2653_s25, 3 }
   0x4   : > { %p387_p2 = pnand %p2175_p0, %p386_p1 }
   0x5   : > { %p428_p3 = scmp.lt.s32.totalorder (!%p387_p2), %s2171_s26, 1 }
   0x6   : > { %390 = sbr.rel (%p387_p2) target bundleno = 5114 (0x13fa), region = 72 }
   0xb   : > { %s3325_s26 = smov (!%p428_p3, %s2171_s26), 1  ;;  %vm440_vm0 = vcmask 392192   ;;  %v473_v7 = vld [vmem:[%s3313_s3 + $0x20] sm:$0xff]  ;;  %v474_v8 = vld [vmem:[%s3313_s3 + $0x28] sm:$0xff]  ;;  %v2655_v10 = vmov 0.0   ;;  %v471_v11 = vld [vmem:[%s3313_s3 + $0x10] sm:$0xff] }
   0xc   : > { %s2176_s27 = sshll.u32 %s3325_s26, 3  ;;  %v478_v9 = vpack.c.bf16 %v474_v8, %v473_v7  ;;  %2392 = vmatprep.subr.bf16.mxu0 %v2655_v10  ;;  %2422 = vmatprep.subr.bf16.mxu1 %v2655_v10  ;;  %v472_v12 = vld [vmem:[%s3313_s3 + $0x18] sm:$0xff]  ;;  %v469_v14 = vld [vmem:[%s3313_s3] sm:$0xff]  ;;  %v470_v15 = vld [vmem:[%s3313_s3 + $0x8] sm:$0xff]  ;;  %vm2656_vm1 = vmmov 0   ;;  %vm745_vm2 = vcmask 1043456  }
   0xd   : > { %s2743_s30 = scalar_lea.vmem %s3310_s0, %s2176_s27  ;;  %v477_v13 = vpack.c.bf16 %v472_v12, %v471_v11  ;;  %v476_v16 = vpack.c.bf16 %v470_v15, %v469_v14  ;;  %2398 = vmatprep.mubr.msk.bf16.mxu0 %vm2656_vm1, %v2655_v10  ;;  %2424 = vmatprep.mubr.msk.bf16.mxu1 %vm2656_vm1, %v2655_v10  ;;  %v2178_v21 = vld [vmem:[%s3311_s1] ss:$0 sm:$0xff]  ;;  %v2187_v26 = vld [vmem:[%s3313_s3 + $0xe8] sm:$0xff]  ;;  %v2184_v30 = vld [vmem:[%s3313_s3 + $0xd0] sm:$0xff]  ;;  %vm683_vm3 = vcmask 1045504   ;;  %vm679_vm4 = vcmask 97280   ;;  %s435_s20 = scalar_lea.vmem %s3323_s13, %s2176_s27 }
   0xe   : > { %v437_v0 = vld [vmem:[%s2743_s30] sm:$0xff]  ;;  %2393 = vmatpush3.bf16.msra.mxu0 %v478_v9  ;;  %v2185_v31 = vld [vmem:[%s3313_s3 + $0xd8] sm:$0xff]  ;;  %v2183_v34 = vld [vmem:[%s3313_s3 + $0xc8] sm:$0xff]  ;;  %vm728_vm5 = vcmask 64512  }
   0xf   : > { %v441_v1 = vsel %vm440_vm0, %v437_v0, 0.0  ;;  %2394 = vmatprep.subr.bf16.mxu0 %v2655_v10  ;;  %v2179_v23 = vld [vmem:[%s3312_s2] ss:$0 sm:$0xff]  ;;  %v537_v32 = vpack.c.bf16 %v2185_v31, %v2184_v30  ;;  %v2196_v37 = vld [vmem:[%s3313_s3 + $0x1a8] sm:$0xff]  ;;  %v2193_v39 = vld [vmem:[%s3313_s3 + $0x190] sm:$0xff] }
  0x10   : > { %442 = vadd.xlane.f32.xlu0 %v441_v1  ;;  %v2186_v25 = vld [vmem:[%s3313_s3 + $0xe0] sm:$0xff]  ;;  %v2194_v40 = vld [vmem:[%s3313_s3 + $0x198] sm:$0xff]  ;;  %v2192_v43 = vld [vmem:[%s3313_s3 + $0x188] sm:$0xff] }
  0x11   : > { %v538_v28 = vpack.c.bf16 %v2187_v26, %v2186_v25  ;;  %v2182_v33 = vld [vmem:[%s3313_s3 + $0xc0] sm:$0xff]  ;;  %v595_v41 = vpack.c.bf16 %v2194_v40, %v2193_v39  ;;  %v2206_v45 = vld [vmem:[%s3313_s3 + $0x50] sm:$0xff]  ;;  %v2207_v46 = vld [vmem:[%s3313_s3 + $0x58] sm:$0xff] }
  0x12   : > { %2395 = vmatpush3.bf16.msra.mxu0 %v477_v13  ;;  %v536_v35 = vpack.c.bf16 %v2183_v34, %v2182_v33  ;;  %v2195_v36 = vld [vmem:[%s3313_s3 + $0x1a0] sm:$0xff]  ;;  %v802_v47 = vpack.c.bf16 %v2207_v46, %v2206_v45  ;;  %v2205_v49 = vld [vmem:[%s3313_s3 + $0x48] sm:$0xff]  ;;  %v2202_v51 = vld [vmem:[%s3313_s3 + $0x30] sm:$0xff] }
  0x13   : > { %2396 = vmatprep.subr.bf16.mxu0 %v2655_v10  ;;  %v596_v38 = vpack.c.bf16 %v2196_v37, %v2195_v36  ;;  %v2191_v42 = vld [vmem:[%s3313_s3 + $0x180] sm:$0xff]  ;;  %v2203_v52 = vld [vmem:[%s3313_s3 + $0x38] sm:$0xff]  ;;  %v2224_v54 = vld [vmem:[%s3313_s3 + $0x1d0] sm:$0xff] }
  0x14   : > { %v594_v44 = vpack.c.bf16 %v2192_v43, %v2191_v42  ;;  %v2204_v48 = vld [vmem:[%s3313_s3 + $0x40] sm:$0xff]  ;;  %v800_v53 = vpack.c.bf16 %v2203_v52, %v2202_v51  ;;  %v2225_v55 = vld [vmem:[%s3313_s3 + $0x1d8] sm:$0xff]  ;;  %v2223_v58 = vld [vmem:[%s3313_s3 + $0x1c8] sm:$0xff] }
  0x15   : > { %v801_v50 = vpack.c.bf16 %v2205_v49, %v2204_v48  ;;  %v918_v56 = vpack.c.bf16 %v2225_v55, %v2224_v54  ;;  %v2222_v57 = vld [vmem:[%s3313_s3 + $0x1c0] sm:$0xff]  ;;  %v2220_v60 = vld [vmem:[%s3313_s3 + $0x1b0] sm:$0xff]  ;;  %v2221_v61 = vld [vmem:[%s3313_s3 + $0x1b8] sm:$0xff] }
  0x16   : > { %2397 = vmatpush3.bf16.msra.mxu0 %v476_v16  ;;  %v917_v59 = vpack.c.bf16 %v2223_v58, %v2222_v57  ;;  %v916_v62 = vpack.c.bf16 %v2221_v61, %v2220_v60  ;;  %v2198_v26 = vld [vmem:[%s3314_s4 + $0x8] ss:$0 sm:$0xff]  ;;  %v2216_v51 = vld [vmem:[%s3313_s3 + $0x118] sm:$0xff] }
  0x17   : > { %2402 = vmatprep.subr.bf16.mxu0 %v2655_v10  ;;  %v2214_v57 = vld [vmem:[%s3313_s3 + $0x108] sm:$0xff]  ;;  %v2212_v60 = vld [vmem:[%s3313_s3 + $0xf8] sm:$0xff] }
  0x99   : > { %v443_v2 = vpop.xlane.xlu0 %442 }
  0x9a   : > { %v445_v3 = vmul.f32 0.020833334, %v443_v2 }
  0x9c   : > { %v446_v4 = vsub.f32 %v437_v0, %v445_v3  ;;  %v2189_v3 = vld [vmem:[%s3314_s4 + $0x4] ss:$0 sm:$0xff] }
  0x9e   : > { %v447_v5 = vmul.f32 %v446_v4, %v446_v4 }
  0xa0   : > { %v448_v6 = vsel %vm440_vm0, %v447_v5, 0.0 }
  0xa1   : > { %449 = vadd.xlane.f32.xlu0 %v448_v6 }
 0x12a   : > { %v450_v17 = vpop.xlane.xlu0 %449 }
 0x12b   : > { %v451_v18 = vmul.f32 0.020833334, %v450_v17 }
 0x12d   : > { %v452_v19 = vadd.f32 1e-05, %v451_v18  ;;  %v2227_v18 = vld [vmem:[%s3314_s4 + $0x9] ss:$0 sm:$0xff] }
 0x12f   : > { %2624 = vrsqrt.f32 %v452_v19 }
 0x13c   : > { %v2625_v20 = vpop.eup %2624 }
 0x13d   : > { %v454_v22 = vmul.f32 %v2625_v20, %v446_v4 }
 0x13f   : > { %v461_v24 = vmul.f32 %v2178_v21, %v454_v22 }
 0x141   : > { %v468_v27 = vadd.f32 %v2179_v23, %v461_v24 }
 0x143   : > { %v2787_v29 = vpack.c.bf16 %v468_v27, %v468_v27 }
 0x145   : > { %2399 = vmatmul.mubr.msk.bf16.vlgmr.msra.gmra.mxu0 %vm440_vm0, %v2787_v29 }
 0x146   : > { %2403 = vmatpush3.bf16.msra.mxu0 %v538_v28  ;;  %2408 = vmatprep.mubr.msk.bf16.mxu0 %vm2656_vm1, %v2655_v10  ;;  %v2180_v28 = vld [vmem:[%s3314_s4] ss:$0 sm:$0xff] }
 0x147   : > { %2404 = vmatprep.subr.bf16.mxu0 %v2655_v10 }
 0x14a   : > { %2405 = vmatpush3.bf16.msra.mxu0 %v537_v32 }
 0x14b   : > { %2406 = vmatprep.subr.bf16.mxu0 %v2655_v10 }
 0x14e   : > { %2407 = vmatpush3.bf16.msra.mxu0 %v536_v35 }
 0x14f   : > { %2412 = vmatprep.subr.bf16.mxu0 %v2655_v10 }
 0x151   : > { %2409 = vmatmul.mubr.msk.bf16.vlgmr.msra.gmra.mxu0 %vm440_vm0, %v2787_v29 }
 0x152   : > { %2413 = vmatpush3.bf16.msra.mxu0 %v596_v38  ;;  %2418 = vmatprep.mubr.msk.bf16.mxu0 %vm2656_vm1, %v2655_v10 }
 0x153   : > { %2414 = vmatprep.subr.bf16.mxu0 %v2655_v10 }
 0x156   : > { %2415 = vmatpush3.bf16.msra.mxu0 %v595_v41 }
 0x157   : > { %2416 = vmatprep.subr.bf16.mxu0 %v2655_v10 }
 0x15a   : > { %2417 = vmatpush3.bf16.msra.mxu0 %v594_v44 }
 0x15b   : > { %2434 = vmatprep.subr.bf16.mxu0 %v2655_v10 }
 0x15d   : > { %2419 = vmatmul.mubr.msk.bf16.vlgmr.msra.gmra.mxu0 %vm440_vm0, %v2787_v29 }
 0x15e   : > { %2435 = vmatpush3.bf16.msra.mxu0 %v802_v47  ;;  %2440 = vmatprep.mubr.msk.bf16.mxu0 %vm2656_vm1, %v2655_v10 }
 0x15f   : > { %2436 = vmatprep.subr.bf16.mxu0 %v2655_v10 }
 0x162   : > { %2437 = vmatpush3.bf16.msra.mxu0 %v801_v50  ;;  %v2215_v50 = vld [vmem:[%s3313_s3 + $0x110] sm:$0xff] }
 0x163   : > { %2438 = vmatprep.subr.bf16.mxu0 %v2655_v10  ;;  %v860_v54 = vpack.c.bf16 %v2216_v51, %v2215_v50  ;;  %v2239_v50 = vld [vmem:[%s3313_s3 + $0x80] sm:$0xff]  ;;  %v2240_v51 = vld [vmem:[%s3313_s3 + $0x88] sm:$0xff] }
 0x166   : > { %2439 = vmatpush3.bf16.msra.mxu0 %v800_v53 }
 0x167   : > { %2454 = vmatprep.subr.bf16.mxu0 %v2655_v10 }
 0x169   : > { %2441 = vmatmul.mubr.msk.bf16.vlgmr.msra.gmra.mxu0 %vm440_vm0, %v2787_v29 }
 0x16a   : > { %2455 = vmatpush3.bf16.msra.mxu0 %v918_v56  ;;  %2460 = vmatprep.mubr.msk.bf16.mxu0 %vm2656_vm1, %v2655_v10  ;;  %v2213_v56 = vld [vmem:[%s3313_s3 + $0x100] sm:$0xff] }
 0x16b   : > { %2456 = vmatprep.subr.bf16.mxu0 %v2655_v10  ;;  %v859_v58 = vpack.c.bf16 %v2214_v57, %v2213_v56  ;;  %v2238_v56 = vld [vmem:[%s3313_s3 + $0x78] sm:$0xff] }
 0x16e   : > { %2457 = vmatpush3.bf16.msra.mxu0 %v917_v59  ;;  %v2211_v59 = vld [vmem:[%s3313_s3 + $0xf0] sm:$0xff] }
 0x16f   : > { %2458 = vmatprep.subr.bf16.mxu0 %v2655_v10  ;;  %v858_v61 = vpack.c.bf16 %v2212_v60, %v2211_v59  ;;  %v2235_v60 = vld [vmem:[%s3313_s3 + $0x60] sm:$0xff] }
 0x172   : > { %2459 = vmatpush3.bf16.msra.mxu0 %v916_v62 }
 0x173   : > { %2470 = vmatprep.subr.bf16.mxu0 %v2655_v10 }
 0x175   : > { %2461 = vmatmul.mubr.msk.bf16.vlgmr.msra.gmra.mxu0 %vm440_vm0, %v2787_v29 }
 0x176   : > { %2472 = vmatprep.mubr.msk.bf16.mxu0 %vm2656_vm1, %v2655_v10 }
 0x205   : > { %v523_v63 = vpop.f32.mrf.mxu0 }
 0x206   : > { %v524_v32 = vadd.f32 %v2180_v28, %v523_v63  ;;  %v2232_v28 = vld [vmem:[%s3315_s5 + $0x18] sm:$0xf] }
 0x207   : > { %v2400_v0 = vpop.f32.mrf.mxu0 }
 0x208   : > { %v677_v36 = vpack.c.bf16 %v524_v32, %v524_v32 }
 0x209   : > { %v526_v1 = vpop.f32.mrf.mxu0 }
 0x20b   : > { %v2401_v2 = vpop.f32.mrf.mxu0 }
 0x20c   : > { %v2218_v2 = vld [vmem:[%s3314_s4 + $0x5] ss:$0 sm:$0xff] }
 0x211   : > { %v581_v4 = vpop.f32.mrf.mxu0 }
 0x212   : > { %v582_v5 = vadd.f32 %v2189_v3, %v581_v4 }
 0x213   : > { %v2410_v6 = vpop.f32.mrf.mxu0 }
 0x214   : > { %645 = vxpose.xlu1.b32.start.end [1/1] (short) (narrow) %v582_v5, 16 }
 0x215   : > { %v584_v7 = vpop.f32.mrf.mxu0 }
 0x217   : > { %v2411_v8 = vpop.f32.mrf.mxu0 }
 0x21d   : > { %v639_v9 = vpop.f32.mrf.mxu0 }
 0x21e   : > { %v640_v30 = vadd.f32 %v2198_v26, %v639_v9  ;;  %v2209_v9 = vld [vmem:[%s3314_s4 + $0x1] ss:$0 sm:$0xff] }
 0x21f   : > { %v2420_v11 = vpop.f32.mrf.mxu0 }
 0x220   : > { %v741_v34 = vpack.c.bf16 %v640_v30, %v640_v30 }
 0x221   : > { %v642_v12 = vpop.f32.mrf.mxu0 }
 0x222   : > { %v747_v37 = vsel %vm745_vm2, %v741_v34, 0  ;;  %v790_v34 = vld [vmem:[%s3315_s5 + $0x8] sm:$0xf] }
 0x223   : > { %v2421_v13 = vpop.f32.mrf.mxu0 }
 0x229   : > { %v2890_v14 = vpop.f32.mrf.mxu0 }
 0x22a   : > { %v846_v12 = vadd.f32 %v2209_v9, %v2890_v14 }
 0x22b   : > { %v2442_v15 = vpop.f32.mrf.mxu0 }
 0x22d   : > { %v848_v16 = vpop.f32.mrf.mxu0 }
 0x22e   : > { %v999_v16 = vpack.c.bf16 %v846_v12, %v846_v12  ;;  %v2254_v12 = vld [vmem:[%s3313_s3 + $0x1e8] sm:$0xff] }
 0x22f   : > { %v2443_v17 = vpop.f32.mrf.mxu0 }
 0x235   : > { %v961_v19 = vpop.f32.mrf.mxu0 }
 0x236   : > { %v962_v20 = vadd.f32 %v2227_v18, %v961_v19 }
 0x237   : > { %v2462_v21 = vpop.f32.mrf.mxu0 }
 0x238   : > { %v1060_v22 = vpack.c.bf16 %v962_v20, %v962_v20 }
 0x239   : > { %v964_v23 = vpop.f32.mrf.mxu0 }
 0x23a   : > { %v1065_v24 = vsel %vm745_vm2, %v1060_v22, 0 }
 0x23b   : > { %v2463_v25 = vpop.f32.mrf.mxu0  ;;  %2471 = vmatpush3.bf16.msra.mxu0 %v1065_v24 }
 0x23c   : > { %2482 = vmatprep.subr.bf16.mxu0 %v2655_v10 }
 0x290   : > { %v661_v27 = vpop.trf.xlu1 }
 0x294   : > { %v662_v31 = vpop.trf.xlu1 }
 0x295   : > { %v678_v33 = vpack.c.bf16 %v662_v31, %v661_v27  ;;  %v2231_v27 = vld [vmem:[%s3315_s5 + $0x10] sm:$0xff] }
 0x296   : > { %v1111_v30 = vpack.c.bf16 %v2232_v28, %v2231_v27  ;;  %v2242_v28 = vld [vmem:[%s3314_s4 + $0x2] ss:$0 sm:$0xff] }
 0x297   : > { %v685_v35 = vsel %vm683_vm3, %v678_v33, 0  ;;  %v789_v33 = vld [vmem:[%s3315_s5] sm:$0xff] }
 0x298   : > { %2423 = vmatpush3.bf16.msra.mxu1 %v685_v35  ;;  %v1116_v31 = vsel %vm683_vm3, %v1111_v30, 0  ;;  %v792_v35 = vpack.c.bf16 %v790_v34, %v789_v33 }
 0x299   : > { %2428 = vmatprep.subr.bf16.mxu1 %v2655_v10 }
 0x29b   : > { %2425 = vmatmul.mubr.msk.bf16.vlgmr.msra.gmra.mxu1 %vm679_vm4, %v677_v36 }
 0x29c   : > { %2429 = vmatpush3.bf16.msra.mxu1 %v747_v37  ;;  %2430 = vmatprep.mubr.msk.bf16.mxu1 %vm2656_vm1, %v2655_v10 }
 0x29d   : > { %2444 = vmatprep.subr.bf16.mxu1 %v2655_v10 }
 0x35b   : > { %v721_v38 = vpop.f32.mrf.mxu1 }
 0x35c   : > { %v727_v39 = vmul.f32 0.28867513, %v721_v38 }
 0x35d   : > { %v2426_v40 = vpop.f32.mrf.mxu1 }
 0x35e   : > { %v729_v41 = vsel %vm728_vm5, %v727_v39, -inf  ;;  %v2248_v40 = vld [vmem:[%s3313_s3 + $0x140] sm:$0xff] }
 0x35f   : > { %730 = vmax.xlane.f32.xlu1 %v729_v41  ;;  %v724_v42 = vpop.f32.mrf.mxu1  ;;  %v2249_v41 = vld [vmem:[%s3313_s3 + $0x148] sm:$0xff] }
 0x360   : > { %v1271_v42 = vpack.c.bf16 %v2249_v41, %v2248_v40 }
 0x361   : > { %v2427_v43 = vpop.f32.mrf.mxu1 }
 0x3e8   : > { %v731_v44 = vpop.xlane.xlu1 %730 }
 0x3e9   : > { %v732_v45 = vsub.f32 %v727_v39, %v731_v44  ;;  %v1162_v39 = vsel %vm683_vm3, %v792_v35, 0  ;;  %v2246_v44 = vld [vmem:[%s3313_s3 + $0x130] sm:$0xff] }
 0x3eb   : > { %v733_v46 = vmul.f32 1.442695, %v732_v45  ;;  %v2247_v45 = vld [vmem:[%s3313_s3 + $0x138] sm:$0xff] }
 0x3ed   : > { %2626 = vpow2.f32 %v733_v46  ;;  %v1270_v46 = vpack.c.bf16 %v2247_v45, %v2246_v44 }
 0x3fa   : > { %v2627_v47 = vpop.eup %2626 }
 0x3fb   : > { %v735_v48 = vsel %vm728_vm5, %v2627_v47, 0.0 }
 0x3fc   : > { %736 = vadd.xlane.f32.xlu0 %v735_v48  ;;  %v2245_v48 = vld [vmem:[%s3313_s3 + $0x128] sm:$0xff] }
 0x485   : > { %v737_v49 = vpop.xlane.xlu0 %736 }
 0x486   : > { %2628 = vrcp.f32 %v737_v49 }
 0x493   : > { %v2629_v52 = vpop.eup %2628 }
 0x494   : > { %v739_v53 = vmul.f32 %v2629_v52, %v2627_v47  ;;  %v2244_v47 = vld [vmem:[%s3313_s3 + $0x120] sm:$0xff] }
 0x495   : > { %v1269_v49 = vpack.c.bf16 %v2245_v48, %v2244_v47 }
 0x496   : > { %v740_v55 = vpack.c.bf16 %v739_v53, %v739_v53  ;;  %v1213_v53 = vpack.c.bf16 %v2240_v51, %v2239_v50 }
 0x498   : > { %2431 = vmatmul.mubr.msk.bf16.vlgmr.msra.gmra.mxu1 %vm728_vm5, %v740_v55  ;;  %v2237_v55 = vld [vmem:[%s3313_s3 + $0x70] sm:$0xff] }
 0x499   : > { %2445 = vmatpush3.bf16.msra.mxu1 %v860_v54  ;;  %2450 = vmatprep.mubr.msk.bf16.mxu1 %vm2656_vm1, %v2655_v10  ;;  %v1212_v59 = vpack.c.bf16 %v2238_v56, %v2237_v55  ;;  %v2264_v55 = vld [vmem:[%s3315_s5 + $0x20] sm:$0xff]  ;;  %v2265_v56 = vld [vmem:[%s3315_s5 + $0x28] sm:$0xf] }
 0x49a   : > { %2446 = vmatprep.subr.bf16.mxu1 %v2655_v10 }
 0x49d   : > { %2447 = vmatpush3.bf16.msra.mxu1 %v859_v58 }
 0x49e   : > { %2448 = vmatprep.subr.bf16.mxu1 %v2655_v10 }
 0x4a1   : > { %2449 = vmatpush3.bf16.msra.mxu1 %v858_v61  ;;  %v2236_v61 = vld [vmem:[%s3313_s3 + $0x68] sm:$0xff] }
 0x4a2   : > { %2464 = vmatprep.subr.bf16.mxu1 %v2655_v10 }
 0x4a4   : > { %2451 = vmatmul.mubr.msk.bf16.vlgmr.msra.gmra.mxu1 %vm440_vm0, %v2787_v29 }
 0x4a5   : > { %2466 = vmatprep.mubr.msk.bf16.mxu1 %vm2656_vm1, %v2655_v10 }
 0x558   : > { %v783_v62 = vpop.f32.mrf.mxu1 }
 0x559   : > { %v791_v43 = vpack.c.bf16 %v783_v62, %v783_v62 }
 0x55a   : > { %v2432_v63 = vpop.f32.mrf.mxu1 }
 0x55c   : > { %v786_v0 = vpop.f32.mrf.mxu1 }
 0x55d   : > { %v1211_v0 = vpack.c.bf16 %v2236_v61, %v2235_v60  ;;  %v2271_v60 = vld [vmem:[%s3313_s3 + $0xb0] sm:$0xff]  ;;  %v2272_v61 = vld [vmem:[%s3313_s3 + $0xb8] sm:$0xff] }
 0x55e   : > { %v2433_v1 = vpop.f32.mrf.mxu1 }
 0x55f   : > { %v2257_v1 = vld [vmem:[%s3313_s3 + $0x200] sm:$0xff] }
 0x564   : > { %v903_v3 = vpop.f32.mrf.mxu1 }
 0x565   : > { %v904_v4 = vadd.f32 %v2218_v2, %v903_v3  ;;  %v2258_v2 = vld [vmem:[%s3313_s3 + $0x208] sm:$0xff] }
 0x566   : > { %v2452_v5 = vpop.f32.mrf.mxu1 }
 0x567   : > { %967 = vxpose.xlu0.b32.start.end [1/1] (short) (narrow) %v904_v4, 16  ;;  %v1329_v5 = vpack.c.bf16 %v2258_v2, %v2257_v1  ;;  %v1579_v1 = vpack.c.bf16 %v2272_v61, %v2271_v60 }
 0x568   : > { %v906_v6 = vpop.f32.mrf.mxu1 }
 0x569   : > { %v2255_v6 = vld [vmem:[%s3313_s3 + $0x1f0] sm:$0xff] }
 0x56a   : > { %v2453_v7 = vpop.f32.mrf.mxu1 }
 0x56b   : > { %v2256_v7 = vld [vmem:[%s3313_s3 + $0x1f8] sm:$0xff] }
 0x56c   : > { %v1328_v9 = vpack.c.bf16 %v2256_v7, %v2255_v6  ;;  %v2267_v6 = vld [vmem:[%s3313_s3 + $0x90] sm:$0xff]  ;;  %v2268_v7 = vld [vmem:[%s3313_s3 + $0x98] sm:$0xff] }
 0x5e3   : > { %v983_v8 = vpop.trf.xlu0 }
 0x5e7   : > { %v984_v11 = vpop.trf.xlu0 }
 0x5e8   : > { %v1000_v13 = vpack.c.bf16 %v984_v11, %v983_v8  ;;  %v2253_v11 = vld [vmem:[%s3313_s3 + $0x1e0] sm:$0xff] }
 0x5ea   : > { %v1005_v15 = vsel %vm683_vm3, %v1000_v13, 0  ;;  %v2251_v13 = vld [vmem:[%s3314_s4 + $0x6] ss:$0 sm:$0xff] }
 0x5eb   : > { %2465 = vmatpush3.bf16.msra.mxu1 %v1005_v15 }
 0x5ec   : > { %2476 = vmatprep.subr.bf16.mxu1 %v2655_v10 }
 0x5ee   : > { %2467 = vmatmul.mubr.msk.bf16.vlgmr.msra.gmra.mxu1 %vm679_vm4, %v999_v16  ;;  %v1327_v16 = vpack.c.bf16 %v2254_v12, %v2253_v11  ;;  %v2290_v11 = vld [vmem:[%s3313_s3 + $0x238] sm:$0xff] }
 0x5ef   : > { %2478 = vmatprep.mubr.msk.bf16.mxu1 %vm2656_vm1, %v2655_v10  ;;  %2477 = vmatpush3.bf16.msra.mxu1 %v1116_v31 }
 0x5f0   : > { %2488 = vmatprep.subr.bf16.mxu1 %v2655_v10 }
 0x6ae   : > { %v1041_v17 = vpop.f32.mrf.mxu1 }
 0x6af   : > { %v1047_v18 = vmul.f32 0.28867513, %v1041_v17 }
 0x6b0   : > { %v2468_v19 = vpop.f32.mrf.mxu1 }
 0x6b1   : > { %v1048_v20 = vsel %vm728_vm5, %v1047_v18, -inf }
 0x6b2   : > { %1049 = vmax.xlane.f32.xlu1 %v1048_v20  ;;  %v1044_v21 = vpop.f32.mrf.mxu1 }
 0x6b4   : > { %v2469_v14 = vpop.f32.mrf.mxu1 }
 0x73b   : > { %v1050_v22 = vpop.xlane.xlu1 %1049 }
 0x73c   : > { %v1051_v23 = vsub.f32 %v1047_v18, %v1050_v22 }
 0x73e   : > { %v1052_v24 = vmul.f32 1.442695, %v1051_v23 }
 0x740   : > { %2630 = vpow2.f32 %v1052_v24 }
 0x74d   : > { %v2631_v25 = vpop.eup %2630 }
 0x74e   : > { %v1054_v26 = vsel %vm728_vm5, %v2631_v25, 0.0 }
 0x74f   : > { %1055 = vadd.xlane.f32.xlu1 %v1054_v26 }
 0x7d8   : > { %v1056_v32 = vpop.xlane.xlu1 %1055 }
 0x7d9   : > { %2632 = vrcp.f32 %v1056_v32 }
 0x7e6   : > { %v2633_v36 = vpop.eup %2632 }
 0x7e7   : > { %v1058_v37 = vmul.f32 %v2633_v36, %v2631_v25  ;;  %v2260_v36 = vld [vmem:[%s3314_s4 + $0xa] ss:$0 sm:$0xff] }
 0x7e9   : > { %v1059_v38 = vpack.c.bf16 %v1058_v37, %v1058_v37 }
 0x7eb   : > { %2473 = vmatmul.mubr.msk.bf16.vlgmr.msra.gmra.mxu0 %vm728_vm5, %v1059_v38 }
 0x7ec   : > { %2483 = vmatpush3.bf16.msra.mxu0 %v1162_v39  ;;  %2484 = vmatprep.mubr.msk.bf16.mxu0 %vm2656_vm1, %v2655_v10 }
 0x7ed   : > { %2498 = vmatprep.subr.bf16.mxu0 %v2655_v10 }
 0x7f3   : > { %2485 = vmatmul.mubr.msk.bf16.vlgmr.msra.gmra.mxu0 %vm679_vm4, %v791_v43 }
 0x7f4   : > { %2499 = vmatpush3.bf16.msra.mxu0 %v1271_v42  ;;  %2504 = vmatprep.mubr.msk.bf16.mxu0 %vm2656_vm1, %v2655_v10 }
 0x7f5   : > { %2500 = vmatprep.subr.bf16.mxu0 %v2655_v10 }
 0x7f8   : > { %2501 = vmatpush3.bf16.msra.mxu0 %v1270_v46 }
 0x7f9   : > { %2502 = vmatprep.subr.bf16.mxu0 %v2655_v10 }
 0x7fc   : > { %2503 = vmatpush3.bf16.msra.mxu0 %v1269_v49 }
 0x7fd   : > { %2518 = vmatprep.subr.bf16.mxu0 %v2655_v10 }
 0x7ff   : > { %2505 = vmatmul.mubr.msk.bf16.vlgmr.msra.gmra.mxu0 %vm440_vm0, %v2787_v29 }
 0x800   : > { %2520 = vmatprep.mubr.msk.bf16.mxu0 %vm2656_vm1, %v2655_v10 }
 0x8ab   : > { %v1101_v52 = vpop.f32.mrf.mxu0 }
 0x8ac   : > { %v1110_v54 = vpack.c.bf16 %v1101_v52, %v1101_v52 }
 0x8ad   : > { %v2474_v57 = vpop.f32.mrf.mxu0 }
 0x8ae   : > { %2479 = vmatmul.mubr.msk.bf16.vlgmr.msra.gmra.mxu1 %vm679_vm4, %v1110_v54  ;;  %v1522_v57 = vpack.c.bf16 %v2265_v56, %v2264_v55 }
 0x8af   : > { %2489 = vmatpush3.bf16.msra.mxu1 %v1213_v53  ;;  %v1104_v58 = vpop.f32.mrf.mxu0  ;;  %2494 = vmatprep.mubr.msk.bf16.mxu1 %vm2656_vm1, %v2655_v10 }
 0x8b0   : > { %2490 = vmatprep.subr.bf16.mxu1 %v2655_v10  ;;  %v1527_v58 = vsel %vm683_vm3, %v1522_v57, 0 }
 0x8b1   : > { %v2475_v62 = vpop.f32.mrf.mxu0 }
 0x8b3   : > { %2491 = vmatpush3.bf16.msra.mxu1 %v1212_v59  ;;  %v3023_v63 = vpop.f32.mrf.mxu0 }
 0x8b4   : > { %2492 = vmatprep.subr.bf16.mxu1 %v2655_v10 }
 0x8b5   : > { %v2486_v3 = vpop.f32.mrf.mxu0 }
 0x8b6   : > { %v2269_v3 = vld [vmem:[%s3313_s3 + $0xa0] sm:$0xff] }
 0x8b7   : > { %2493 = vmatpush3.bf16.msra.mxu1 %v1211_v0  ;;  %v1201_v4 = vpop.f32.mrf.mxu0 }
 0x8b8   : > { %2508 = vmatprep.subr.bf16.mxu1 %v2655_v10  ;;  %v2270_v4 = vld [vmem:[%s3313_s3 + $0xa8] sm:$0xff] }
 0x8b9   : > { %v2487_v8 = vpop.f32.mrf.mxu0 }
 0x8ba   : > { %2495 = vmatmul.mubr.msk.bf16.vlgmr.msra.gmra.mxu1 %vm440_vm0, %v2787_v29  ;;  %v1577_v8 = vpack.c.bf16 %v2268_v7, %v2267_v6 }
 0x8bb   : > { %2509 = vmatpush3.bf16.msra.mxu1 %v1329_v5  ;;  %2514 = vmatprep.mubr.msk.bf16.mxu1 %vm2656_vm1, %v2655_v10  ;;  %v1578_v5 = vpack.c.bf16 %v2270_v4, %v2269_v3 }
 0x8bc   : > { %2510 = vmatprep.subr.bf16.mxu1 %v2655_v10 }
 0x8bf   : > { %v1314_v15 = vpop.f32.mrf.mxu0  ;;  %2511 = vmatpush3.bf16.msra.mxu1 %v1328_v9  ;;  %v2289_v9 = vld [vmem:[%s3313_s3 + $0x230] sm:$0xff] }
 0x8c0   : > { %v1315_v17 = vadd.f32 %v2251_v13, %v1314_v15  ;;  %2512 = vmatprep.subr.bf16.mxu1 %v2655_v10  ;;  %v1695_v12 = vpack.c.bf16 %v2290_v11, %v2289_v9  ;;  %v2287_v13 = vld [vmem:[%s3313_s3 + $0x220] sm:$0xff]  ;;  %v2288_v15 = vld [vmem:[%s3313_s3 + $0x228] sm:$0xff] }
 0x8c1   : > { %v2506_v18 = vpop.f32.mrf.mxu0 }
 0x8c2   : > { %1378 = vxpose.xlu1.b32.start.end [1/1] (short) (narrow) %v1315_v17, 16  ;;  %v2285_v17 = vld [vmem:[%s3313_s3 + $0x210] sm:$0xff]  ;;  %v2286_v18 = vld [vmem:[%s3313_s3 + $0x218] sm:$0xff] }
 0x8c3   : > { %v1317_v19 = vpop.f32.mrf.mxu0  ;;  %2513 = vmatpush3.bf16.msra.mxu1 %v1327_v16  ;;  %v1694_v16 = vpack.c.bf16 %v2288_v15, %v2287_v13 }
 0x8c4   : > { %2524 = vmatprep.subr.bf16.mxu1 %v2655_v10  ;;  %v1693_v19 = vpack.c.bf16 %v2286_v18, %v2285_v17  ;;  %v2296_v17 = vld [vmem:[%s3315_s5 + $0x30] sm:$0xff]  ;;  %v2297_v18 = vld [vmem:[%s3315_s5 + $0x38] sm:$0xf] }
 0x8c5   : > { %v2507_v20 = vpop.f32.mrf.mxu0 }
 0x8c6   : > { %2515 = vmatmul.mubr.msk.bf16.vlgmr.msra.gmra.mxu1 %vm440_vm0, %v2787_v29  ;;  %v2280_v20 = vld [vmem:[%s3313_s3 + $0x170] sm:$0xff] }
 0x8c7   : > { %2526 = vmatprep.mubr.msk.bf16.mxu1 %vm2656_vm1, %v2655_v10 }
 0x93e   : > { %v1394_v21 = vpop.trf.xlu1 }
 0x942   : > { %v1395_v14 = vpop.trf.xlu1 }
 0x943   : > { %v1411_v22 = vpack.c.bf16 %v1395_v14, %v1394_v21  ;;  %v2281_v21 = vld [vmem:[%s3313_s3 + $0x178] sm:$0xff] }
 0x945   : > { %v1416_v23 = vsel %vm683_vm3, %v1411_v22, 0  ;;  %v1637_v22 = vpack.c.bf16 %v2281_v21, %v2280_v20 }
 0x946   : > { %2519 = vmatpush3.bf16.msra.mxu0 %v1416_v23 }
 0x947   : > { %2530 = vmatprep.subr.bf16.mxu0 %v2655_v10 }
 0x96e   : > { %v3061_v24 = vpop.f32.mrf.mxu1 }
 0x970   : > { %v2480_v25 = vpop.f32.mrf.mxu1 }
 0x971   : > { %v2278_v25 = vld [vmem:[%s3313_s3 + $0x160] sm:$0xff] }
 0x972   : > { %v1155_v26 = vpop.f32.mrf.mxu1 }
 0x973   : > { %v2279_v26 = vld [vmem:[%s3313_s3 + $0x168] sm:$0xff] }
 0x974   : > { %v2481_v27 = vpop.f32.mrf.mxu1 }
 0x97a   : > { %v1256_v30 = vpop.f32.mrf.mxu1 }
 0x97b   : > { %v1257_v31 = vadd.f32 %v2242_v28, %v1256_v30  ;;  %v1636_v30 = vpack.c.bf16 %v2279_v26, %v2278_v25 }
 0x97c   : > { %v2496_v32 = vpop.f32.mrf.mxu1 }
 0x97d   : > { %v1410_v33 = vpack.c.bf16 %v1257_v31, %v1257_v31  ;;  %v2276_v31 = vld [vmem:[%s3313_s3 + $0x150] sm:$0xff]  ;;  %v2277_v32 = vld [vmem:[%s3313_s3 + $0x158] sm:$0xff] }
 0x97e   : > { %v1259_v34 = vpop.f32.mrf.mxu1 }
 0x97f   : > { %2521 = vmatmul.mubr.msk.bf16.vlgmr.msra.gmra.mxu0 %vm679_vm4, %v1410_v33  ;;  %v1635_v34 = vpack.c.bf16 %v2277_v32, %v2276_v31  ;;  %v2646_v31 = vld [vmem:[%s2743_s30] sm:$0xff] }
 0x980   : > { %v2497_v35 = vpop.f32.mrf.mxu1  ;;  %2532 = vmatprep.mubr.msk.bf16.mxu0 %vm2656_vm1, %v2655_v10  ;;  %2531 = vmatpush3.bf16.msra.mxu0 %v1527_v58 }
 0x981   : > { %2546 = vmatprep.subr.bf16.mxu0 %v2655_v10 }
 0x986   : > { %v1372_v37 = vpop.f32.mrf.mxu1 }
 0x987   : > { %v1373_v38 = vadd.f32 %v2260_v36, %v1372_v37 }
 0x988   : > { %v2516_v39 = vpop.f32.mrf.mxu1 }
 0x989   : > { %v1471_v40 = vpack.c.bf16 %v1373_v38, %v1373_v38 }
 0x98a   : > { %v1375_v41 = vpop.f32.mrf.mxu1 }
 0x98b   : > { %v1476_v42 = vsel %vm745_vm2, %v1471_v40, 0 }
 0x98c   : > { %v2517_v43 = vpop.f32.mrf.mxu1  ;;  %2525 = vmatpush3.bf16.msra.mxu1 %v1476_v42 }
 0x98d   : > { %2536 = vmatprep.subr.bf16.mxu1 %v2655_v10  ;;  %v1199_v43 = vadd.f32 %v3023_v63, %v3061_v24  ;;  %v2292_v63 = vld [vmem:[%s3314_s4 + $0xb] ss:$0 sm:$0xff] }
 0xa3f   : > { %v1452_v44 = vpop.f32.mrf.mxu0 }
 0xa40   : > { %v1458_v45 = vmul.f32 0.28867513, %v1452_v44 }
 0xa41   : > { %v2522_v46 = vpop.f32.mrf.mxu0 }
 0xa42   : > { %v1459_v47 = vsel %vm728_vm5, %v1458_v45, -inf }
 0xa43   : > { %1460 = vmax.xlane.f32.xlu0 %v1459_v47  ;;  %v1455_v48 = vpop.f32.mrf.mxu0 }
 0xa45   : > { %v2523_v49 = vpop.f32.mrf.mxu0 }
 0xacc   : > { %v1461_v50 = vpop.xlane.xlu0 %1460 }
 0xacd   : > { %v1462_v51 = vsub.f32 %v1458_v45, %v1461_v50 }
 0xacf   : > { %v1463_v52 = vmul.f32 1.442695, %v1462_v51 }
 0xad1   : > { %2634 = vpow2.f32 %v1463_v52 }
 0xade   : > { %v2635_v53 = vpop.eup %2634 }
 0xadf   : > { %v1465_v54 = vsel %vm728_vm5, %v2635_v53, 0.0 }
 0xae0   : > { %1466 = vadd.xlane.f32.xlu0 %v1465_v54  ;;  %v2274_v54 = vld [vmem:[%s3314_s4 + $0x3] ss:$0 sm:$0xff] }
 0xb69   : > { %v1467_v59 = vpop.xlane.xlu0 %1466 }
 0xb6a   : > { %2636 = vrcp.f32 %v1467_v59 }
 0xb77   : > { %v2637_v62 = vpop.eup %2636 }
 0xb78   : > { %v1469_v0 = vmul.f32 %v2637_v62, %v2635_v53 }
 0xb7a   : > { %v1470_v2 = vpack.c.bf16 %v1469_v0, %v1469_v0 }
 0xb7c   : > { %2527 = vmatmul.mubr.msk.bf16.vlgmr.msra.gmra.mxu1 %vm728_vm5, %v1470_v2 }
 0xb7d   : > { %2537 = vmatpush3.bf16.msra.mxu1 %v1579_v1  ;;  %2542 = vmatprep.mubr.msk.bf16.mxu1 %vm2656_vm1, %v2655_v10 }
 0xb7e   : > { %2538 = vmatprep.subr.bf16.mxu1 %v2655_v10 }
 0xb81   : > { %2539 = vmatpush3.bf16.msra.mxu1 %v1578_v5 }
 0xb82   : > { %2540 = vmatprep.subr.bf16.mxu1 %v2655_v10 }
 0xb85   : > { %2541 = vmatpush3.bf16.msra.mxu1 %v1577_v8 }
 0xb86   : > { %2556 = vmatprep.subr.bf16.mxu1 %v2655_v10 }
 0xb88   : > { %2543 = vmatmul.mubr.msk.bf16.vlgmr.msra.gmra.mxu1 %vm440_vm0, %v2787_v29 }
 0xb89   : > { %2557 = vmatpush3.bf16.msra.mxu1 %v1695_v12  ;;  %2562 = vmatprep.mubr.msk.bf16.mxu1 %vm2656_vm1, %v2655_v10 }
 0xb8a   : > { %2558 = vmatprep.subr.bf16.mxu1 %v2655_v10 }
 0xb8d   : > { %2559 = vmatpush3.bf16.msra.mxu1 %v1694_v16 }
 0xb8e   : > { %2560 = vmatprep.subr.bf16.mxu1 %v2655_v10 }
 0xb91   : > { %2561 = vmatpush3.bf16.msra.mxu1 %v1693_v19  ;;  %v1888_v19 = vpack.c.bf16 %v2297_v18, %v2296_v17  ;;  %v2043_v18 = vld [vmem:[%s3321_s11] sm:$0xff] }
 0xb92   : > { %2578 = vmatprep.subr.bf16.mxu1 %v2655_v10 }
 0xb93   : > { %v1893_v20 = vsel %vm683_vm3, %v1888_v19, 0  ;;  %v2044_v19 = vld [vmem:[%s3321_s11 + $0x8] sm:$0xff] }
 0xb94   : > { %2563 = vmatmul.mubr.msk.bf16.vlgmr.msra.gmra.mxu1 %vm440_vm0, %v2787_v29 }
 0xb95   : > { %2580 = vmatprep.mubr.msk.bf16.mxu1 %vm2656_vm1, %v2655_v10  ;;  %2579 = vmatpush3.bf16.msra.mxu1 %v1893_v20  ;;  %v2060_v20 = vpack.c.bf16 %v2044_v19, %v2043_v18 }
 0xb96   : > { %2594 = vmatprep.subr.bf16.mxu1 %v2655_v10 }
 0xc3c   : > { %v1512_v14 = vpop.f32.mrf.mxu1 }
 0xc3d   : > { %v1521_v23 = vpack.c.bf16 %v1512_v14, %v1512_v14 }
 0xc3e   : > { %v2528_v27 = vpop.f32.mrf.mxu1 }
 0xc3f   : > { %2533 = vmatmul.mubr.msk.bf16.vlgmr.msra.gmra.mxu0 %vm679_vm4, %v1521_v23 }
 0xc40   : > { %2547 = vmatpush3.bf16.msra.mxu0 %v1637_v22  ;;  %v1515_v28 = vpop.f32.mrf.mxu1  ;;  %2552 = vmatprep.mubr.msk.bf16.mxu0 %vm2656_vm1, %v2655_v10 }
 0xc41   : > { %2548 = vmatprep.subr.bf16.mxu0 %v2655_v10  ;;  %v2299_v28 = vld [vmem:[%s3316_s6] ss:$0 sm:$0xff] }
 0xc42   : > { %v2529_v33 = vpop.f32.mrf.mxu1 }
 0xc44   : > { %2549 = vmatpush3.bf16.msra.mxu0 %v1636_v30 }
 0xc45   : > { %2550 = vmatprep.subr.bf16.mxu0 %v2655_v10 }
 0xc48   : > { %v1622_v35 = vpop.f32.mrf.mxu1  ;;  %2551 = vmatpush3.bf16.msra.mxu0 %v1635_v34 }
 0xc49   : > { %2566 = vmatprep.subr.bf16.mxu0 %v2655_v10  ;;  %v1623_v57 = vadd.f32 %v2274_v54, %v1622_v35  ;;  %v2301_v54 = vld [vmem:[%s3318_s8] ss:$0 sm:$0xff] }
 0xc4a   : > { %v2544_v36 = vpop.f32.mrf.mxu1 }
 0xc4b   : > { %2553 = vmatmul.mubr.msk.bf16.vlgmr.msra.gmra.mxu0 %vm440_vm0, %v2787_v29  ;;  %v2283_v29 = vld [vmem:[%s3314_s4 + $0x7] ss:$0 sm:$0xff]  ;;  %v1776_v61 = vpack.c.bf16 %v1623_v57, %v1623_v57 }
 0xc4c   : > { %v1625_v37 = vpop.f32.mrf.mxu1  ;;  %2568 = vmatprep.mubr.msk.bf16.mxu0 %vm2656_vm1, %v2655_v10 }
 0xc4e   : > { %v2545_v38 = vpop.f32.mrf.mxu1 }
 0xc54   : > { %v1738_v39 = vpop.f32.mrf.mxu1 }
 0xc55   : > { %v1739_v55 = vadd.f32 %v2292_v63, %v1738_v39  ;;  %v2300_v63 = vld [vmem:[%s3317_s7] ss:$0 sm:$0xff] }
 0xc56   : > { %v2564_v40 = vpop.f32.mrf.mxu1 }
 0xc57   : > { %v1837_v59 = vpack.c.bf16 %v1739_v55, %v1739_v55 }
 0xc58   : > { %v1741_v41 = vpop.f32.mrf.mxu1 }
 0xc59   : > { %v1842_v62 = vsel %vm745_vm2, %v1837_v59, 0  ;;  %v2058_v59 = vld [vmem:[%s3321_s11 + $0x78] sm:$0xff] }
 0xc5a   : > { %v2565_v42 = vpop.f32.mrf.mxu1 }
 0xc5b   : > { %v1978_v42 = vld [vmem:[%s3319_s9 + $0x20] sm:$0xff] }
 0xcff   : > { %v1563_v44 = vpop.f32.mrf.mxu0 }
 0xd00   : > { %v3167_v45 = vadd.f32 %v1563_v44, %v1199_v43  ;;  %v1979_v43 = vld [vmem:[%s3319_s9 + $0x28] sm:$0xff] }
 0xd01   : > { %v2534_v46 = vpop.f32.mrf.mxu0  ;;  %v1983_v44 = vpack.c.bf16 %v1979_v43, %v1978_v42 }
 0xd02   : > { %v1977_v46 = vld [vmem:[%s3319_s9 + $0x18] sm:$0xff] }
 0xd03   : > { %v1566_v47 = vpop.f32.mrf.mxu0 }
 0xd05   : > { %v2535_v48 = vpop.f32.mrf.mxu0 }
 0xd06   : > { %v1974_v48 = vld [vmem:[%s3319_s9] sm:$0xff] }
 0xd0b   : > { %v1680_v49 = vpop.f32.mrf.mxu0 }
 0xd0c   : > { %v1681_v50 = vadd.f32 %v2283_v29, %v1680_v49  ;;  %v1975_v29 = vld [vmem:[%s3319_s9 + $0x8] sm:$0xff] }
 0xd0d   : > { %v2554_v51 = vpop.f32.mrf.mxu0  ;;  %v1981_v49 = vpack.c.bf16 %v1975_v29, %v1974_v48 }
 0xd0e   : > { %1744 = vxpose.xlu1.b32.start.end [1/1] (short) (narrow) %v1681_v50, 16 }
 0xd0f   : > { %v1683_v52 = vpop.f32.mrf.mxu0 }
 0xd11   : > { %v2555_v53 = vpop.f32.mrf.mxu0 }
 0xd8a   : > { %v1760_v24 = vpop.trf.xlu1 }
 0xd8e   : > { %v1761_v56 = vpop.trf.xlu1 }
 0xd8f   : > { %v1777_v58 = vpack.c.bf16 %v1761_v56, %v1760_v24 }
 0xd91   : > { %v1782_v60 = vsel %vm683_vm3, %v1777_v58, 0  ;;  %v2057_v58 = vld [vmem:[%s3321_s11 + $0x70] sm:$0xff] }
 0xd92   : > { %2567 = vmatpush3.bf16.msra.mxu0 %v1782_v60  ;;  %v2067_v60 = vpack.c.bf16 %v2058_v59, %v2057_v58 }
 0xd93   : > { %2572 = vmatprep.subr.bf16.mxu0 %v2655_v10 }
 0xd95   : > { %2569 = vmatmul.mubr.msk.bf16.vlgmr.msra.gmra.mxu0 %vm679_vm4, %v1776_v61  ;;  %v2055_v61 = vld [vmem:[%s3321_s11 + $0x60] sm:$0xff] }
 0xd96   : > { %2573 = vmatpush3.bf16.msra.mxu0 %v1842_v62  ;;  %2574 = vmatprep.mubr.msk.bf16.mxu0 %vm2656_vm1, %v2655_v10  ;;  %v2056_v62 = vld [vmem:[%s3321_s11 + $0x68] sm:$0xff] }
 0xd97   : > { %2584 = vmatprep.subr.bf16.mxu0 %v2655_v10 }
 0xe55   : > { %v1818_v0 = vpop.f32.mrf.mxu0 }
 0xe56   : > { %v1824_v1 = vmul.f32 0.28867513, %v1818_v0  ;;  %v2066_v0 = vpack.c.bf16 %v2056_v62, %v2055_v61 }
 0xe57   : > { %v2570_v2 = vpop.f32.mrf.mxu0 }
 0xe58   : > { %v1825_v3 = vsel %vm728_vm5, %v1824_v1, -inf  ;;  %v2054_v2 = vld [vmem:[%s3321_s11 + $0x58] sm:$0xff] }
 0xe59   : > { %1826 = vmax.xlane.f32.xlu0 %v1825_v3  ;;  %v1821_v4 = vpop.f32.mrf.mxu0 }
 0xe5a   : > { %v2051_v4 = vld [vmem:[%s3321_s11 + $0x40] sm:$0xff] }
 0xe5b   : > { %v2571_v5 = vpop.f32.mrf.mxu0 }
 0xe5c   : > { %v2052_v5 = vld [vmem:[%s3321_s11 + $0x48] sm:$0xff] }
 0xee2   : > { %v1827_v6 = vpop.xlane.xlu0 %1826 }
 0xee3   : > { %v1828_v7 = vsub.f32 %v1824_v1, %v1827_v6  ;;  %v2053_v1 = vld [vmem:[%s3321_s11 + $0x50] sm:$0xff] }
 0xee4   : > { %v2065_v3 = vpack.c.bf16 %v2054_v2, %v2053_v1  ;;  %v2049_v6 = vld [vmem:[%s3321_s11 + $0x30] sm:$0xff] }
 0xee5   : > { %v1829_v8 = vmul.f32 1.442695, %v1828_v7  ;;  %v2064_v7 = vpack.c.bf16 %v2052_v5, %v2051_v4 }
 0xee7   : > { %2638 = vpow2.f32 %v1829_v8  ;;  %v2050_v8 = vld [vmem:[%s3321_s11 + $0x38] sm:$0xff] }
 0xef4   : > { %v2639_v9 = vpop.eup %2638 }
 0xef5   : > { %v1831_v11 = vsel %vm728_vm5, %v2639_v9, 0.0 }
 0xef6   : > { %1832 = vadd.xlane.f32.xlu1 %v1831_v11  ;;  %v2047_v11 = vld [vmem:[%s3321_s11 + $0x20] sm:$0xff] }
 0xf7f   : > { %v1833_v12 = vpop.xlane.xlu1 %1832 }
 0xf80   : > { %2640 = vrcp.f32 %v1833_v12  ;;  %v2048_v12 = vld [vmem:[%s3321_s11 + $0x28] sm:$0xff] }
 0xf8d   : > { %v2641_v13 = vpop.eup %2640 }
 0xf8e   : > { %v1835_v15 = vmul.f32 %v2641_v13, %v2639_v9  ;;  %v2063_v9 = vpack.c.bf16 %v2050_v8, %v2049_v6  ;;  %v2062_v13 = vpack.c.bf16 %v2048_v12, %v2047_v11 }
 0xf90   : > { %v1836_v16 = vpack.c.bf16 %v1835_v15, %v1835_v15  ;;  %v2045_v15 = vld [vmem:[%s3321_s11 + $0x10] sm:$0xff] }
 0xf92   : > { %2575 = vmatmul.mubr.msk.bf16.vlgmr.msra.gmra.mxu0 %vm728_vm5, %v1836_v16  ;;  %v2046_v16 = vld [vmem:[%s3321_s11 + $0x18] sm:$0xff] }
 0xf93   : > { %2590 = vmatprep.mubr.msk.bf16.mxu0 %vm2656_vm1, %v2655_v10  ;;  %2585 = vmatpush3.bf16.msra.mxu0 %v1983_v44  ;;  %v2061_v17 = vpack.c.bf16 %v2046_v16, %v2045_v15 }
 0xf94   : > { %2586 = vmatprep.subr.bf16.mxu0 %v2655_v10 }
0x1052   : > { %v1878_v21 = vpop.f32.mrf.mxu0 }
0x1053   : > { %v1887_v14 = vpack.c.bf16 %v1878_v21, %v1878_v21  ;;  %v2302_v21 = vld [vmem:[%s3320_s10] ss:$0 sm:$0xff] }
0x1054   : > { %v2576_v22 = vpop.f32.mrf.mxu0 }
0x1055   : > { %2581 = vmatmul.mubr.msk.bf16.vlgmr.msra.gmra.mxu1 %vm679_vm4, %v1887_v14 }
0x1056   : > { %v1881_v23 = vpop.f32.mrf.mxu0  ;;  %2610 = vmatprep.mubr.msk.bf16.mxu1 %vm2656_vm1, %v2655_v10  ;;  %2595 = vmatpush3.bf16.msra.mxu1 %v2067_v60 }
0x1057   : > { %2596 = vmatprep.subr.bf16.mxu1 %v2655_v10 }
0x1058   : > { %v2577_v25 = vpop.f32.mrf.mxu0 }
0x105a   : > { %2597 = vmatpush3.bf16.msra.mxu1 %v2066_v0 }
0x105b   : > { %2598 = vmatprep.subr.bf16.mxu1 %v2655_v10 }
0x105e   : > { %2599 = vmatpush3.bf16.msra.mxu1 %v2065_v3 }
0x105f   : > { %2600 = vmatprep.subr.bf16.mxu1 %v2655_v10 }
0x1062   : > { %2601 = vmatpush3.bf16.msra.mxu1 %v2064_v7 }
0x1063   : > { %2602 = vmatprep.subr.bf16.mxu1 %v2655_v10 }
0x1066   : > { %2603 = vmatpush3.bf16.msra.mxu1 %v2063_v9 }
0x1067   : > { %2604 = vmatprep.subr.bf16.mxu1 %v2655_v10 }
0x106a   : > { %2605 = vmatpush3.bf16.msra.mxu1 %v2062_v13 }
0x106b   : > { %2606 = vmatprep.subr.bf16.mxu1 %v2655_v10 }
0x106e   : > { %2607 = vmatpush3.bf16.msra.mxu1 %v2061_v17 }
0x106f   : > { %2608 = vmatprep.subr.bf16.mxu1 %v2655_v10 }
0x1072   : > { %2609 = vmatpush3.bf16.msra.mxu1 %v2060_v20 }
0x1115   : > { %v1929_v26 = vpop.f32.mrf.mxu1 }
0x1116   : > { %v1935_v27 = vadd.f32 %v1929_v26, %v3167_v45  ;;  %v1976_v45 = vld [vmem:[%s3319_s9 + $0x10] sm:$0xff] }
0x1117   : > { %v2582_v30 = vpop.f32.mrf.mxu1  ;;  %v1982_v47 = vpack.c.bf16 %v1977_v46, %v1976_v45 }
0x1118   : > { %v1936_v32 = vadd.f32 %v2646_v31, %v1935_v27 }
0x1119   : > { %v1932_v33 = vpop.f32.mrf.mxu1  ;;  %2587 = vmatpush3.bf16.msra.mxu0 %v1982_v47 }
0x111a   : > { %v3206_v34 = vadd.f32 %v2299_v28, %v1936_v32  ;;  %2588 = vmatprep.subr.bf16.mxu0 %v2655_v10 }
0x111b   : > { %v2583_v35 = vpop.f32.mrf.mxu1 }
0x111c   : > { %v1947_v36 = vsel %vm440_vm0, %v3206_v34, 0.0 }
0x111d   : > { %1948 = vadd.xlane.f32.xlu0 %v1947_v36  ;;  %2589 = vmatpush3.bf16.msra.mxu0 %v1981_v49 }
0x11a6   : > { %v1949_v37 = vpop.xlane.xlu0 %1948 }
0x11a7   : > { %v1950_v38 = vmul.f32 0.020833334, %v1949_v37 }
0x11a9   : > { %v1951_v39 = vsub.f32 %v3206_v34, %v1950_v38 }
0x11ab   : > { %v1952_v40 = vmul.f32 %v1951_v39, %v1951_v39 }
0x11ad   : > { %v1953_v41 = vsel %vm440_vm0, %v1952_v40, 0.0 }
0x11ae   : > { %1954 = vadd.xlane.f32.xlu0 %v1953_v41 }
0x1237   : > { %v1955_v50 = vpop.xlane.xlu0 %1954 }
0x1238   : > { %v1956_v51 = vmul.f32 0.020833334, %v1955_v50 }
0x123a   : > { %v1957_v52 = vadd.f32 1e-05, %v1956_v51 }
0x123c   : > { %2642 = vrsqrt.f32 %v1957_v52 }
0x1249   : > { %v2643_v53 = vpop.eup %2642 }
0x124a   : > { %v1959_v24 = vmul.f32 %v2643_v53, %v1951_v39  ;;  %v2304_v39 = vld [vmem:[%s3322_s12] ss:$0 sm:$0xff] }
0x124c   : > { %v1966_v55 = vmul.f32 %v2300_v63, %v1959_v24 }
0x124e   : > { %v1973_v56 = vadd.f32 %v2301_v54, %v1966_v55 }
0x1250   : > { %v1980_v57 = vpack.c.bf16 %v1973_v56, %v1973_v56 }
0x1252   : > { %2591 = vmatmul.mubr.msk.bf16.vlgmr.msra.gmra.mxu0 %vm440_vm0, %v1980_v57 }
0x1312   : > { %v2028_v14 = vpop.f32.mrf.mxu0 }
0x1313   : > { %v2029_v22 = vadd.f32 %v2302_v21, %v2028_v14 }
0x1314   : > { %v2592_v23 = vpop.f32.mrf.mxu0 }
0x1315   : > { %v2035_v25 = vmul.f32 0.044715, %v2029_v22  ;;  %v2034_v35 = vmul.f32 0.5, %v2029_v22 }
0x1316   : > { %v2031_v26 = vpop.f32.mrf.mxu0 }
0x1317   : > { %v2036_v27 = vmul.f32 %v2035_v25, %v2029_v22 }
0x1318   : > { %v2593_v28 = vpop.f32.mrf.mxu0 }
0x1319   : > { %v2037_v30 = vmul.f32 %v2036_v27, %v2029_v22 }
0x131b   : > { %v2038_v31 = vadd.f32 %v2037_v30, %v2029_v22 }
0x131d   : > { %v2039_v32 = vmul.f32 0.7978846, %v2038_v31 }
0x131f   : > { %2644 = vtanh.f32 %v2039_v32 }
0x132c   : > { %v2645_v33 = vpop.eup %2644 }
0x132d   : > { %v2041_v10 = vadd.f32 1.0, %v2645_v33 }
0x132f   : > { %v2042_v36 = vmul.f32 %v2041_v10, %v2034_v35 }
0x1331   : > { %v2059_v37 = vpack.c.bf16 %v2042_v36, %v2042_v36 }
0x1333   : > { %2611 = vmatmul.mubr.bf16.vlgmr.msra.gmra.mxu1 %v2059_v37 }
0x13f3   : > { %v2102_v38 = vpop.f32.mrf.mxu1 }
0x13f4   : > { %v2108_v40 = vadd.f32 %v2102_v38, %v3206_v34 }
0x13f5   : > { %v2612_v41 = vpop.f32.mrf.mxu1 }
0x13f6   : > { %v2116_v42 = vadd.f32 %v2304_v39, %v2108_v40 }
0x13f7   : > { %v2105_v43 = vpop.f32.mrf.mxu1 }
0x13f8   : > { %2117 = vst.msk [vmem:[%s435_s20] sm:$0xff] %vm440_vm0, %v2116_v42 }
0x13f9   : > { %v2613_v44 = vpop.f32.mrf.mxu1 }
0x13fa PF: > { %s23_s25 = sadd.s32 1, %s2653_s25  }
0x13fb   : > { %p20_p4 = scmp.ge.s32.totalorder %s23_s25, 4  }
0x13fd   :  { %22 = sbr.rel (!%p20_p4) target bundleno = 1 (0x1), region = 127 }

</bundles_post_ra>
